<compile_context>
chip_gen: v7x
topology: tpu7x:2x2x1
jax: 0.10.0
libtpu: 0.0.40
codegen_flags: <defaults>
</compile_context>

<pallas_src>
import math
from functools import partial

import jax
import jax.numpy as jnp
from jax import lax
from jax.experimental import pallas as pl
from jax.experimental.pallas import tpu as pltpu

HIDDEN = 64  # GRU hidden size per direction (matches nn.GRU(32, 64, ...))


# ------------------------------ Pallas kernel ------------------------------ #

def _bigru_recurrence(gates_ref, seqf_ref, seqb_ref, whh_ref, bhn_ref, L, H, unroll):
    """Fused fwd+bwd GRU recurrence over direction-aligned gates.

    gates_ref : (L, 6H) f32; row t holds fwd gates of x[t] and bwd gates of
                x[L-1-t], columns interleaved [rf rb | zf zb | nf nb].
    seqf_ref  : (L, 2H) write-only; row t's LEFT half = fwd output at t.
    seqb_ref  : (L, 2H) write-only; row s's RIGHT half = bwd output at s.
    whh_ref   : (2H, 6H) bf16 block-structured hidden->gate weights (no bias).
    bhn_ref   : (1, 2H) f32 hidden bias of the n gate only (r/z folded into b_ih).
    """
    f32 = jnp.float32
    whh = whh_ref[...]     # hoisted out of the loop (loop-invariant, bf16)
    bhn = bhn_ref[...]     # hoisted (f32)

    def step(t, h):
        g = gates_ref[pl.ds(t, 1), :]                                    # (1, 6H)
        hh = jnp.dot(h.astype(jnp.bfloat16), whh, preferred_element_type=f32)
        r = jax.nn.sigmoid(g[:, :2 * H] + hh[:, :2 * H])                 # [rf|rb]
        z = jax.nn.sigmoid(g[:, 2 * H:4 * H] + hh[:, 2 * H:4 * H])       # [zf|zb]
        n = jnp.tanh(g[:, 4 * H:] + r * (hh[:, 4 * H:] + bhn))           # [nf|nb]
        h_new = n + z * (h - n)                                          # (1, 2H)
        # Write-only, full-lane (unmasked) stores.
        seqf_ref[pl.ds(t, 1), :] = h_new
        seqb_ref[pl.ds(L - 1 - t, 1), :] = h_new
        return h_new

    # TODO(synk): hold W_hh resident across the loop via pltpu.matmul_push_rhs /
    # matmul_acc_lhs / matmul_pop once the 6H=384-wide RHS staging constraints are
    # validated per generation; bf16 operands already cut the per-step MXU cost.
    lax.fori_loop(0, L, step, jnp.zeros((1, 2 * H), f32), unroll=unroll)


def _net_kernel(rev_ref, a_ref, x_ref,
                w1_ref, b1_ref, w2_ref, b2_ref,
                wih0_ref, bih0_ref, whh0_ref, bhn0_ref,
                wih1_ref, bih1_ref, whh1_ref, bhn1_ref,
                linw_ref, linb_ref,
                o_ref,
                gates_scr, seqf_scr, seqb_scr):
    f32, bf16 = jnp.float32, jnp.bfloat16
    H = whh0_ref.shape[0] // 2
    L = a_ref.shape[0]
    unroll = True if L <= 32 else 8

    fwd_cols = (lax.broadcasted_iota(jnp.int32, (1, 6 * H), 1) % (2 * H)) < H
    left_half = lax.broadcasted_iota(jnp.int32, (1, 2 * H), 1) < H

    a = a_ref[...]        # bf16 normalized adjacency
    rev = rev_ref[...]    # bf16 anti-identity (exact 0/1 values)

    # ---- GCNConv1 + ReLU ----
    h = jnp.dot(x_ref[...].astype(bf16), w1_ref[...], preferred_element_type=f32)
    h = jnp.maximum(
        jnp.dot(a, h.astype(bf16), preferred_element_type=f32) + b1_ref[...], 0.0)
    # TODO(synk): F.dropout(x, training=self.training) — identity in eval mode.

    # ---- GCNConv2 + ReLU ----
    h = jnp.dot(h.astype(bf16), w2_ref[...], preferred_element_type=f32)
    h = jnp.maximum(
        jnp.dot(a, h.astype(bf16), preferred_element_type=f32) + b2_ref[...], 0.0)

    def gate_proj(inp_f32, wih_ref, bih_ref):
        """Direction-aligned gate projections in one vectorized pass."""
        xb = inp_f32.astype(bf16)
        # Exact row reversal of the bf16 input via 0/1 anti-identity matmul.
        xr = jnp.dot(rev, xb, preferred_element_type=f32).astype(bf16)
        gf = jnp.dot(xb, wih_ref[...], preferred_element_type=f32)   # fwd-ordered
        gb = jnp.dot(xr, wih_ref[...], preferred_element_type=f32)   # reversed
        gates_scr[...] = jnp.where(fwd_cols, gf, gb) + bih_ref[...]

    # ---- BiGRU layer 0 ----
    gate_proj(h, wih0_ref, bih0_ref)
    _bigru_recurrence(gates_scr, seqf_scr, seqb_scr, whh0_ref, bhn0_ref, L, H, unroll)
    seq = jnp.where(left_half, seqf_scr[...], seqb_scr[...])
    # TODO(synk): GRU inter-layer dropout=0.5 — identity in eval mode.

    # ---- BiGRU layer 1 (scratch buffers reused) ----
    gate_proj(seq, wih1_ref, bih1_ref)
    _bigru_recurrence(gates_scr, seqf_scr, seqb_scr, whh1_ref, bhn1_ref, L, H, unroll)
    seq = jnp.where(left_half, seqf_scr[...], seqb_scr[...])

    # ---- Final Linear(2H, padded_classes), lane-dense 128-wide output ----
    o_ref[...] = (jnp.dot(seq.astype(bf16), linw_ref[...], preferred_element_type=f32)
                  + linb_ref[...])


def _net_pallas(a_norm_bf16, rev_bf16, x, p):
    n = x.shape[0]
    H = HIDDEN
    padded_c = p["lin_w"].shape[1]

    operands = (rev_bf16, a_norm_bf16, x,
                p["gcn1_w"], p["gcn1_b"], p["gcn2_w"], p["gcn2_b"],
                p["gru0"]["wih"], p["gru0"]["bih"], p["gru0"]["whh"], p["gru0"]["bhn"],
                p["gru1"]["wih"], p["gru1"]["bih"], p["gru1"]["whh"], p["gru1"]["bhn"],
                p["lin_w"], p["lin_b"])

    # Derive the VMEM limit from actual buffer sizes (2x for buffering + margin).
    in_bytes = sum(int(o.size) * o.dtype.itemsize for o in operands)
    out_bytes = 4 * n * padded_c
    scratch_bytes = 4 * (n * 6 * H + 2 * n * 2 * H)
    vmem_limit = int(min(max(2 * (in_bytes + out_bytes) + scratch_bytes + (4 << 20),
                             16 << 20), 96 << 20))

    # TODO(synk): for large N, row-tile A / activations / output with a BlockSpec
    # grid ('parallel' row axis) — required on v7x (64 MiB VMEM, 2 TensorCores).
    return pl.pallas_call(
        _net_kernel,
        out_shape=jax.ShapeDtypeStruct((n, padded_c), jnp.float32),
        scratch_shapes=[
            pltpu.VMEM((n, 6 * H), jnp.float32),   # direction-aligned gates (reused)
            pltpu.VMEM((n, 2 * H), jnp.float32),   # fwd-half outputs (write-only)
            pltpu.VMEM((n, 2 * H), jnp.float32),   # bwd-half outputs (write-only)
        ],
        compiler_params=pltpu.CompilerParams(vmem_limit_bytes=vmem_limit),
    )(*operands)


# ------------------------------- glue (JAX) -------------------------------- #

def normalized_adjacency(edge_index, num_nodes):
    # PyG GCNConv: A_hat = A + I, D_hat = deg(A_hat), D^-1/2 A_hat D^-1/2  (f32)
    src, dst = edge_index[0], edge_index[1]
    a = jnp.zeros((num_nodes, num_nodes), jnp.float32)
    a = a.at[dst, src].add(1.0)                            # message src -> dst
    a = a + jnp.eye(num_nodes, dtype=jnp.float32)          # self loops
    deg = a.sum(axis=1)
    d_inv_sqrt = jnp.where(deg > 0, lax.rsqrt(deg), 0.0)
    return d_inv_sqrt[:, None] * a * d_inv_sqrt[None, :]


@partial(jax.jit, static_argnames=("num_classes",))
def net_forward(params, x, edge_index, *, num_classes):
    n = x.shape[0]
    a_norm = normalized_adjacency(edge_index, n).astype(jnp.bfloat16)
    rev = jnp.flip(jnp.eye(n, dtype=jnp.float32), axis=0).astype(jnp.bfloat16)
    out = _net_pallas(a_norm, rev, x, params)
    return out[:, :num_classes]


# --------------------------- parameter packing ----------------------------- #

def _uniform(key, shape, bound):
    return jax.random.uniform(key, shape, jnp.float32, -bound, bound)


def _pack_bigru(w_ih_f, w_hh_f, b_ih_f, b_hh_f,
                w_ih_b, w_hh_b, b_ih_b, b_hh_b, hidden):
    """Pack PyTorch-layout per-direction GRU weights into the fused layout.

    Column order for all 6H-wide tensors: [r_f r_b z_f z_b n_f n_b] so each of
    the r / z / n slices used in the kernel is exactly 2H = 128 lanes.  b_hh for
    the r/z gates is folded into b_ih; only b_hn is kept separately.
    """
    H = hidden
    wih_cols, bih_cols = [], []
    whh = jnp.zeros((2 * H, 6 * H), jnp.float32)
    for g in range(3):   # 0=r, 1=z, 2=n
        wih_cols += [w_ih_f[g * H:(g + 1) * H, :].T, w_ih_b[g * H:(g + 1) * H, :].T]
        bi_f = b_ih_f[g * H:(g + 1) * H]
        bi_b = b_ih_b[g * H:(g + 1) * H]
        if g < 2:   # fold hidden bias of r/z into the input bias
            bi_f = bi_f + b_hh_f[g * H:(g + 1) * H]
            bi_b = bi_b + b_hh_b[g * H:(g + 1) * H]
        bih_cols += [bi_f, bi_b]
        whh = whh.at[:H, (2 * g) * H:(2 * g + 1) * H].set(w_hh_f[g * H:(g + 1) * H, :].T)
        whh = whh.at[H:, (2 * g + 1) * H:(2 * g + 2) * H].set(w_hh_b[g * H:(g + 1) * H, :].T)
    bhn = jnp.concatenate([b_hh_f[2 * H:], b_hh_b[2 * H:]]).reshape(1, 2 * H)
    return {
        "wih": jnp.concatenate(wih_cols, axis=1).astype(jnp.bfloat16),  # (in, 6H)
        "bih": jnp.concatenate(bih_cols).reshape(1, 6 * H),             # (1, 6H) f32
        "whh": whh.astype(jnp.bfloat16),                                # (2H, 6H)
        "bhn": bhn,                                                     # (1, 2H) f32
    }


def init_params(key, num_features, num_classes, hidden=HIDDEN):
    keys = jax.random.split(key, 64)
    ki = iter(keys)
    p = {}
    # GCNConv weights, stored (in, out) bf16; biases stored as (1, out) f32 rows.
    p["gcn1_w"] = _uniform(next(ki), (num_features, 16),
                           1.0 / math.sqrt(num_features)).astype(jnp.bfloat16)
    p["gcn1_b"] = jnp.zeros((1, 16), jnp.float32)
    p["gcn2_w"] = _uniform(next(ki), (16, 32), 1.0 / math.sqrt(16.0)).astype(jnp.bfloat16)
    p["gcn2_b"] = jnp.zeros((1, 32), jnp.float32)

    def gru_layer(in_dim):
        bnd = 1.0 / math.sqrt(hidden)
        raw = {
            name: _uniform(next(ki), shape, bnd)
            for name, shape in [
                ("w_ih_f", (3 * hidden, in_dim)), ("w_hh_f", (3 * hidden, hidden)),
                ("b_ih_f", (3 * hidden,)), ("b_hh_f", (3 * hidden,)),
                ("w_ih_b", (3 * hidden, in_dim)), ("w_hh_b", (3 * hidden, hidden)),
                ("b_ih_b", (3 * hidden,)), ("b_hh_b", (3 * hidden,)),
            ]
        }
        return _pack_bigru(raw["w_ih_f"], raw["w_hh_f"], raw["b_ih_f"], raw["b_hh_f"],
                           raw["w_ih_b"], raw["w_hh_b"], raw["b_ih_b"], raw["b_hh_b"],
                           hidden)

    p["gru0"] = gru_layer(32)            # layer 0: input 32
    p["gru1"] = gru_layer(2 * hidden)    # layer 1: input 128 (bidirectional)

    # Linear(128, num_classes), padded to a lane-dense multiple of 128 columns.
    padded_c = ((num_classes + 127) // 128) * 128
    lb = 1.0 / math.sqrt(2 * hidden)
    lin_w = _uniform(next(ki), (2 * hidden, num_classes), lb)
    lin_b = _uniform(next(ki), (1, num_classes), lb)
    p["lin_w"] = (jnp.zeros((2 * hidden, padded_c), jnp.float32)
                  .at[:, :num_classes].set(lin_w).astype(jnp.bfloat16))
    p["lin_b"] = jnp.zeros((1, padded_c), jnp.float32).at[:, :num_classes].set(lin_b)
    return p


# ---------------------------------- main ----------------------------------- #

if __name__ == "__main__":
    num_nodes = 8
    num_features = 4
    num_classes = 3

    key = jax.random.PRNGKey(0)
    k_x, k_p = jax.random.split(key)

    x = jax.random.normal(k_x, (num_nodes, num_features), jnp.float32)
    # Deterministic ring graph, edges in both directions.
    src = jnp.arange(num_nodes, dtype=jnp.int32)
    dst = (src + 1) % num_nodes
    edge_index = jnp.stack(
        [jnp.concatenate([src, dst]), jnp.concatenate([dst, src])], axis=0
    )

    params = init_params(k_p, num_features, num_classes)

    out = net_forward(params, x, edge_index, num_classes=num_classes)
    out = jax.block_until_ready(out)

    assert out.shape == (num_nodes, num_classes)
    assert bool(jnp.all(jnp.isfinite(out)))
    print("KERNEL_OK")
</pallas_src>

<mosaic_0001>
module attributes {stable_mosaic.version = 11 : i64} {
  func.func private @main(%arg0: i32) attributes {dimension_semantics = [#tpu.dimension_semantics<core_parallel>], iteration_bounds = array<i64: 2>, tpu.core_type = #tpu.core_type<sc_scalar_subcore>, window_params = []} {
    return
  }
}

module attributes {stable_mosaic.version = 11 : i64} {
  func.func private @main(%arg0: i32) attributes {dimension_semantics = [#tpu.dimension_semantics<core_parallel>], iteration_bounds = array<i64: 2>, tpu.core_type = #tpu.core_type<sc_scalar_subcore>, window_params = []} {
    return
  }
}

module attributes {stable_mosaic.version = 11 : i64} {
  func.func @_net_kernel(%arg0: memref<8x8xbf16, #tpu.memory_space<vmem>>, %arg1: memref<8x8xbf16, #tpu.memory_space<vmem>>, %arg2: memref<8x4xf32, #tpu.memory_space<vmem>>, %arg3: memref<4x16xbf16, #tpu.memory_space<vmem>>, %arg4: memref<1x16xf32, #tpu.memory_space<vmem>>, %arg5: memref<16x32xbf16, #tpu.memory_space<vmem>>, %arg6: memref<1x32xf32, #tpu.memory_space<vmem>>, %arg7: memref<32x384xbf16, #tpu.memory_space<vmem>>, %arg8: memref<1x384xf32, #tpu.memory_space<vmem>>, %arg9: memref<128x384xbf16, #tpu.memory_space<vmem>>, %arg10: memref<1x128xf32, #tpu.memory_space<vmem>>, %arg11: memref<128x384xbf16, #tpu.memory_space<vmem>>, %arg12: memref<1x384xf32, #tpu.memory_space<vmem>>, %arg13: memref<128x384xbf16, #tpu.memory_space<vmem>>, %arg14: memref<1x128xf32, #tpu.memory_space<vmem>>, %arg15: memref<128x128xbf16, #tpu.memory_space<vmem>>, %arg16: memref<1x128xf32, #tpu.memory_space<vmem>>, %arg17: memref<8x128xf32, #tpu.memory_space<vmem>>, %arg18: memref<8x384xf32, #tpu.memory_space<vmem>>, %arg19: memref<8x128xf32, #tpu.memory_space<vmem>>, %arg20: memref<8x128xf32, #tpu.memory_space<vmem>>) attributes {dimension_semantics = [], scalar_prefetch = 0 : i64, scratch_operands = 3 : i64, tpu.core_type = #tpu.core_type<tc>} {
    %0 = tpu.iota {dimensions = array<i32: 1>} : vector<1x384xi32>
    %c128_i32 = arith.constant 128 : i32
    %c0_i32 = arith.constant 0 : i32
    %1 = arith.cmpi eq, %c128_i32, %c0_i32 : i32
    %c1_i32 = arith.constant 1 : i32
    %2 = arith.select %1, %c1_i32, %c128_i32 : i32
    %3 = vector.broadcast %2 : i32 to vector<1x384xi32>
    %4 = arith.remsi %0, %3 : vector<1x384xi32>
    %c0_i32_0 = arith.constant 0 : i32
    %5 = vector.broadcast %c0_i32_0 : i32 to vector<1x384xi32>
    %6 = arith.cmpi ne, %4, %5 : vector<1x384xi32>
    %c0_i32_1 = arith.constant 0 : i32
    %7 = vector.broadcast %c0_i32_1 : i32 to vector<1x384xi32>
    %8 = arith.cmpi slt, %4, %7 : vector<1x384xi32>
    %c0_i32_2 = arith.constant 0 : i32
    %9 = arith.cmpi slt, %2, %c0_i32_2 : i32
    %10 = vector.broadcast %9 : i1 to vector<1x384xi1>
    %11 = vector.broadcast %10 : vector<1x384xi1> to vector<1x384xi1>
    %12 = arith.xori %8, %11 : vector<1x384xi1>
    %13 = arith.andi %12, %6 : vector<1x384xi1>
    %14 = vector.broadcast %2 : i32 to vector<1x384xi32>
    %15 = arith.addi %4, %14 : vector<1x384xi32>
    %16 = arith.select %13, %15, %4 : vector<1x384xi1>, vector<1x384xi32>
    %c64_i32 = arith.constant 64 : i32
    %17 = vector.broadcast %c64_i32 : i32 to vector<1x384xi32>
    %18 = arith.cmpi slt, %16, %17 : vector<1x384xi32>
    %19 = tpu.iota {dimensions = array<i32: 1>} : vector<1x128xi32>
    %c64_i32_3 = arith.constant 64 : i32
    %20 = vector.broadcast %c64_i32_3 : i32 to vector<1x128xi32>
    %21 = arith.cmpi slt, %19, %20 : vector<1x128xi32>
    %c0 = arith.constant 0 : index
    %c0_4 = arith.constant 0 : index
    %22 = vector.load %arg1[%c0, %c0_4] : memref<8x8xbf16, #tpu.memory_space<vmem>>, vector<8x8xbf16>
    %c0_5 = arith.constant 0 : index
    %c0_6 = arith.constant 0 : index
    %23 = vector.load %arg0[%c0_5, %c0_6] : memref<8x8xbf16, #tpu.memory_space<vmem>>, vector<8x8xbf16>
    %c0_7 = arith.constant 0 : index
    %c0_8 = arith.constant 0 : index
    %24 = vector.load %arg2[%c0_7, %c0_8] : memref<8x4xf32, #tpu.memory_space<vmem>>, vector<8x4xf32>
    %25 = arith.truncf %24 : vector<8x4xf32> to vector<8x4xbf16>
    %c0_9 = arith.constant 0 : index
    %c0_10 = arith.constant 0 : index
    %26 = vector.load %arg3[%c0_9, %c0_10] : memref<4x16xbf16, #tpu.memory_space<vmem>>, vector<4x16xbf16>
    %cst = arith.constant dense<0.000000e+00> : vector<8x16xf32>
    %27 = tpu.matmul %25, %26, %cst {dimension_numbers = #tpu.dot_dimension_numbers<[1], [0], [0], [1], [0, 0, 1, 1], [], []>} : vector<8x4xbf16>, vector<4x16xbf16>, vector<8x16xf32> -> vector<8x16xf32>
    %28 = arith.truncf %27 : vector<8x16xf32> to vector<8x16xbf16>
    %cst_11 = arith.constant dense<0.000000e+00> : vector<8x16xf32>
    %29 = tpu.matmul %22, %28, %cst_11 {dimension_numbers = #tpu.dot_dimension_numbers<[1], [0], [0], [1], [0, 0, 1, 1], [], []>} : vector<8x8xbf16>, vector<8x16xbf16>, vector<8x16xf32> -> vector<8x16xf32>
    %c0_12 = arith.constant 0 : index
    %c0_13 = arith.constant 0 : index
    %30 = vector.load %arg4[%c0_12, %c0_13] : memref<1x16xf32, #tpu.memory_space<vmem>>, vector<1x16xf32>
    %31 = vector.broadcast %30 : vector<1x16xf32> to vector<8x16xf32>
    %32 = arith.addf %29, %31 : vector<8x16xf32>
    %cst_14 = arith.constant 0.000000e+00 : f32
    %33 = vector.broadcast %cst_14 : f32 to vector<8x16xf32>
    %34 = arith.maximumf %32, %33 : vector<8x16xf32>
    %35 = arith.truncf %34 : vector<8x16xf32> to vector<8x16xbf16>
    %c0_15 = arith.constant 0 : index
    %c0_16 = arith.constant 0 : index
    %36 = vector.load %arg5[%c0_15, %c0_16] : memref<16x32xbf16, #tpu.memory_space<vmem>>, vector<16x32xbf16>
    %cst_17 = arith.constant dense<0.000000e+00> : vector<8x32xf32>
    %37 = tpu.matmul %35, %36, %cst_17 {dimension_numbers = #tpu.dot_dimension_numbers<[1], [0], [0], [1], [0, 0, 1, 1], [], []>} : vector<8x16xbf16>, vector<16x32xbf16>, vector<8x32xf32> -> vector<8x32xf32>
    %38 = arith.truncf %37 : vector<8x32xf32> to vector<8x32xbf16>
    %cst_18 = arith.constant dense<0.000000e+00> : vector<8x32xf32>
    %39 = tpu.matmul %22, %38, %cst_18 {dimension_numbers = #tpu.dot_dimension_numbers<[1], [0], [0], [1], [0, 0, 1, 1], [], []>} : vector<8x8xbf16>, vector<8x32xbf16>, vector<8x32xf32> -> vector<8x32xf32>
    %c0_19 = arith.constant 0 : index
    %c0_20 = arith.constant 0 : index
    %40 = vector.load %arg6[%c0_19, %c0_20] : memref<1x32xf32, #tpu.memory_space<vmem>>, vector<1x32xf32>
    %41 = vector.broadcast %40 : vector<1x32xf32> to vector<8x32xf32>
    %42 = arith.addf %39, %41 : vector<8x32xf32>
    %cst_21 = arith.constant 0.000000e+00 : f32
    %43 = vector.broadcast %cst_21 : f32 to vector<8x32xf32>
    %44 = arith.maximumf %42, %43 : vector<8x32xf32>
    %45 = arith.truncf %44 : vector<8x32xf32> to vector<8x32xbf16>
    %cst_22 = arith.constant dense<0.000000e+00> : vector<8x32xf32>
    %46 = tpu.matmul %23, %45, %cst_22 {dimension_numbers = #tpu.dot_dimension_numbers<[1], [0], [0], [1], [0, 0, 1, 1], [], []>} : vector<8x8xbf16>, vector<8x32xbf16>, vector<8x32xf32> -> vector<8x32xf32>
    %47 = arith.truncf %46 : vector<8x32xf32> to vector<8x32xbf16>
    %c0_23 = arith.constant 0 : index
    %c0_24 = arith.constant 0 : index
    %48 = vector.load %arg7[%c0_23, %c0_24] : memref<32x384xbf16, #tpu.memory_space<vmem>>, vector<32x384xbf16>
    %cst_25 = arith.constant dense<0.000000e+00> : vector<8x384xf32>
    %49 = tpu.matmul %45, %48, %cst_25 {dimension_numbers = #tpu.dot_dimension_numbers<[1], [0], [0], [1], [0, 0, 1, 1], [], []>} : vector<8x32xbf16>, vector<32x384xbf16>, vector<8x384xf32> -> vector<8x384xf32>
    %c0_26 = arith.constant 0 : index
    %c0_27 = arith.constant 0 : index
    %50 = vector.load %arg7[%c0_26, %c0_27] : memref<32x384xbf16, #tpu.memory_space<vmem>>, vector<32x384xbf16>
    %cst_28 = arith.constant dense<0.000000e+00> : vector<8x384xf32>
    %51 = tpu.matmul %47, %50, %cst_28 {dimension_numbers = #tpu.dot_dimension_numbers<[1], [0], [0], [1], [0, 0, 1, 1], [], []>} : vector<8x32xbf16>, vector<32x384xbf16>, vector<8x384xf32> -> vector<8x384xf32>
    %52 = vector.shape_cast %18 : vector<1x384xi1> to vector<1x384xi1>
    %53 = vector.broadcast %52 : vector<1x384xi1> to vector<8x384xi1>
    %54 = arith.select %53, %49, %51 : vector<8x384xi1>, vector<8x384xf32>
    %c0_29 = arith.constant 0 : index
    %c0_30 = arith.constant 0 : index
    %55 = vector.load %arg8[%c0_29, %c0_30] : memref<1x384xf32, #tpu.memory_space<vmem>>, vector<1x384xf32>
    %56 = vector.broadcast %55 : vector<1x384xf32> to vector<8x384xf32>
    %57 = arith.addf %54, %56 : vector<8x384xf32>
    %c0_31 = arith.constant 0 : index
    %c0_32 = arith.constant 0 : index
    %58 = vector.load %arg18[%c0_31, %c0_32] : memref<8x384xf32, #tpu.memory_space<vmem>>, vector<8x384xf32>
    tpu.vector_store %arg18[%c0_31, %c0_32], %57 {strides = array<i32>} : memref<8x384xf32, #tpu.memory_space<vmem>>, vector<8x384xf32>,
    %c0_33 = arith.constant 0 : index
    %c0_34 = arith.constant 0 : index
    %59 = vector.load %arg9[%c0_33, %c0_34] : memref<128x384xbf16, #tpu.memory_space<vmem>>, vector<128x384xbf16>
    %c0_35 = arith.constant 0 : index
    %c0_36 = arith.constant 0 : index
    %60 = vector.load %arg10[%c0_35, %c0_36] : memref<1x128xf32, #tpu.memory_space<vmem>>, vector<1x128xf32>
    %cst_37 = arith.constant 0.000000e+00 : f32
    %61 = vector.broadcast %cst_37 : f32 to vector<1x128xf32>
    %c0_i32_38 = arith.constant 0 : i32
    %62 = arith.index_cast %c0_i32_38 : i32 to index
    %c0_39 = arith.constant 0 : index
    %63 = vector.load %arg18[%62, %c0_39] : memref<8x384xf32, #tpu.memory_space<vmem>>, vector<1x384xf32>
    %64 = arith.truncf %61 : vector<1x128xf32> to vector<1x128xbf16>
    %cst_40 = arith.constant dense<0.000000e+00> : vector<1x384xf32>
    %65 = tpu.matmul %64, %59, %cst_40 {dimension_numbers = #tpu.dot_dimension_numbers<[1], [0], [0], [1], [0, 0, 1, 1], [], []>} : vector<1x128xbf16>, vector<128x384xbf16>, vector<1x384xf32> -> vector<1x384xf32>
    %66 = vector.extract_strided_slice %63 {offsets = [0, 0], sizes = [1, 128], strides = [1, 1]} : vector<1x384xf32> to vector<1x128xf32>
    %67 = vector.extract_strided_slice %65 {offsets = [0, 0], sizes = [1, 128], strides = [1, 1]} : vector<1x384xf32> to vector<1x128xf32>
    %68 = arith.addf %66, %67 : vector<1x128xf32>
    %69 = arith.negf %68 : vector<1x128xf32>
    %70 = math.exp %69 : vector<1x128xf32>
    %cst_41 = arith.constant 1.000000e+00 : f32
    %71 = vector.broadcast %cst_41 : f32 to vector<1x128xf32>
    %72 = arith.addf %71, %70 : vector<1x128xf32>
    %73 = arith.divf %71, %72 : vector<1x128xf32>
    %74 = vector.extract_strided_slice %63 {offsets = [0, 128], sizes = [1, 128], strides = [1, 1]} : vector<1x384xf32> to vector<1x128xf32>
    %75 = vector.extract_strided_slice %65 {offsets = [0, 128], sizes = [1, 128], strides = [1, 1]} : vector<1x384xf32> to vector<1x128xf32>
    %76 = arith.addf %74, %75 : vector<1x128xf32>
    %77 = arith.negf %76 : vector<1x128xf32>
    %78 = math.exp %77 : vector<1x128xf32>
    %cst_42 = arith.constant 1.000000e+00 : f32
    %79 = vector.broadcast %cst_42 : f32 to vector<1x128xf32>
    %80 = arith.addf %79, %78 : vector<1x128xf32>
    %81 = arith.divf %79, %80 : vector<1x128xf32>
    %82 = vector.extract_strided_slice %63 {offsets = [0, 256], sizes = [1, 128], strides = [1, 1]} : vector<1x384xf32> to vector<1x128xf32>
    %83 = vector.extract_strided_slice %65 {offsets = [0, 256], sizes = [1, 128], strides = [1, 1]} : vector<1x384xf32> to vector<1x128xf32>
    %84 = arith.addf %83, %60 : vector<1x128xf32>
    %85 = arith.mulf %73, %84 : vector<1x128xf32>
    %86 = arith.addf %82, %85 : vector<1x128xf32>
    %87 = math.tanh %86 : vector<1x128xf32>
    %88 = arith.subf %61, %87 : vector<1x128xf32>
    %89 = arith.mulf %81, %88 : vector<1x128xf32>
    %90 = arith.addf %87, %89 : vector<1x128xf32>
    %91 = arith.index_cast %c0_i32_38 : i32 to index
    %c0_43 = arith.constant 0 : index
    %92 = vector.load %arg19[%91, %c0_43] : memref<8x128xf32, #tpu.memory_space<vmem>>, vector<1x128xf32>
    tpu.vector_store %arg19[%91, %c0_43], %90 {strides = array<i32>} : memref<8x128xf32, #tpu.memory_space<vmem>>, vector<1x128xf32>,
    %c7_i32 = arith.constant 7 : i32
    %93 = arith.subi %c7_i32, %c0_i32_38 : i32
    %94 = arith.index_cast %93 : i32 to index
    %c0_44 = arith.constant 0 : index
    %95 = vector.load %arg20[%94, %c0_44] : memref<8x128xf32, #tpu.memory_space<vmem>>, vector<1x128xf32>
    tpu.vector_store %arg20[%94, %c0_44], %90 {strides = array<i32>} : memref<8x128xf32, #tpu.memory_space<vmem>>, vector<1x128xf32>,
    %c1_i32_45 = arith.constant 1 : i32
    %96 = arith.index_cast %c1_i32_45 : i32 to index
    %c0_46 = arith.constant 0 : index
    %97 = vector.load %arg18[%96, %c0_46] : memref<8x384xf32, #tpu.memory_space<vmem>>, vector<1x384xf32>
    %98 = arith.truncf %90 : vector<1x128xf32> to vector<1x128xbf16>
    %cst_47 = arith.constant dense<0.000000e+00> : vector<1x384xf32>
    %99 = tpu.matmul %98, %59, %cst_47 {dimension_numbers = #tpu.dot_dimension_numbers<[1], [0], [0], [1], [0, 0, 1, 1], [], []>} : vector<1x128xbf16>, vector<128x384xbf16>, vector<1x384xf32> -> vector<1x384xf32>
    %100 = vector.extract_strided_slice %97 {offsets = [0, 0], sizes = [1, 128], strides = [1, 1]} : vector<1x384xf32> to vector<1x128xf32>
    %101 = vector.extract_strided_slice %99 {offsets = [0, 0], sizes = [1, 128], strides = [1, 1]} : vector<1x384xf32> to vector<1x128xf32>
    %102 = arith.addf %100, %101 : vector<1x128xf32>
    %103 = arith.negf %102 : vector<1x128xf32>
    %104 = math.exp %103 : vector<1x128xf32>
    %cst_48 = arith.constant 1.000000e+00 : f32
    %105 = vector.broadcast %cst_48 : f32 to vector<1x128xf32>
    %106 = arith.addf %105, %104 : vector<1x128xf32>
    %107 = arith.divf %105, %106 : vector<1x128xf32>
    %108 = vector.extract_strided_slice %97 {offsets = [0, 128], sizes = [1, 128], strides = [1, 1]} : vector<1x384xf32> to vector<1x128xf32>
    %109 = vector.extract_strided_slice %99 {offsets = [0, 128], sizes = [1, 128], strides = [1, 1]} : vector<1x384xf32> to vector<1x128xf32>
    %110 = arith.addf %108, %109 : vector<1x128xf32>
    %111 = arith.negf %110 : vector<1x128xf32>
    %112 = math.exp %111 : vector<1x128xf32>
    %cst_49 = arith.constant 1.000000e+00 : f32
    %113 = vector.broadcast %cst_49 : f32 to vector<1x128xf32>
    %114 = arith.addf %113, %112 : vector<1x128xf32>
    %115 = arith.divf %113, %114 : vector<1x128xf32>
    %116 = vector.extract_strided_slice %97 {offsets = [0, 256], sizes = [1, 128], strides = [1, 1]} : vector<1x384xf32> to vector<1x128xf32>
    %117 = vector.extract_strided_slice %99 {offsets = [0, 256], sizes = [1, 128], strides = [1, 1]} : vector<1x384xf32> to vector<1x128xf32>
    %118 = arith.addf %117, %60 : vector<1x128xf32>
    %119 = arith.mulf %107, %118 : vector<1x128xf32>
    %120 = arith.addf %116, %119 : vector<1x128xf32>
    %121 = math.tanh %120 : vector<1x128xf32>
    %122 = arith.subf %90, %121 : vector<1x128xf32>
    %123 = arith.mulf %115, %122 : vector<1x128xf32>
    %124 = arith.addf %121, %123 : vector<1x128xf32>
    %125 = arith.index_cast %c1_i32_45 : i32 to index
    %c0_50 = arith.constant 0 : index
    %126 = vector.load %arg19[%125, %c0_50] : memref<8x128xf32, #tpu.memory_space<vmem>>, vector<1x128xf32>
    tpu.vector_store %arg19[%125, %c0_50], %124 {strides = array<i32>} : memref<8x128xf32, #tpu.memory_space<vmem>>, vector<1x128xf32>,
    %c7_i32_51 = arith.constant 7 : i32
    %127 = arith.subi %c7_i32_51, %c1_i32_45 : i32
    %128 = arith.index_cast %127 : i32 to index
    %c0_52 = arith.constant 0 : index
    %129 = vector.load %arg20[%128, %c0_52] : memref<8x128xf32, #tpu.memory_space<vmem>>, vector<1x128xf32>
    tpu.vector_store %arg20[%128, %c0_52], %124 {strides = array<i32>} : memref<8x128xf32, #tpu.memory_space<vmem>>, vector<1x128xf32>,
    %c2_i32 = arith.constant 2 : i32
    %130 = arith.index_cast %c2_i32 : i32 to index
    %c0_53 = arith.constant 0 : index
    %131 = vector.load %arg18[%130, %c0_53] : memref<8x384xf32, #tpu.memory_space<vmem>>, vector<1x384xf32>
    %132 = arith.truncf %124 : vector<1x128xf32> to vector<1x128xbf16>
    %cst_54 = arith.constant dense<0.000000e+00> : vector<1x384xf32>
    %133 = tpu.matmul %132, %59, %cst_54 {dimension_numbers = #tpu.dot_dimension_numbers<[1], [0], [0], [1], [0, 0, 1, 1], [], []>} : vector<1x128xbf16>, vector<128x384xbf16>, vector<1x384xf32> -> vector<1x384xf32>
    %134 = vector.extract_strided_slice %131 {offsets = [0, 0], sizes = [1, 128], strides = [1, 1]} : vector<1x384xf32> to vector<1x128xf32>
    %135 = vector.extract_strided_slice %133 {offsets = [0, 0], sizes = [1, 128], strides = [1, 1]} : vector<1x384xf32> to vector<1x128xf32>
    %136 = arith.addf %134, %135 : vector<1x128xf32>
    %137 = arith.negf %136 : vector<1x128xf32>
    %138 = math.exp %137 : vector<1x128xf32>
    %cst_55 = arith.constant 1.000000e+00 : f32
    %139 = vector.broadcast %cst_55 : f32 to vector<1x128xf32>
    %140 = arith.addf %139, %138 : vector<1x128xf32>
    %141 = arith.divf %139, %140 : vector<1x128xf32>
    %142 = vector.extract_strided_slice %131 {offsets = [0, 128], sizes = [1, 128], strides = [1, 1]} : vector<1x384xf32> to vector<1x128xf32>
    %143 = vector.extract_strided_slice %133 {offsets = [0, 128], sizes = [1, 128], strides = [1, 1]} : vector<1x384xf32> to vector<1x128xf32>
    %144 = arith.addf %142, %143 : vector<1x128xf32>
    %145 = arith.negf %144 : vector<1x128xf32>
    %146 = math.exp %145 : vector<1x128xf32>
    %cst_56 = arith.constant 1.000000e+00 : f32
    %147 = vector.broadcast %cst_56 : f32 to vector<1x128xf32>
    %148 = arith.addf %147, %146 : vector<1x128xf32>
    %149 = arith.divf %147, %148 : vector<1x128xf32>
    %150 = vector.extract_strided_slice %131 {offsets = [0, 256], sizes = [1, 128], strides = [1, 1]} : vector<1x384xf32> to vector<1x128xf32>
    %151 = vector.extract_strided_slice %133 {offsets = [0, 256], sizes = [1, 128], strides = [1, 1]} : vector<1x384xf32> to vector<1x128xf32>
    %152 = arith.addf %151, %60 : vector<1x128xf32>
    %153 = arith.mulf %141, %152 : vector<1x128xf32>
    %154 = arith.addf %150, %153 : vector<1x128xf32>
    %155 = math.tanh %154 : vector<1x128xf32>
    %156 = arith.subf %124, %155 : vector<1x128xf32>
    %157 = arith.mulf %149, %156 : vector<1x128xf32>
    %158 = arith.addf %155, %157 : vector<1x128xf32>
    %159 = arith.index_cast %c2_i32 : i32 to index
    %c0_57 = arith.constant 0 : index
    %160 = vector.load %arg19[%159, %c0_57] : memref<8x128xf32, #tpu.memory_space<vmem>>, vector<1x128xf32>
    tpu.vector_store %arg19[%159, %c0_57], %158 {strides = array<i32>} : memref<8x128xf32, #tpu.memory_space<vmem>>, vector<1x128xf32>,
    %c7_i32_58 = arith.constant 7 : i32
    %161 = arith.subi %c7_i32_58, %c2_i32 : i32
    %162 = arith.index_cast %161 : i32 to index
    %c0_59 = arith.constant 0 : index
    %163 = vector.load %arg20[%162, %c0_59] : memref<8x128xf32, #tpu.memory_space<vmem>>, vector<1x128xf32>
    tpu.vector_store %arg20[%162, %c0_59], %158 {strides = array<i32>} : memref<8x128xf32, #tpu.memory_space<vmem>>, vector<1x128xf32>,
    %c3_i32 = arith.constant 3 : i32
    %164 = arith.index_cast %c3_i32 : i32 to index
    %c0_60 = arith.constant 0 : index
    %165 = vector.load %arg18[%164, %c0_60] : memref<8x384xf32, #tpu.memory_space<vmem>>, vector<1x384xf32>
    %166 = arith.truncf %158 : vector<1x128xf32> to vector<1x128xbf16>
    %cst_61 = arith.constant dense<0.000000e+00> : vector<1x384xf32>
    %167 = tpu.matmul %166, %59, %cst_61 {dimension_numbers = #tpu.dot_dimension_numbers<[1], [0], [0], [1], [0, 0, 1, 1], [], []>} : vector<1x128xbf16>, vector<128x384xbf16>, vector<1x384xf32> -> vector<1x384xf32>
    %168 = vector.extract_strided_slice %165 {offsets = [0, 0], sizes = [1, 128], strides = [1, 1]} : vector<1x384xf32> to vector<1x128xf32>
    %169 = vector.extract_strided_slice %167 {offsets = [0, 0], sizes = [1, 128], strides = [1, 1]} : vector<1x384xf32> to vector<1x128xf32>
    %170 = arith.addf %168, %169 : vector<1x128xf32>
    %171 = arith.negf %170 : vector<1x128xf32>
    %172 = math.exp %171 : vector<1x128xf32>
    %cst_62 = arith.constant 1.000000e+00 : f32
    %173 = vector.broadcast %cst_62 : f32 to vector<1x128xf32>
    %174 = arith.addf %173, %172 : vector<1x128xf32>
    %175 = arith.divf %173, %174 : vector<1x128xf32>
    %176 = vector.extract_strided_slice %165 {offsets = [0, 128], sizes = [1, 128], strides = [1, 1]} : vector<1x384xf32> to vector<1x128xf32>
    %177 = vector.extract_strided_slice %167 {offsets = [0, 128], sizes = [1, 128], strides = [1, 1]} : vector<1x384xf32> to vector<1x128xf32>
    %178 = arith.addf %176, %177 : vector<1x128xf32>
    %179 = arith.negf %178 : vector<1x128xf32>
    %180 = math.exp %179 : vector<1x128xf32>
    %cst_63 = arith.constant 1.000000e+00 : f32
    %181 = vector.broadcast %cst_63 : f32 to vector<1x128xf32>
    %182 = arith.addf %181, %180 : vector<1x128xf32>
    %183 = arith.divf %181, %182 : vector<1x128xf32>
    %184 = vector.extract_strided_slice %165 {offsets = [0, 256], sizes = [1, 128], strides = [1, 1]} : vector<1x384xf32> to vector<1x128xf32>
    %185 = vector.extract_strided_slice %167 {offsets = [0, 256], sizes = [1, 128], strides = [1, 1]} : vector<1x384xf32> to vector<1x128xf32>
    %186 = arith.addf %185, %60 : vector<1x128xf32>
    %187 = arith.mulf %175, %186 : vector<1x128xf32>
    %188 = arith.addf %184, %187 : vector<1x128xf32>
    %189 = math.tanh %188 : vector<1x128xf32>
    %190 = arith.subf %158, %189 : vector<1x128xf32>
    %191 = arith.mulf %183, %190 : vector<1x128xf32>
    %192 = arith.addf %189, %191 : vector<1x128xf32>
    %193 = arith.index_cast %c3_i32 : i32 to index
    %c0_64 = arith.constant 0 : index
    %194 = vector.load %arg19[%193, %c0_64] : memref<8x128xf32, #tpu.memory_space<vmem>>, vector<1x128xf32>
    tpu.vector_store %arg19[%193, %c0_64], %192 {strides = array<i32>} : memref<8x128xf32, #tpu.memory_space<vmem>>, vector<1x128xf32>,
    %c7_i32_65 = arith.constant 7 : i32
    %195 = arith.subi %c7_i32_65, %c3_i32 : i32
    %196 = arith.index_cast %195 : i32 to index
    %c0_66 = arith.constant 0 : index
    %197 = vector.load %arg20[%196, %c0_66] : memref<8x128xf32, #tpu.memory_space<vmem>>, vector<1x128xf32>
    tpu.vector_store %arg20[%196, %c0_66], %192 {strides = array<i32>} : memref<8x128xf32, #tpu.memory_space<vmem>>, vector<1x128xf32>,
    %c4_i32 = arith.constant 4 : i32
    %198 = arith.index_cast %c4_i32 : i32 to index
    %c0_67 = arith.constant 0 : index
    %199 = vector.load %arg18[%198, %c0_67] : memref<8x384xf32, #tpu.memory_space<vmem>>, vector<1x384xf32>
    %200 = arith.truncf %192 : vector<1x128xf32> to vector<1x128xbf16>
    %cst_68 = arith.constant dense<0.000000e+00> : vector<1x384xf32>
    %201 = tpu.matmul %200, %59, %cst_68 {dimension_numbers = #tpu.dot_dimension_numbers<[1], [0], [0], [1], [0, 0, 1, 1], [], []>} : vector<1x128xbf16>, vector<128x384xbf16>, vector<1x384xf32> -> vector<1x384xf32>
    %202 = vector.extract_strided_slice %199 {offsets = [0, 0], sizes = [1, 128], strides = [1, 1]} : vector<1x384xf32> to vector<1x128xf32>
    %203 = vector.extract_strided_slice %201 {offsets = [0, 0], sizes = [1, 128], strides = [1, 1]} : vector<1x384xf32> to vector<1x128xf32>
    %204 = arith.addf %202, %203 : vector<1x128xf32>
    %205 = arith.negf %204 : vector<1x128xf32>
    %206 = math.exp %205 : vector<1x128xf32>
    %cst_69 = arith.constant 1.000000e+00 : f32
    %207 = vector.broadcast %cst_69 : f32 to vector<1x128xf32>
    %208 = arith.addf %207, %206 : vector<1x128xf32>
    %209 = arith.divf %207, %208 : vector<1x128xf32>
    %210 = vector.extract_strided_slice %199 {offsets = [0, 128], sizes = [1, 128], strides = [1, 1]} : vector<1x384xf32> to vector<1x128xf32>
    %211 = vector.extract_strided_slice %201 {offsets = [0, 128], sizes = [1, 128], strides = [1, 1]} : vector<1x384xf32> to vector<1x128xf32>
    %212 = arith.addf %210, %211 : vector<1x128xf32>
    %213 = arith.negf %212 : vector<1x128xf32>
    %214 = math.exp %213 : vector<1x128xf32>
    %cst_70 = arith.constant 1.000000e+00 : f32
    %215 = vector.broadcast %cst_70 : f32 to vector<1x128xf32>
    %216 = arith.addf %215, %214 : vector<1x128xf32>
    %217 = arith.divf %215, %216 : vector<1x128xf32>
    %218 = vector.extract_strided_slice %199 {offsets = [0, 256], sizes = [1, 128], strides = [1, 1]} : vector<1x384xf32> to vector<1x128xf32>
    %219 = vector.extract_strided_slice %201 {offsets = [0, 256], sizes = [1, 128], strides = [1, 1]} : vector<1x384xf32> to vector<1x128xf32>
    %220 = arith.addf %219, %60 : vector<1x128xf32>
    %221 = arith.mulf %209, %220 : vector<1x128xf32>
    %222 = arith.addf %218, %221 : vector<1x128xf32>
    %223 = math.tanh %222 : vector<1x128xf32>
    %224 = arith.subf %192, %223 : vector<1x128xf32>
    %225 = arith.mulf %217, %224 : vector<1x128xf32>
    %226 = arith.addf %223, %225 : vector<1x128xf32>
    %227 = arith.index_cast %c4_i32 : i32 to index
    %c0_71 = arith.constant 0 : index
    %228 = vector.load %arg19[%227, %c0_71] : memref<8x128xf32, #tpu.memory_space<vmem>>, vector<1x128xf32>
    tpu.vector_store %arg19[%227, %c0_71], %226 {strides = array<i32>} : memref<8x128xf32, #tpu.memory_space<vmem>>, vector<1x128xf32>,
    %c7_i32_72 = arith.constant 7 : i32
    %229 = arith.subi %c7_i32_72, %c4_i32 : i32
    %230 = arith.index_cast %229 : i32 to index
    %c0_73 = arith.constant 0 : index
    %231 = vector.load %arg20[%230, %c0_73] : memref<8x128xf32, #tpu.memory_space<vmem>>, vector<1x128xf32>
    tpu.vector_store %arg20[%230, %c0_73], %226 {strides = array<i32>} : memref<8x128xf32, #tpu.memory_space<vmem>>, vector<1x128xf32>,
    %c5_i32 = arith.constant 5 : i32
    %232 = arith.index_cast %c5_i32 : i32 to index
    %c0_74 = arith.constant 0 : index
    %233 = vector.load %arg18[%232, %c0_74] : memref<8x384xf32, #tpu.memory_space<vmem>>, vector<1x384xf32>
    %234 = arith.truncf %226 : vector<1x128xf32> to vector<1x128xbf16>
    %cst_75 = arith.constant dense<0.000000e+00> : vector<1x384xf32>
    %235 = tpu.matmul %234, %59, %cst_75 {dimension_numbers = #tpu.dot_dimension_numbers<[1], [0], [0], [1], [0, 0, 1, 1], [], []>} : vector<1x128xbf16>, vector<128x384xbf16>, vector<1x384xf32> -> vector<1x384xf32>
    %236 = vector.extract_strided_slice %233 {offsets = [0, 0], sizes = [1, 128], strides = [1, 1]} : vector<1x384xf32> to vector<1x128xf32>
    %237 = vector.extract_strided_slice %235 {offsets = [0, 0], sizes = [1, 128], strides = [1, 1]} : vector<1x384xf32> to vector<1x128xf32>
    %238 = arith.addf %236, %237 : vector<1x128xf32>
    %239 = arith.negf %238 : vector<1x128xf32>
    %240 = math.exp %239 : vector<1x128xf32>
    %cst_76 = arith.constant 1.000000e+00 : f32
    %241 = vector.broadcast %cst_76 : f32 to vector<1x128xf32>
    %242 = arith.addf %241, %240 : vector<1x128xf32>
    %243 = arith.divf %241, %242 : vector<1x128xf32>
    %244 = vector.extract_strided_slice %233 {offsets = [0, 128], sizes = [1, 128], strides = [1, 1]} : vector<1x384xf32> to vector<1x128xf32>
    %245 = vector.extract_strided_slice %235 {offsets = [0, 128], sizes = [1, 128], strides = [1, 1]} : vector<1x384xf32> to vector<1x128xf32>
    %246 = arith.addf %244, %245 : vector<1x128xf32>
    %247 = arith.negf %246 : vector<1x128xf32>
    %248 = math.exp %247 : vector<1x128xf32>
    %cst_77 = arith.constant 1.000000e+00 : f32
    %249 = vector.broadcast %cst_77 : f32 to vector<1x128xf32>
    %250 = arith.addf %249, %248 : vector<1x128xf32>
    %251 = arith.divf %249, %250 : vector<1x128xf32>
    %252 = vector.extract_strided_slice %233 {offsets = [0, 256], sizes = [1, 128], strides = [1, 1]} : vector<1x384xf32> to vector<1x128xf32>
    %253 = vector.extract_strided_slice %235 {offsets = [0, 256], sizes = [1, 128], strides = [1, 1]} : vector<1x384xf32> to vector<1x128xf32>
    %254 = arith.addf %253, %60 : vector<1x128xf32>
    %255 = arith.mulf %243, %254 : vector<1x128xf32>
    %256 = arith.addf %252, %255 : vector<1x128xf32>
    %257 = math.tanh %256 : vector<1x128xf32>
    %258 = arith.subf %226, %257 : vector<1x128xf32>
    %259 = arith.mulf %251, %258 : vector<1x128xf32>
    %260 = arith.addf %257, %259 : vector<1x128xf32>
    %261 = arith.index_cast %c5_i32 : i32 to index
    %c0_78 = arith.constant 0 : index
    %262 = vector.load %arg19[%261, %c0_78] : memref<8x128xf32, #tpu.memory_space<vmem>>, vector<1x128xf32>
    tpu.vector_store %arg19[%261, %c0_78], %260 {strides = array<i32>} : memref<8x128xf32, #tpu.memory_space<vmem>>, vector<1x128xf32>,
    %c7_i32_79 = arith.constant 7 : i32
    %263 = arith.subi %c7_i32_79, %c5_i32 : i32
    %264 = arith.index_cast %263 : i32 to index
    %c0_80 = arith.constant 0 : index
    %265 = vector.load %arg20[%264, %c0_80] : memref<8x128xf32, #tpu.memory_space<vmem>>, vector<1x128xf32>
    tpu.vector_store %arg20[%264, %c0_80], %260 {strides = array<i32>} : memref<8x128xf32, #tpu.memory_space<vmem>>, vector<1x128xf32>,
    %c6_i32 = arith.constant 6 : i32
    %266 = arith.index_cast %c6_i32 : i32 to index
    %c0_81 = arith.constant 0 : index
    %267 = vector.load %arg18[%266, %c0_81] : memref<8x384xf32, #tpu.memory_space<vmem>>, vector<1x384xf32>
    %268 = arith.truncf %260 : vector<1x128xf32> to vector<1x128xbf16>
    %cst_82 = arith.constant dense<0.000000e+00> : vector<1x384xf32>
    %269 = tpu.matmul %268, %59, %cst_82 {dimension_numbers = #tpu.dot_dimension_numbers<[1], [0], [0], [1], [0, 0, 1, 1], [], []>} : vector<1x128xbf16>, vector<128x384xbf16>, vector<1x384xf32> -> vector<1x384xf32>
    %270 = vector.extract_strided_slice %267 {offsets = [0, 0], sizes = [1, 128], strides = [1, 1]} : vector<1x384xf32> to vector<1x128xf32>
    %271 = vector.extract_strided_slice %269 {offsets = [0, 0], sizes = [1, 128], strides = [1, 1]} : vector<1x384xf32> to vector<1x128xf32>
    %272 = arith.addf %270, %271 : vector<1x128xf32>
    %273 = arith.negf %272 : vector<1x128xf32>
    %274 = math.exp %273 : vector<1x128xf32>
    %cst_83 = arith.constant 1.000000e+00 : f32
    %275 = vector.broadcast %cst_83 : f32 to vector<1x128xf32>
    %276 = arith.addf %275, %274 : vector<1x128xf32>
    %277 = arith.divf %275, %276 : vector<1x128xf32>
    %278 = vector.extract_strided_slice %267 {offsets = [0, 128], sizes = [1, 128], strides = [1, 1]} : vector<1x384xf32> to vector<1x128xf32>
    %279 = vector.extract_strided_slice %269 {offsets = [0, 128], sizes = [1, 128], strides = [1, 1]} : vector<1x384xf32> to vector<1x128xf32>
    %280 = arith.addf %278, %279 : vector<1x128xf32>
    %281 = arith.negf %280 : vector<1x128xf32>
    %282 = math.exp %281 : vector<1x128xf32>
    %cst_84 = arith.constant 1.000000e+00 : f32
    %283 = vector.broadcast %cst_84 : f32 to vector<1x128xf32>
    %284 = arith.addf %283, %282 : vector<1x128xf32>
    %285 = arith.divf %283, %284 : vector<1x128xf32>
    %286 = vector.extract_strided_slice %267 {offsets = [0, 256], sizes = [1, 128], strides = [1, 1]} : vector<1x384xf32> to vector<1x128xf32>
    %287 = vector.extract_strided_slice %269 {offsets = [0, 256], sizes = [1, 128], strides = [1, 1]} : vector<1x384xf32> to vector<1x128xf32>
    %288 = arith.addf %287, %60 : vector<1x128xf32>
    %289 = arith.mulf %277, %288 : vector<1x128xf32>
    %290 = arith.addf %286, %289 : vector<1x128xf32>
    %291 = math.tanh %290 : vector<1x128xf32>
    %292 = arith.subf %260, %291 : vector<1x128xf32>
    %293 = arith.mulf %285, %292 : vector<1x128xf32>
    %294 = arith.addf %291, %293 : vector<1x128xf32>
    %295 = arith.index_cast %c6_i32 : i32 to index
    %c0_85 = arith.constant 0 : index
    %296 = vector.load %arg19[%295, %c0_85] : memref<8x128xf32, #tpu.memory_space<vmem>>, vector<1x128xf32>
    tpu.vector_store %arg19[%295, %c0_85], %294 {strides = array<i32>} : memref<8x128xf32, #tpu.memory_space<vmem>>, vector<1x128xf32>,
    %c7_i32_86 = arith.constant 7 : i32
    %297 = arith.subi %c7_i32_86, %c6_i32 : i32
    %298 = arith.index_cast %297 : i32 to index
    %c0_87 = arith.constant 0 : index
    %299 = vector.load %arg20[%298, %c0_87] : memref<8x128xf32, #tpu.memory_space<vmem>>, vector<1x128xf32>
    tpu.vector_store %arg20[%298, %c0_87], %294 {strides = array<i32>} : memref<8x128xf32, #tpu.memory_space<vmem>>, vector<1x128xf32>,
    %c7_i32_88 = arith.constant 7 : i32
    %300 = arith.index_cast %c7_i32_88 : i32 to index
    %c0_89 = arith.constant 0 : index
    %301 = vector.load %arg18[%300, %c0_89] : memref<8x384xf32, #tpu.memory_space<vmem>>, vector<1x384xf32>
    %302 = arith.truncf %294 : vector<1x128xf32> to vector<1x128xbf16>
    %cst_90 = arith.constant dense<0.000000e+00> : vector<1x384xf32>
    %303 = tpu.matmul %302, %59, %cst_90 {dimension_numbers = #tpu.dot_dimension_numbers<[1], [0], [0], [1], [0, 0, 1, 1], [], []>} : vector<1x128xbf16>, vector<128x384xbf16>, vector<1x384xf32> -> vector<1x384xf32>
    %304 = vector.extract_strided_slice %301 {offsets = [0, 0], sizes = [1, 128], strides = [1, 1]} : vector<1x384xf32> to vector<1x128xf32>
    %305 = vector.extract_strided_slice %303 {offsets = [0, 0], sizes = [1, 128], strides = [1, 1]} : vector<1x384xf32> to vector<1x128xf32>
    %306 = arith.addf %304, %305 : vector<1x128xf32>
    %307 = arith.negf %306 : vector<1x128xf32>
    %308 = math.exp %307 : vector<1x128xf32>
    %cst_91 = arith.constant 1.000000e+00 : f32
    %309 = vector.broadcast %cst_91 : f32 to vector<1x128xf32>
    %310 = arith.addf %309, %308 : vector<1x128xf32>
    %311 = arith.divf %309, %310 : vector<1x128xf32>
    %312 = vector.extract_strided_slice %301 {offsets = [0, 128], sizes = [1, 128], strides = [1, 1]} : vector<1x384xf32> to vector<1x128xf32>
    %313 = vector.extract_strided_slice %303 {offsets = [0, 128], sizes = [1, 128], strides = [1, 1]} : vector<1x384xf32> to vector<1x128xf32>
    %314 = arith.addf %312, %313 : vector<1x128xf32>
    %315 = arith.negf %314 : vector<1x128xf32>
    %316 = math.exp %315 : vector<1x128xf32>
    %cst_92 = arith.constant 1.000000e+00 : f32
    %317 = vector.broadcast %cst_92 : f32 to vector<1x128xf32>
    %318 = arith.addf %317, %316 : vector<1x128xf32>
    %319 = arith.divf %317, %318 : vector<1x128xf32>
    %320 = vector.extract_strided_slice %301 {offsets = [0, 256], sizes = [1, 128], strides = [1, 1]} : vector<1x384xf32> to vector<1x128xf32>
    %321 = vector.extract_strided_slice %303 {offsets = [0, 256], sizes = [1, 128], strides = [1, 1]} : vector<1x384xf32> to vector<1x128xf32>
    %322 = arith.addf %321, %60 : vector<1x128xf32>
    %323 = arith.mulf %311, %322 : vector<1x128xf32>
    %324 = arith.addf %320, %323 : vector<1x128xf32>
    %325 = math.tanh %324 : vector<1x128xf32>
    %326 = arith.subf %294, %325 : vector<1x128xf32>
    %327 = arith.mulf %319, %326 : vector<1x128xf32>
    %328 = arith.addf %325, %327 : vector<1x128xf32>
    %329 = arith.index_cast %c7_i32_88 : i32 to index
    %c0_93 = arith.constant 0 : index
    %330 = vector.load %arg19[%329, %c0_93] : memref<8x128xf32, #tpu.memory_space<vmem>>, vector<1x128xf32>
    tpu.vector_store %arg19[%329, %c0_93], %328 {strides = array<i32>} : memref<8x128xf32, #tpu.memory_space<vmem>>, vector<1x128xf32>,
    %c7_i32_94 = arith.constant 7 : i32
    %331 = arith.subi %c7_i32_94, %c7_i32_88 : i32
    %332 = arith.index_cast %331 : i32 to index
    %c0_95 = arith.constant 0 : index
    %333 = vector.load %arg20[%332, %c0_95] : memref<8x128xf32, #tpu.memory_space<vmem>>, vector<1x128xf32>
    tpu.vector_store %arg20[%332, %c0_95], %328 {strides = array<i32>} : memref<8x128xf32, #tpu.memory_space<vmem>>, vector<1x128xf32>,
    %c8_i32 = arith.constant 8 : i32
    %c0_96 = arith.constant 0 : index
    %c0_97 = arith.constant 0 : index
    %334 = vector.load %arg19[%c0_96, %c0_97] : memref<8x128xf32, #tpu.memory_space<vmem>>, vector<8x128xf32>
    %c0_98 = arith.constant 0 : index
    %c0_99 = arith.constant 0 : index
    %335 = vector.load %arg20[%c0_98, %c0_99] : memref<8x128xf32, #tpu.memory_space<vmem>>, vector<8x128xf32>
    %336 = vector.shape_cast %21 : vector<1x128xi1> to vector<1x128xi1>
    %337 = vector.broadcast %336 : vector<1x128xi1> to vector<8x128xi1>
    %338 = arith.select %337, %334, %335 : vector<8x128xi1>, vector<8x128xf32>
    %339 = arith.truncf %338 : vector<8x128xf32> to vector<8x128xbf16>
    %cst_100 = arith.constant dense<0.000000e+00> : vector<8x128xf32>
    %340 = tpu.matmul %23, %339, %cst_100 {dimension_numbers = #tpu.dot_dimension_numbers<[1], [0], [0], [1], [0, 0, 1, 1], [], []>} : vector<8x8xbf16>, vector<8x128xbf16>, vector<8x128xf32> -> vector<8x128xf32>
    %341 = arith.truncf %340 : vector<8x128xf32> to vector<8x128xbf16>
    %c0_101 = arith.constant 0 : index
    %c0_102 = arith.constant 0 : index
    %342 = vector.load %arg11[%c0_101, %c0_102] : memref<128x384xbf16, #tpu.memory_space<vmem>>, vector<128x384xbf16>
    %cst_103 = arith.constant dense<0.000000e+00> : vector<8x384xf32>
    %343 = tpu.matmul %339, %342, %cst_103 {dimension_numbers = #tpu.dot_dimension_numbers<[1], [0], [0], [1], [0, 0, 1, 1], [], []>} : vector<8x128xbf16>, vector<128x384xbf16>, vector<8x384xf32> -> vector<8x384xf32>
    %c0_104 = arith.constant 0 : index
    %c0_105 = arith.constant 0 : index
    %344 = vector.load %arg11[%c0_104, %c0_105] : memref<128x384xbf16, #tpu.memory_space<vmem>>, vector<128x384xbf16>
    %cst_106 = arith.constant dense<0.000000e+00> : vector<8x384xf32>
    %345 = tpu.matmul %341, %344, %cst_106 {dimension_numbers = #tpu.dot_dimension_numbers<[1], [0], [0], [1], [0, 0, 1, 1], [], []>} : vector<8x128xbf16>, vector<128x384xbf16>, vector<8x384xf32> -> vector<8x384xf32>
    %346 = vector.shape_cast %18 : vector<1x384xi1> to vector<1x384xi1>
    %347 = vector.broadcast %346 : vector<1x384xi1> to vector<8x384xi1>
    %348 = arith.select %347, %343, %345 : vector<8x384xi1>, vector<8x384xf32>
    %c0_107 = arith.constant 0 : index
    %c0_108 = arith.constant 0 : index
    %349 = vector.load %arg12[%c0_107, %c0_108] : memref<1x384xf32, #tpu.memory_space<vmem>>, vector<1x384xf32>
    %350 = vector.broadcast %349 : vector<1x384xf32> to vector<8x384xf32>
    %351 = arith.addf %348, %350 : vector<8x384xf32>
    %c0_109 = arith.constant 0 : index
    %c0_110 = arith.constant 0 : index
    %352 = vector.load %arg18[%c0_109, %c0_110] : memref<8x384xf32, #tpu.memory_space<vmem>>, vector<8x384xf32>
    tpu.vector_store %arg18[%c0_109, %c0_110], %351 {strides = array<i32>} : memref<8x384xf32, #tpu.memory_space<vmem>>, vector<8x384xf32>,
    %c0_111 = arith.constant 0 : index
    %c0_112 = arith.constant 0 : index
    %353 = vector.load %arg13[%c0_111, %c0_112] : memref<128x384xbf16, #tpu.memory_space<vmem>>, vector<128x384xbf16>
    %c0_113 = arith.constant 0 : index
    %c0_114 = arith.constant 0 : index
    %354 = vector.load %arg14[%c0_113, %c0_114] : memref<1x128xf32, #tpu.memory_space<vmem>>, vector<1x128xf32>
    %cst_115 = arith.constant 0.000000e+00 : f32
    %355 = vector.broadcast %cst_115 : f32 to vector<1x128xf32>
    %c0_i32_116 = arith.constant 0 : i32
    %356 = arith.index_cast %c0_i32_116 : i32 to index
    %c0_117 = arith.constant 0 : index
    %357 = vector.load %arg18[%356, %c0_117] : memref<8x384xf32, #tpu.memory_space<vmem>>, vector<1x384xf32>
    %358 = arith.truncf %355 : vector<1x128xf32> to vector<1x128xbf16>
    %cst_118 = arith.constant dense<0.000000e+00> : vector<1x384xf32>
    %359 = tpu.matmul %358, %353, %cst_118 {dimension_numbers = #tpu.dot_dimension_numbers<[1], [0], [0], [1], [0, 0, 1, 1], [], []>} : vector<1x128xbf16>, vector<128x384xbf16>, vector<1x384xf32> -> vector<1x384xf32>
    %360 = vector.extract_strided_slice %357 {offsets = [0, 0], sizes = [1, 128], strides = [1, 1]} : vector<1x384xf32> to vector<1x128xf32>
    %361 = vector.extract_strided_slice %359 {offsets = [0, 0], sizes = [1, 128], strides = [1, 1]} : vector<1x384xf32> to vector<1x128xf32>
    %362 = arith.addf %360, %361 : vector<1x128xf32>
    %363 = arith.negf %362 : vector<1x128xf32>
    %364 = math.exp %363 : vector<1x128xf32>
    %cst_119 = arith.constant 1.000000e+00 : f32
    %365 = vector.broadcast %cst_119 : f32 to vector<1x128xf32>
    %366 = arith.addf %365, %364 : vector<1x128xf32>
    %367 = arith.divf %365, %366 : vector<1x128xf32>
    %368 = vector.extract_strided_slice %357 {offsets = [0, 128], sizes = [1, 128], strides = [1, 1]} : vector<1x384xf32> to vector<1x128xf32>
    %369 = vector.extract_strided_slice %359 {offsets = [0, 128], sizes = [1, 128], strides = [1, 1]} : vector<1x384xf32> to vector<1x128xf32>
    %370 = arith.addf %368, %369 : vector<1x128xf32>
    %371 = arith.negf %370 : vector<1x128xf32>
    %372 = math.exp %371 : vector<1x128xf32>
    %cst_120 = arith.constant 1.000000e+00 : f32
    %373 = vector.broadcast %cst_120 : f32 to vector<1x128xf32>
    %374 = arith.addf %373, %372 : vector<1x128xf32>
    %375 = arith.divf %373, %374 : vector<1x128xf32>
    %376 = vector.extract_strided_slice %357 {offsets = [0, 256], sizes = [1, 128], strides = [1, 1]} : vector<1x384xf32> to vector<1x128xf32>
    %377 = vector.extract_strided_slice %359 {offsets = [0, 256], sizes = [1, 128], strides = [1, 1]} : vector<1x384xf32> to vector<1x128xf32>
    %378 = arith.addf %377, %354 : vector<1x128xf32>
    %379 = arith.mulf %367, %378 : vector<1x128xf32>
    %380 = arith.addf %376, %379 : vector<1x128xf32>
    %381 = math.tanh %380 : vector<1x128xf32>
    %382 = arith.subf %355, %381 : vector<1x128xf32>
    %383 = arith.mulf %375, %382 : vector<1x128xf32>
    %384 = arith.addf %381, %383 : vector<1x128xf32>
    %385 = arith.index_cast %c0_i32_116 : i32 to index
    %c0_121 = arith.constant 0 : index
    %386 = vector.load %arg19[%385, %c0_121] : memref<8x128xf32, #tpu.memory_space<vmem>>, vector<1x128xf32>
    tpu.vector_store %arg19[%385, %c0_121], %384 {strides = array<i32>} : memref<8x128xf32, #tpu.memory_space<vmem>>, vector<1x128xf32>,
    %c7_i32_122 = arith.constant 7 : i32
    %387 = arith.subi %c7_i32_122, %c0_i32_116 : i32
    %388 = arith.index_cast %387 : i32 to index
    %c0_123 = arith.constant 0 : index
    %389 = vector.load %arg20[%388, %c0_123] : memref<8x128xf32, #tpu.memory_space<vmem>>, vector<1x128xf32>
    tpu.vector_store %arg20[%388, %c0_123], %384 {strides = array<i32>} : memref<8x128xf32, #tpu.memory_space<vmem>>, vector<1x128xf32>,
    %c1_i32_124 = arith.constant 1 : i32
    %390 = arith.index_cast %c1_i32_124 : i32 to index
    %c0_125 = arith.constant 0 : index
    %391 = vector.load %arg18[%390, %c0_125] : memref<8x384xf32, #tpu.memory_space<vmem>>, vector<1x384xf32>
    %392 = arith.truncf %384 : vector<1x128xf32> to vector<1x128xbf16>
    %cst_126 = arith.constant dense<0.000000e+00> : vector<1x384xf32>
    %393 = tpu.matmul %392, %353, %cst_126 {dimension_numbers = #tpu.dot_dimension_numbers<[1], [0], [0], [1], [0, 0, 1, 1], [], []>} : vector<1x128xbf16>, vector<128x384xbf16>, vector<1x384xf32> -> vector<1x384xf32>
    %394 = vector.extract_strided_slice %391 {offsets = [0, 0], sizes = [1, 128], strides = [1, 1]} : vector<1x384xf32> to vector<1x128xf32>
    %395 = vector.extract_strided_slice %393 {offsets = [0, 0], sizes = [1, 128], strides = [1, 1]} : vector<1x384xf32> to vector<1x128xf32>
    %396 = arith.addf %394, %395 : vector<1x128xf32>
    %397 = arith.negf %396 : vector<1x128xf32>
    %398 = math.exp %397 : vector<1x128xf32>
    %cst_127 = arith.constant 1.000000e+00 : f32
    %399 = vector.broadcast %cst_127 : f32 to vector<1x128xf32>
    %400 = arith.addf %399, %398 : vector<1x128xf32>
    %401 = arith.divf %399, %400 : vector<1x128xf32>
    %402 = vector.extract_strided_slice %391 {offsets = [0, 128], sizes = [1, 128], strides = [1, 1]} : vector<1x384xf32> to vector<1x128xf32>
    %403 = vector.extract_strided_slice %393 {offsets = [0, 128], sizes = [1, 128], strides = [1, 1]} : vector<1x384xf32> to vector<1x128xf32>
    %404 = arith.addf %402, %403 : vector<1x128xf32>
    %405 = arith.negf %404 : vector<1x128xf32>
    %406 = math.exp %405 : vector<1x128xf32>
    %cst_128 = arith.constant 1.000000e+00 : f32
    %407 = vector.broadcast %cst_128 : f32 to vector<1x128xf32>
    %408 = arith.addf %407, %406 : vector<1x128xf32>
    %409 = arith.divf %407, %408 : vector<1x128xf32>
    %410 = vector.extract_strided_slice %391 {offsets = [0, 256], sizes = [1, 128], strides = [1, 1]} : vector<1x384xf32> to vector<1x128xf32>
    %411 = vector.extract_strided_slice %393 {offsets = [0, 256], sizes = [1, 128], strides = [1, 1]} : vector<1x384xf32> to vector<1x128xf32>
    %412 = arith.addf %411, %354 : vector<1x128xf32>
    %413 = arith.mulf %401, %412 : vector<1x128xf32>
    %414 = arith.addf %410, %413 : vector<1x128xf32>
    %415 = math.tanh %414 : vector<1x128xf32>
    %416 = arith.subf %384, %415 : vector<1x128xf32>
    %417 = arith.mulf %409, %416 : vector<1x128xf32>
    %418 = arith.addf %415, %417 : vector<1x128xf32>
    %419 = arith.index_cast %c1_i32_124 : i32 to index
    %c0_129 = arith.constant 0 : index
    %420 = vector.load %arg19[%419, %c0_129] : memref<8x128xf32, #tpu.memory_space<vmem>>, vector<1x128xf32>
    tpu.vector_store %arg19[%419, %c0_129], %418 {strides = array<i32>} : memref<8x128xf32, #tpu.memory_space<vmem>>, vector<1x128xf32>,
    %c7_i32_130 = arith.constant 7 : i32
    %421 = arith.subi %c7_i32_130, %c1_i32_124 : i32
    %422 = arith.index_cast %421 : i32 to index
    %c0_131 = arith.constant 0 : index
    %423 = vector.load %arg20[%422, %c0_131] : memref<8x128xf32, #tpu.memory_space<vmem>>, vector<1x128xf32>
    tpu.vector_store %arg20[%422, %c0_131], %418 {strides = array<i32>} : memref<8x128xf32, #tpu.memory_space<vmem>>, vector<1x128xf32>,
    %c2_i32_132 = arith.constant 2 : i32
    %424 = arith.index_cast %c2_i32_132 : i32 to index
    %c0_133 = arith.constant 0 : index
    %425 = vector.load %arg18[%424, %c0_133] : memref<8x384xf32, #tpu.memory_space<vmem>>, vector<1x384xf32>
    %426 = arith.truncf %418 : vector<1x128xf32> to vector<1x128xbf16>
    %cst_134 = arith.constant dense<0.000000e+00> : vector<1x384xf32>
    %427 = tpu.matmul %426, %353, %cst_134 {dimension_numbers = #tpu.dot_dimension_numbers<[1], [0], [0], [1], [0, 0, 1, 1], [], []>} : vector<1x128xbf16>, vector<128x384xbf16>, vector<1x384xf32> -> vector<1x384xf32>
    %428 = vector.extract_strided_slice %425 {offsets = [0, 0], sizes = [1, 128], strides = [1, 1]} : vector<1x384xf32> to vector<1x128xf32>
    %429 = vector.extract_strided_slice %427 {offsets = [0, 0], sizes = [1, 128], strides = [1, 1]} : vector<1x384xf32> to vector<1x128xf32>
    %430 = arith.addf %428, %429 : vector<1x128xf32>
    %431 = arith.negf %430 : vector<1x128xf32>
    %432 = math.exp %431 : vector<1x128xf32>
    %cst_135 = arith.constant 1.000000e+00 : f32
    %433 = vector.broadcast %cst_135 : f32 to vector<1x128xf32>
    %434 = arith.addf %433, %432 : vector<1x128xf32>
    %435 = arith.divf %433, %434 : vector<1x128xf32>
    %436 = vector.extract_strided_slice %425 {offsets = [0, 128], sizes = [1, 128], strides = [1, 1]} : vector<1x384xf32> to vector<1x128xf32>
    %437 = vector.extract_strided_slice %427 {offsets = [0, 128], sizes = [1, 128], strides = [1, 1]} : vector<1x384xf32> to vector<1x128xf32>
    %438 = arith.addf %436, %437 : vector<1x128xf32>
    %439 = arith.negf %438 : vector<1x128xf32>
    %440 = math.exp %439 : vector<1x128xf32>
    %cst_136 = arith.constant 1.000000e+00 : f32
    %441 = vector.broadcast %cst_136 : f32 to vector<1x128xf32>
    %442 = arith.addf %441, %440 : vector<1x128xf32>
    %443 = arith.divf %441, %442 : vector<1x128xf32>
    %444 = vector.extract_strided_slice %425 {offsets = [0, 256], sizes = [1, 128], strides = [1, 1]} : vector<1x384xf32> to vector<1x128xf32>
    %445 = vector.extract_strided_slice %427 {offsets = [0, 256], sizes = [1, 128], strides = [1, 1]} : vector<1x384xf32> to vector<1x128xf32>
    %446 = arith.addf %445, %354 : vector<1x128xf32>
    %447 = arith.mulf %435, %446 : vector<1x128xf32>
    %448 = arith.addf %444, %447 : vector<1x128xf32>
    %449 = math.tanh %448 : vector<1x128xf32>
    %450 = arith.subf %418, %449 : vector<1x128xf32>
    %451 = arith.mulf %443, %450 : vector<1x128xf32>
    %452 = arith.addf %449, %451 : vector<1x128xf32>
    %453 = arith.index_cast %c2_i32_132 : i32 to index
    %c0_137 = arith.constant 0 : index
    %454 = vector.load %arg19[%453, %c0_137] : memref<8x128xf32, #tpu.memory_space<vmem>>, vector<1x128xf32>
    tpu.vector_store %arg19[%453, %c0_137], %452 {strides = array<i32>} : memref<8x128xf32, #tpu.memory_space<vmem>>, vector<1x128xf32>,
    %c7_i32_138 = arith.constant 7 : i32
    %455 = arith.subi %c7_i32_138, %c2_i32_132 : i32
    %456 = arith.index_cast %455 : i32 to index
    %c0_139 = arith.constant 0 : index
    %457 = vector.load %arg20[%456, %c0_139] : memref<8x128xf32, #tpu.memory_space<vmem>>, vector<1x128xf32>
    tpu.vector_store %arg20[%456, %c0_139], %452 {strides = array<i32>} : memref<8x128xf32, #tpu.memory_space<vmem>>, vector<1x128xf32>,
    %c3_i32_140 = arith.constant 3 : i32
    %458 = arith.index_cast %c3_i32_140 : i32 to index
    %c0_141 = arith.constant 0 : index
    %459 = vector.load %arg18[%458, %c0_141] : memref<8x384xf32, #tpu.memory_space<vmem>>, vector<1x384xf32>
    %460 = arith.truncf %452 : vector<1x128xf32> to vector<1x128xbf16>
    %cst_142 = arith.constant dense<0.000000e+00> : vector<1x384xf32>
    %461 = tpu.matmul %460, %353, %cst_142 {dimension_numbers = #tpu.dot_dimension_numbers<[1], [0], [0], [1], [0, 0, 1, 1], [], []>} : vector<1x128xbf16>, vector<128x384xbf16>, vector<1x384xf32> -> vector<1x384xf32>
    %462 = vector.extract_strided_slice %459 {offsets = [0, 0], sizes = [1, 128], strides = [1, 1]} : vector<1x384xf32> to vector<1x128xf32>
    %463 = vector.extract_strided_slice %461 {offsets = [0, 0], sizes = [1, 128], strides = [1, 1]} : vector<1x384xf32> to vector<1x128xf32>
    %464 = arith.addf %462, %463 : vector<1x128xf32>
    %465 = arith.negf %464 : vector<1x128xf32>
    %466 = math.exp %465 : vector<1x128xf32>
    %cst_143 = arith.constant 1.000000e+00 : f32
    %467 = vector.broadcast %cst_143 : f32 to vector<1x128xf32>
    %468 = arith.addf %467, %466 : vector<1x128xf32>
    %469 = arith.divf %467, %468 : vector<1x128xf32>
    %470 = vector.extract_strided_slice %459 {offsets = [0, 128], sizes = [1, 128], strides = [1, 1]} : vector<1x384xf32> to vector<1x128xf32>
    %471 = vector.extract_strided_slice %461 {offsets = [0, 128], sizes = [1, 128], strides = [1, 1]} : vector<1x384xf32> to vector<1x128xf32>
    %472 = arith.addf %470, %471 : vector<1x128xf32>
    %473 = arith.negf %472 : vector<1x128xf32>
    %474 = math.exp %473 : vector<1x128xf32>
    %cst_144 = arith.constant 1.000000e+00 : f32
    %475 = vector.broadcast %cst_144 : f32 to vector<1x128xf32>
    %476 = arith.addf %475, %474 : vector<1x128xf32>
    %477 = arith.divf %475, %476 : vector<1x128xf32>
    %478 = vector.extract_strided_slice %459 {offsets = [0, 256], sizes = [1, 128], strides = [1, 1]} : vector<1x384xf32> to vector<1x128xf32>
    %479 = vector.extract_strided_slice %461 {offsets = [0, 256], sizes = [1, 128], strides = [1, 1]} : vector<1x384xf32> to vector<1x128xf32>
    %480 = arith.addf %479, %354 : vector<1x128xf32>
    %481 = arith.mulf %469, %480 : vector<1x128xf32>
    %482 = arith.addf %478, %481 : vector<1x128xf32>
    %483 = math.tanh %482 : vector<1x128xf32>
    %484 = arith.subf %452, %483 : vector<1x128xf32>
    %485 = arith.mulf %477, %484 : vector<1x128xf32>
    %486 = arith.addf %483, %485 : vector<1x128xf32>
    %487 = arith.index_cast %c3_i32_140 : i32 to index
    %c0_145 = arith.constant 0 : index
    %488 = vector.load %arg19[%487, %c0_145] : memref<8x128xf32, #tpu.memory_space<vmem>>, vector<1x128xf32>
    tpu.vector_store %arg19[%487, %c0_145], %486 {strides = array<i32>} : memref<8x128xf32, #tpu.memory_space<vmem>>, vector<1x128xf32>,
    %c7_i32_146 = arith.constant 7 : i32
    %489 = arith.subi %c7_i32_146, %c3_i32_140 : i32
    %490 = arith.index_cast %489 : i32 to index
    %c0_147 = arith.constant 0 : index
    %491 = vector.load %arg20[%490, %c0_147] : memref<8x128xf32, #tpu.memory_space<vmem>>, vector<1x128xf32>
    tpu.vector_store %arg20[%490, %c0_147], %486 {strides = array<i32>} : memref<8x128xf32, #tpu.memory_space<vmem>>, vector<1x128xf32>,
    %c4_i32_148 = arith.constant 4 : i32
    %492 = arith.index_cast %c4_i32_148 : i32 to index
    %c0_149 = arith.constant 0 : index
    %493 = vector.load %arg18[%492, %c0_149] : memref<8x384xf32, #tpu.memory_space<vmem>>, vector<1x384xf32>
    %494 = arith.truncf %486 : vector<1x128xf32> to vector<1x128xbf16>
    %cst_150 = arith.constant dense<0.000000e+00> : vector<1x384xf32>
    %495 = tpu.matmul %494, %353, %cst_150 {dimension_numbers = #tpu.dot_dimension_numbers<[1], [0], [0], [1], [0, 0, 1, 1], [], []>} : vector<1x128xbf16>, vector<128x384xbf16>, vector<1x384xf32> -> vector<1x384xf32>
    %496 = vector.extract_strided_slice %493 {offsets = [0, 0], sizes = [1, 128], strides = [1, 1]} : vector<1x384xf32> to vector<1x128xf32>
    %497 = vector.extract_strided_slice %495 {offsets = [0, 0], sizes = [1, 128], strides = [1, 1]} : vector<1x384xf32> to vector<1x128xf32>
    %498 = arith.addf %496, %497 : vector<1x128xf32>
    %499 = arith.negf %498 : vector<1x128xf32>
    %500 = math.exp %499 : vector<1x128xf32>
    %cst_151 = arith.constant 1.000000e+00 : f32
    %501 = vector.broadcast %cst_151 : f32 to vector<1x128xf32>
    %502 = arith.addf %501, %500 : vector<1x128xf32>
    %503 = arith.divf %501, %502 : vector<1x128xf32>
    %504 = vector.extract_strided_slice %493 {offsets = [0, 128], sizes = [1, 128], strides = [1, 1]} : vector<1x384xf32> to vector<1x128xf32>
    %505 = vector.extract_strided_slice %495 {offsets = [0, 128], sizes = [1, 128], strides = [1, 1]} : vector<1x384xf32> to vector<1x128xf32>
    %506 = arith.addf %504, %505 : vector<1x128xf32>
    %507 = arith.negf %506 : vector<1x128xf32>
    %508 = math.exp %507 : vector<1x128xf32>
    %cst_152 = arith.constant 1.000000e+00 : f32
    %509 = vector.broadcast %cst_152 : f32 to vector<1x128xf32>
    %510 = arith.addf %509, %508 : vector<1x128xf32>
    %511 = arith.divf %509, %510 : vector<1x128xf32>
    %512 = vector.extract_strided_slice %493 {offsets = [0, 256], sizes = [1, 128], strides = [1, 1]} : vector<1x384xf32> to vector<1x128xf32>
    %513 = vector.extract_strided_slice %495 {offsets = [0, 256], sizes = [1, 128], strides = [1, 1]} : vector<1x384xf32> to vector<1x128xf32>
    %514 = arith.addf %513, %354 : vector<1x128xf32>
    %515 = arith.mulf %503, %514 : vector<1x128xf32>
    %516 = arith.addf %512, %515 : vector<1x128xf32>
    %517 = math.tanh %516 : vector<1x128xf32>
    %518 = arith.subf %486, %517 : vector<1x128xf32>
    %519 = arith.mulf %511, %518 : vector<1x128xf32>
    %520 = arith.addf %517, %519 : vector<1x128xf32>
    %521 = arith.index_cast %c4_i32_148 : i32 to index
    %c0_153 = arith.constant 0 : index
    %522 = vector.load %arg19[%521, %c0_153] : memref<8x128xf32, #tpu.memory_space<vmem>>, vector<1x128xf32>
    tpu.vector_store %arg19[%521, %c0_153], %520 {strides = array<i32>} : memref<8x128xf32, #tpu.memory_space<vmem>>, vector<1x128xf32>,
    %c7_i32_154 = arith.constant 7 : i32
    %523 = arith.subi %c7_i32_154, %c4_i32_148 : i32
    %524 = arith.index_cast %523 : i32 to index
    %c0_155 = arith.constant 0 : index
    %525 = vector.load %arg20[%524, %c0_155] : memref<8x128xf32, #tpu.memory_space<vmem>>, vector<1x128xf32>
    tpu.vector_store %arg20[%524, %c0_155], %520 {strides = array<i32>} : memref<8x128xf32, #tpu.memory_space<vmem>>, vector<1x128xf32>,
    %c5_i32_156 = arith.constant 5 : i32
    %526 = arith.index_cast %c5_i32_156 : i32 to index
    %c0_157 = arith.constant 0 : index
    %527 = vector.load %arg18[%526, %c0_157] : memref<8x384xf32, #tpu.memory_space<vmem>>, vector<1x384xf32>
    %528 = arith.truncf %520 : vector<1x128xf32> to vector<1x128xbf16>
    %cst_158 = arith.constant dense<0.000000e+00> : vector<1x384xf32>
    %529 = tpu.matmul %528, %353, %cst_158 {dimension_numbers = #tpu.dot_dimension_numbers<[1], [0], [0], [1], [0, 0, 1, 1], [], []>} : vector<1x128xbf16>, vector<128x384xbf16>, vector<1x384xf32> -> vector<1x384xf32>
    %530 = vector.extract_strided_slice %527 {offsets = [0, 0], sizes = [1, 128], strides = [1, 1]} : vector<1x384xf32> to vector<1x128xf32>
    %531 = vector.extract_strided_slice %529 {offsets = [0, 0], sizes = [1, 128], strides = [1, 1]} : vector<1x384xf32> to vector<1x128xf32>
    %532 = arith.addf %530, %531 : vector<1x128xf32>
    %533 = arith.negf %532 : vector<1x128xf32>
    %534 = math.exp %533 : vector<1x128xf32>
    %cst_159 = arith.constant 1.000000e+00 : f32
    %535 = vector.broadcast %cst_159 : f32 to vector<1x128xf32>
    %536 = arith.addf %535, %534 : vector<1x128xf32>
    %537 = arith.divf %535, %536 : vector<1x128xf32>
    %538 = vector.extract_strided_slice %527 {offsets = [0, 128], sizes = [1, 128], strides = [1, 1]} : vector<1x384xf32> to vector<1x128xf32>
    %539 = vector.extract_strided_slice %529 {offsets = [0, 128], sizes = [1, 128], strides = [1, 1]} : vector<1x384xf32> to vector<1x128xf32>
    %540 = arith.addf %538, %539 : vector<1x128xf32>
    %541 = arith.negf %540 : vector<1x128xf32>
    %542 = math.exp %541 : vector<1x128xf32>
    %cst_160 = arith.constant 1.000000e+00 : f32
    %543 = vector.broadcast %cst_160 : f32 to vector<1x128xf32>
    %544 = arith.addf %543, %542 : vector<1x128xf32>
    %545 = arith.divf %543, %544 : vector<1x128xf32>
    %546 = vector.extract_strided_slice %527 {offsets = [0, 256], sizes = [1, 128], strides = [1, 1]} : vector<1x384xf32> to vector<1x128xf32>
    %547 = vector.extract_strided_slice %529 {offsets = [0, 256], sizes = [1, 128], strides = [1, 1]} : vector<1x384xf32> to vector<1x128xf32>
    %548 = arith.addf %547, %354 : vector<1x128xf32>
    %549 = arith.mulf %537, %548 : vector<1x128xf32>
    %550 = arith.addf %546, %549 : vector<1x128xf32>
    %551 = math.tanh %550 : vector<1x128xf32>
    %552 = arith.subf %520, %551 : vector<1x128xf32>
    %553 = arith.mulf %545, %552 : vector<1x128xf32>
    %554 = arith.addf %551, %553 : vector<1x128xf32>
    %555 = arith.index_cast %c5_i32_156 : i32 to index
    %c0_161 = arith.constant 0 : index
    %556 = vector.load %arg19[%555, %c0_161] : memref<8x128xf32, #tpu.memory_space<vmem>>, vector<1x128xf32>
    tpu.vector_store %arg19[%555, %c0_161], %554 {strides = array<i32>} : memref<8x128xf32, #tpu.memory_space<vmem>>, vector<1x128xf32>,
    %c7_i32_162 = arith.constant 7 : i32
    %557 = arith.subi %c7_i32_162, %c5_i32_156 : i32
    %558 = arith.index_cast %557 : i32 to index
    %c0_163 = arith.constant 0 : index
    %559 = vector.load %arg20[%558, %c0_163] : memref<8x128xf32, #tpu.memory_space<vmem>>, vector<1x128xf32>
    tpu.vector_store %arg20[%558, %c0_163], %554 {strides = array<i32>} : memref<8x128xf32, #tpu.memory_space<vmem>>, vector<1x128xf32>,
    %c6_i32_164 = arith.constant 6 : i32
    %560 = arith.index_cast %c6_i32_164 : i32 to index
    %c0_165 = arith.constant 0 : index
    %561 = vector.load %arg18[%560, %c0_165] : memref<8x384xf32, #tpu.memory_space<vmem>>, vector<1x384xf32>
    %562 = arith.truncf %554 : vector<1x128xf32> to vector<1x128xbf16>
    %cst_166 = arith.constant dense<0.000000e+00> : vector<1x384xf32>
    %563 = tpu.matmul %562, %353, %cst_166 {dimension_numbers = #tpu.dot_dimension_numbers<[1], [0], [0], [1], [0, 0, 1, 1], [], []>} : vector<1x128xbf16>, vector<128x384xbf16>, vector<1x384xf32> -> vector<1x384xf32>
    %564 = vector.extract_strided_slice %561 {offsets = [0, 0], sizes = [1, 128], strides = [1, 1]} : vector<1x384xf32> to vector<1x128xf32>
    %565 = vector.extract_strided_slice %563 {offsets = [0, 0], sizes = [1, 128], strides = [1, 1]} : vector<1x384xf32> to vector<1x128xf32>
    %566 = arith.addf %564, %565 : vector<1x128xf32>
    %567 = arith.negf %566 : vector<1x128xf32>
    %568 = math.exp %567 : vector<1x128xf32>
    %cst_167 = arith.constant 1.000000e+00 : f32
    %569 = vector.broadcast %cst_167 : f32 to vector<1x128xf32>
    %570 = arith.addf %569, %568 : vector<1x128xf32>
    %571 = arith.divf %569, %570 : vector<1x128xf32>
    %572 = vector.extract_strided_slice %561 {offsets = [0, 128], sizes = [1, 128], strides = [1, 1]} : vector<1x384xf32> to vector<1x128xf32>
    %573 = vector.extract_strided_slice %563 {offsets = [0, 128], sizes = [1, 128], strides = [1, 1]} : vector<1x384xf32> to vector<1x128xf32>
    %574 = arith.addf %572, %573 : vector<1x128xf32>
    %575 = arith.negf %574 : vector<1x128xf32>
    %576 = math.exp %575 : vector<1x128xf32>
    %cst_168 = arith.constant 1.000000e+00 : f32
    %577 = vector.broadcast %cst_168 : f32 to vector<1x128xf32>
    %578 = arith.addf %577, %576 : vector<1x128xf32>
    %579 = arith.divf %577, %578 : vector<1x128xf32>
    %580 = vector.extract_strided_slice %561 {offsets = [0, 256], sizes = [1, 128], strides = [1, 1]} : vector<1x384xf32> to vector<1x128xf32>
    %581 = vector.extract_strided_slice %563 {offsets = [0, 256], sizes = [1, 128], strides = [1, 1]} : vector<1x384xf32> to vector<1x128xf32>
    %582 = arith.addf %581, %354 : vector<1x128xf32>
    %583 = arith.mulf %571, %582 : vector<1x128xf32>
    %584 = arith.addf %580, %583 : vector<1x128xf32>
    %585 = math.tanh %584 : vector<1x128xf32>
    %586 = arith.subf %554, %585 : vector<1x128xf32>
    %587 = arith.mulf %579, %586 : vector<1x128xf32>
    %588 = arith.addf %585, %587 : vector<1x128xf32>
    %589 = arith.index_cast %c6_i32_164 : i32 to index
    %c0_169 = arith.constant 0 : index
    %590 = vector.load %arg19[%589, %c0_169] : memref<8x128xf32, #tpu.memory_space<vmem>>, vector<1x128xf32>
    tpu.vector_store %arg19[%589, %c0_169], %588 {strides = array<i32>} : memref<8x128xf32, #tpu.memory_space<vmem>>, vector<1x128xf32>,
    %c7_i32_170 = arith.constant 7 : i32
    %591 = arith.subi %c7_i32_170, %c6_i32_164 : i32
    %592 = arith.index_cast %591 : i32 to index
    %c0_171 = arith.constant 0 : index
    %593 = vector.load %arg20[%592, %c0_171] : memref<8x128xf32, #tpu.memory_space<vmem>>, vector<1x128xf32>
    tpu.vector_store %arg20[%592, %c0_171], %588 {strides = array<i32>} : memref<8x128xf32, #tpu.memory_space<vmem>>, vector<1x128xf32>,
    %c7_i32_172 = arith.constant 7 : i32
    %594 = arith.index_cast %c7_i32_172 : i32 to index
    %c0_173 = arith.constant 0 : index
    %595 = vector.load %arg18[%594, %c0_173] : memref<8x384xf32, #tpu.memory_space<vmem>>, vector<1x384xf32>
    %596 = arith.truncf %588 : vector<1x128xf32> to vector<1x128xbf16>
    %cst_174 = arith.constant dense<0.000000e+00> : vector<1x384xf32>
    %597 = tpu.matmul %596, %353, %cst_174 {dimension_numbers = #tpu.dot_dimension_numbers<[1], [0], [0], [1], [0, 0, 1, 1], [], []>} : vector<1x128xbf16>, vector<128x384xbf16>, vector<1x384xf32> -> vector<1x384xf32>
    %598 = vector.extract_strided_slice %595 {offsets = [0, 0], sizes = [1, 128], strides = [1, 1]} : vector<1x384xf32> to vector<1x128xf32>
    %599 = vector.extract_strided_slice %597 {offsets = [0, 0], sizes = [1, 128], strides = [1, 1]} : vector<1x384xf32> to vector<1x128xf32>
    %600 = arith.addf %598, %599 : vector<1x128xf32>
    %601 = arith.negf %600 : vector<1x128xf32>
    %602 = math.exp %601 : vector<1x128xf32>
    %cst_175 = arith.constant 1.000000e+00 : f32
    %603 = vector.broadcast %cst_175 : f32 to vector<1x128xf32>
    %604 = arith.addf %603, %602 : vector<1x128xf32>
    %605 = arith.divf %603, %604 : vector<1x128xf32>
    %606 = vector.extract_strided_slice %595 {offsets = [0, 128], sizes = [1, 128], strides = [1, 1]} : vector<1x384xf32> to vector<1x128xf32>
    %607 = vector.extract_strided_slice %597 {offsets = [0, 128], sizes = [1, 128], strides = [1, 1]} : vector<1x384xf32> to vector<1x128xf32>
    %608 = arith.addf %606, %607 : vector<1x128xf32>
    %609 = arith.negf %608 : vector<1x128xf32>
    %610 = math.exp %609 : vector<1x128xf32>
    %cst_176 = arith.constant 1.000000e+00 : f32
    %611 = vector.broadcast %cst_176 : f32 to vector<1x128xf32>
    %612 = arith.addf %611, %610 : vector<1x128xf32>
    %613 = arith.divf %611, %612 : vector<1x128xf32>
    %614 = vector.extract_strided_slice %595 {offsets = [0, 256], sizes = [1, 128], strides = [1, 1]} : vector<1x384xf32> to vector<1x128xf32>
    %615 = vector.extract_strided_slice %597 {offsets = [0, 256], sizes = [1, 128], strides = [1, 1]} : vector<1x384xf32> to vector<1x128xf32>
    %616 = arith.addf %615, %354 : vector<1x128xf32>
    %617 = arith.mulf %605, %616 : vector<1x128xf32>
    %618 = arith.addf %614, %617 : vector<1x128xf32>
    %619 = math.tanh %618 : vector<1x128xf32>
    %620 = arith.subf %588, %619 : vector<1x128xf32>
    %621 = arith.mulf %613, %620 : vector<1x128xf32>
    %622 = arith.addf %619, %621 : vector<1x128xf32>
    %623 = arith.index_cast %c7_i32_172 : i32 to index
    %c0_177 = arith.constant 0 : index
    %624 = vector.load %arg19[%623, %c0_177] : memref<8x128xf32, #tpu.memory_space<vmem>>, vector<1x128xf32>
    tpu.vector_store %arg19[%623, %c0_177], %622 {strides = array<i32>} : memref<8x128xf32, #tpu.memory_space<vmem>>, vector<1x128xf32>,
    %c7_i32_178 = arith.constant 7 : i32
    %625 = arith.subi %c7_i32_178, %c7_i32_172 : i32
    %626 = arith.index_cast %625 : i32 to index
    %c0_179 = arith.constant 0 : index
    %627 = vector.load %arg20[%626, %c0_179] : memref<8x128xf32, #tpu.memory_space<vmem>>, vector<1x128xf32>
    tpu.vector_store %arg20[%626, %c0_179], %622 {strides = array<i32>} : memref<8x128xf32, #tpu.memory_space<vmem>>, vector<1x128xf32>,
    %c8_i32_180 = arith.constant 8 : i32
    %c0_181 = arith.constant 0 : index
    %c0_182 = arith.constant 0 : index
    %628 = vector.load %arg19[%c0_181, %c0_182] : memref<8x128xf32, #tpu.memory_space<vmem>>, vector<8x128xf32>
    %c0_183 = arith.constant 0 : index
    %c0_184 = arith.constant 0 : index
    %629 = vector.load %arg20[%c0_183, %c0_184] : memref<8x128xf32, #tpu.memory_space<vmem>>, vector<8x128xf32>
    %630 = vector.shape_cast %21 : vector<1x128xi1> to vector<1x128xi1>
    %631 = vector.broadcast %630 : vector<1x128xi1> to vector<8x128xi1>
    %632 = arith.select %631, %628, %629 : vector<8x128xi1>, vector<8x128xf32>
    %633 = arith.truncf %632 : vector<8x128xf32> to vector<8x128xbf16>
    %c0_185 = arith.constant 0 : index
    %c0_186 = arith.constant 0 : index
    %634 = vector.load %arg15[%c0_185, %c0_186] : memref<128x128xbf16, #tpu.memory_space<vmem>>, vector<128x128xbf16>
    %cst_187 = arith.constant dense<0.000000e+00> : vector<8x128xf32>
    %635 = tpu.matmul %633, %634, %cst_187 {dimension_numbers = #tpu.dot_dimension_numbers<[1], [0], [0], [1], [0, 0, 1, 1], [], []>} : vector<8x128xbf16>, vector<128x128xbf16>, vector<8x128xf32> -> vector<8x128xf32>
    %c0_188 = arith.constant 0 : index
    %c0_189 = arith.constant 0 : index
    %636 = vector.load %arg16[%c0_188, %c0_189] : memref<1x128xf32, #tpu.memory_space<vmem>>, vector<1x128xf32>
    %637 = vector.broadcast %636 : vector<1x128xf32> to vector<8x128xf32>
    %638 = arith.addf %635, %637 : vector<8x128xf32>
    %c0_190 = arith.constant 0 : index
    %c0_191 = arith.constant 0 : index
    %639 = vector.load %arg17[%c0_190, %c0_191] : memref<8x128xf32, #tpu.memory_space<vmem>>, vector<8x128xf32>
    tpu.vector_store %arg17[%c0_190, %c0_191], %638 {strides = array<i32>} : memref<8x128xf32, #tpu.memory_space<vmem>>, vector<8x128xf32>,
    return
  }
}

</mosaic_0001>

<bundles_post_ra>
// kernel: net_forward.1
= control target key start
LH: loop header
LB: loop body
LE: loop exit
PB: predicated region body
PF: predicated region fallthrough
CT: control target
= control target key end

     0   :  { %vm110_vm0 = vcmask 1041408   ;;  %v4290_v0 = vmov 0.0   ;;  %vm4291_vm1 = vmmov 0   ;;  %vm106_vm2 = vcmask 31744   ;;  %s5724_s3 = inlined_call_operand.vmem [shape: bf16[4,16], index: 3, kind: input, shape index: {}]   ;;  %s5725_s2 = inlined_call_operand.vmem [shape: f32[8,4], index: 2, kind: input, shape index: {}]   ;;  %s5726_s1 = inlined_call_operand.vmem [shape: bf16[8,8], index: 1, kind: input, shape index: {}]   ;;  %s5727_s5 = inlined_call_operand.vmem [shape: bf16[16,32], index: 5, kind: input, shape index: {}]   ;;  %s5728_s4 = inlined_call_operand.vmem [shape: f32[1,16], index: 4, kind: input, shape index: {}]   ;;  %s5729_s7 = inlined_call_operand.vmem [shape: bf16[32,384], index: 7, kind: input, shape index: {}]   ;;  %s5730_s6 = inlined_call_operand.vmem [shape: f32[1,32], index: 6, kind: input, shape index: {}]   ;;  %s5731_s0 = inlined_call_operand.vmem [shape: bf16[8,8], index: 0, kind: input, shape index: {}]   ;;  %s5732_s9 = inlined_call_operand.vmem [shape: bf16[128,384], index: 9, kind: input, shape index: {}]   ;;  %s5733_s8 = inlined_call_operand.vmem [shape: f32[1,384], index: 8, kind: input, shape index: {}]   ;;  %s5734_s10 = inlined_call_operand.vmem [shape: f32[1,128], index: 10, kind: input, shape index: {}]   ;;  %s5735_s11 = inlined_call_operand.vmem [shape: bf16[128,384], index: 11, kind: input, shape index: {}]   ;;  %s5736_s13 = inlined_call_operand.vmem [shape: bf16[128,384], index: 13, kind: input, shape index: {}]   ;;  %s5737_s12 = inlined_call_operand.vmem [shape: f32[1,384], index: 12, kind: input, shape index: {}]   ;;  %s5738_s14 = inlined_call_operand.vmem [shape: f32[1,128], index: 14, kind: input, shape index: {}]   ;;  %s5739_s15 = inlined_call_operand.vmem [shape: bf16[128,128], index: 15, kind: input, shape index: {}]   ;;  %s5740_s16 = inlined_call_operand.vmem [shape: f32[1,128], index: 16, kind: input, shape index: {}]   ;;  %s5741_s17 = inlined_call_operand.vmem [shape: f32[8,128], index: 17, kind: output, shape index: {}]  }
   0x1   :  { %5742 = sst [smem:[#allocation5_spill]] %s5724_s3  ;;  %3546 = vmatprep.subr.bf16.mxu1 %v4290_v0  ;;  %3548 = vmatprep.mubr.msk.bf16.mxu1 %vm4291_vm1, %v4290_v0  ;;  %vm166_vm3 = vcmask 1043456   ;;  %v101_v11 = vld [vmem:[%s5726_s1] sm:$0xf]  ;;  %vm162_vm4 = vcmask 64512   ;;  %vm220_vm5 = vcmask 130048  }
   0x2   :  { %5743 = sst [smem:[#allocation6_spill]] %s5725_s2  ;;  %s5744_s26 = sld [smem:[#allocation5_spill]]  ;;  %3570 = vmatprep.subr.bf16.mxu0 %v4290_v0  ;;  %3572 = vmatprep.mubr.msk.bf16.mxu0 %vm4291_vm1, %v4290_v0  ;;  %v3981_v12 = vld [vmem:[%s5727_s5] sm:$0xff]   ;;  %v3987_v29 = vld [vmem:[%s5729_s7 + $0x1c] ss:$12 sps:$4 sm:$0xff]   ;;  %v4292_v31 = vmov 0  }
   0x3   :  { %s5745_s29 = sld [smem:[#allocation6_spill]]  ;;  %v3226_v13 = vld [vmem:[%s5728_s4] ss:$0 sm:$0xff]  ;;  %v3984_v24 = vld [vmem:[%s5729_s7 + $0x4] ss:$12 sps:$4 sm:$0xff]   ;;  %vm404_vm6 = vcmask 261120  }
   0x4   :  { %v3982_v28 = vld [vmem:[%s5729_s7] ss:$12 sps:$4 sm:$0xff]   ;;  %v3985_v30 = vld [vmem:[%s5729_s7 + $0x18] ss:$12 sps:$4 sm:$0xff]   ;;  %v3988_v42 = vld [vmem:[%s5729_s7 + $0x8] ss:$12 sps:$4 sm:$0xff]  }
   0x5   :  { %v3230_v32 = vld [vmem:[%s5730_s6] ss:$0 sm:$0xff]  ;;  %v4459_v44 = vld [vmem:[%s5732_s9 + $0x4] ss:$12 sps:$4 sm:$0xff]   ;;  %v4474_v51 = vld [vmem:[%s5732_s9 + $0x8] ss:$12 sps:$4 sm:$0xff]  }
   0x6   :  { %v102_v41 = vld [vmem:[%s5731_s0] sm:$0xf]  ;;  %v4479_v54 = vld [vmem:[%s5732_s9 + $0x1c] ss:$12 sps:$4 sm:$0xff]   ;;  %v4487_v57 = vld [vmem:[%s5732_s9 + $0x18] ss:$12 sps:$4 sm:$0xff]  }
   0x7   :  { %v3989_v43 = vld [vmem:[%s5729_s7 + $0x20] ss:$12 sps:$4 sm:$0xff]   ;;  %v4511_v61 = vld [vmem:[%s5732_s9 + $0x30] ss:$12 sps:$4 sm:$0xff]   ;;  %v4517_v62 = vld [vmem:[%s5732_s9 + $0x38] ss:$12 sps:$4 sm:$0xff]  }
   0x8   :  { %v105_v1 = vld [vmem:[%s5744_s26] sm:$0x3] }
   0x9   :  { %v103_v2 = vld [vmem:[%s5745_s29] sm:$0xff]  ;;  %v112_v3 = vsel %vm110_vm0, %v105_v1, 0  ;;  %v4523_v1 = vld [vmem:[%s5732_s9 + $0x4c] ss:$12 sps:$4 sm:$0xff]  }
   0xa   :  { %v104_v4 = vpack.c.bf16 %v103_v2, %v103_v2  ;;  %3547 = vmatpush3.bf16.msra.mxu1 %v112_v3  ;;  %v4469_v50 = vld [vmem:[%s5732_s9] ss:$12 sps:$4 sm:$0xff]  }
   0xb   :  { %3552 = vmatprep.subr.bf16.mxu1 %v4290_v0  ;;  %v4493_v58 = vld [vmem:[%s5732_s9 + $0x20] ss:$12 sps:$4 sm:$0xff]  }
   0xc   :  { %v4499_v59 = vld [vmem:[%s5732_s9 + $0x34] ss:$12 sps:$4 sm:$0xff]  }
   0xd   :  { %3549 = vmatmul.mubr.msk.bf16.vlgmr.msra.gmra.mrb[0].mxu1 %vm106_vm2, %v104_v4  ;;  %v4530_v4 = vld [vmem:[%s5732_s9 + $0x48] ss:$12 sps:$4 sm:$0xff]  }
   0xe   :  { %3554 = vmatprep.mubr.msk.bf16.mxu1 %vm4291_vm1, %v4290_v0 }
  0xe0   :  { %v148_v5 = vpop.f32.mrb[0].mxu1 }
  0xe1   :  { %v154_v6 = vpack.c.bf16 %v148_v5, %v148_v5  ;;  %v3550_v7 = vpop.f32.mrb[1].mxu1  ;;  %v4536_v5 = vld [vmem:[%s5732_s9 + $0x50] ss:$12 sps:$4 sm:$0xff]  }
  0xe2   :  { %v151_v8 = vpop.f32.mrb[2].mxu1  ;;  %v4549_v7 = vld [vmem:[%s5732_s9 + $0x60] ss:$12 sps:$4 sm:$0xff]  }
  0xe3   :  { %v168_v9 = vsel %vm166_vm3, %v154_v6, 0  ;;  %v3551_v10 = vpop.f32.mrb[3].mxu1  ;;  %v4542_v6 = vld [vmem:[%s5732_s9 + $0x64] ss:$12 sps:$4 sm:$0xff]   ;;  %v4555_v8 = vld [vmem:[%s5732_s9 + $0x68] ss:$12 sps:$4 sm:$0xff]  }
  0xe4   :  { %3553 = vmatpush3.bf16.msra.mxu1 %v168_v9  ;;  %v4561_v9 = vld [vmem:[%s5732_s9 + $0x7c] ss:$12 sps:$4 sm:$0xff]   ;;  %v4568_v10 = vld [vmem:[%s5732_s9 + $0x78] ss:$12 sps:$4 sm:$0xff]  }
  0xe5   :  { %3558 = vmatprep.subr.bf16.mxu1 %v4290_v0 }
  0xe7   :  { %3555 = vmatmul.mubr.msk.bf16.vlgmr.msra.gmra.mrb[4].mxu1 %vm162_vm4, %v101_v11 }
  0xe8   :  { %3560 = vmatprep.mubr.msk.bf16.mxu1 %vm4291_vm1, %v4290_v0  ;;  %3559 = vmatpush3.bf16.msra.mxu1 %v3981_v12  ;;  %v4580_v12 = vld [vmem:[%s5732_s9 + $0x94] ss:$12 sps:$4 sm:$0xff]  }
  0xe9   :  { %3564 = vmatprep.subr.bf16.mxu1 %v4290_v0 }
 0x1ba   :  { %v204_v14 = vpop.f32.mrb[4].mxu1 }
 0x1bb   :  { %v205_v15 = vadd.f32 %v3226_v13, %v204_v14  ;;  %v3556_v16 = vpop.f32.mrb[5].mxu1  ;;  %v4587_v13 = vld [vmem:[%s5732_s9 + $0x90] ss:$12 sps:$4 sm:$0xff]   ;;  %v4593_v14 = vld [vmem:[%s5732_s9 + $0x98] ss:$12 sps:$4 sm:$0xff]  }
 0x1bc   :  { %v207_v17 = vpop.f32.mrb[6].mxu1  ;;  %v4606_v16 = vld [vmem:[%s5732_s9 + $0xa8] ss:$12 sps:$4 sm:$0xff]  }
 0x1bd   :  { %v210_v18 = vmax.f32 %v205_v15, 0.0  ;;  %v3557_v19 = vpop.f32.mrb[7].mxu1  ;;  %v4599_v15 = vld [vmem:[%s5732_s9 + $0xac] ss:$12 sps:$4 sm:$0xff]   ;;  %v4612_v17 = vld [vmem:[%s5732_s9 + $0xb0] ss:$12 sps:$4 sm:$0xff]  }
 0x1bf   :  { %v211_v20 = vpack.c.bf16 %v210_v18, %v210_v18  ;;  %v57_v18 = vlaneseq }
 0x1c1   :  { %3561 = vmatmul.mubr.msk.bf16.vlgmr.msra.gmra.mrb[8].mxu1 %vm220_vm5, %v211_v20  ;;  %v4657_v19 = vand.u32 127, %v57_v18  ;;  %v4659_v20 = vshrl.u32 %v57_v18, 7 }
 0x1c2   :  { %3566 = vmatprep.mubr.msk.bf16.mxu1 %vm4291_vm1, %v4290_v0 }
 0x1c3   :  { %vm97_vm7 = vcmp.lt.s32.totalorder %v4657_v19, 64 }
 0x294   :  { %v258_v21 = vpop.f32.mrb[8].mxu1 }
 0x295   :  { %v264_v22 = vpack.c.bf16 %v258_v21, %v258_v21  ;;  %v3562_v23 = vpop.f32.mrb[9].mxu1  ;;  %v60_v21 = vadd.s32 256, %v4657_v19 }
 0x296   :  { %v261_v25 = vpop.f32.mrb[10].mxu1  ;;  %v585_v23 = vsub.s32 0, %v4659_v20 }
 0x297   :  { %v273_v26 = vsel %vm166_vm3, %v264_v22, 0  ;;  %v3563_v27 = vpop.f32.mrb[11].mxu1  ;;  %v59_v22 = vadd.s32 128, %v4657_v19  ;;  %v593_v25 = vsub.s32 2, %v4659_v20 }
 0x298   :  { %3565 = vmatpush3.bf16.msra.mxu1 %v273_v26  ;;  %v581_v26 = vld [vmem:[%s5733_s8] sm:$0x7] }
 0x299   :  { %407 = vmatprep.subr.bf16.mxu1 %v3984_v24  ;;  %v72_v27 = vand.u32 127, %v59_v22 }
 0x29b   :  { %3567 = vmatmul.mubr.msk.bf16.vlgmr.msra.gmra.mrb[12].mxu1 %vm162_vm4, %v101_v11  ;;  %v4574_v11 = vld [vmem:[%s5732_s9 + $0x80] ss:$12 sps:$4 sm:$0xff]   ;;  %vm4678_vm9 = vcmp.lt.s32.totalorder %v72_v27, 64 }
 0x29c   :  { %408 = vmatpush1.bf16.msra.mxu1 %v3982_v28  ;;  %439 = vmatprep.mubr.bf16.mxu1 %v4292_v31 }
 0x29d   :  { %409 = vmatprep.subr.bf16.mxu1 %v3987_v29 }
 0x2a0   :  { %410 = vmatpush1.bf16.msra.mxu1 %v3985_v30 }
 0x2a1   :  { %491 = vmatprep.subr.bf16.mxu1 %v3984_v24  ;;  %v79_v24 = vand.u32 127, %v60_v21 }
 0x2a3   :  { %vm4672_vm8 = vcmp.lt.s32.totalorder %v79_v24, 64 }
 0x36e   :  { %v309_v33 = vpop.f32.mrb[12].mxu1 }
 0x36f   :  { %v310_v34 = vadd.f32 %v3230_v32, %v309_v33  ;;  %v3568_v35 = vpop.f32.mrb[13].mxu1  ;;  %v594_v32 = vrot.slane %v581_v26, %v593_v25 }
 0x370   :  { %v312_v36 = vpop.f32.mrb[14].mxu1 }
 0x371   :  { %v315_v37 = vmax.f32 %v310_v34, 0.0  ;;  %v3569_v38 = vpop.f32.mrb[15].mxu1 }
 0x373   :  { %v316_v39 = vpack.c.bf16 %v315_v37, %v315_v37 }
 0x375   :  { %3239 = vmatmul.mubr.msk.bf16.vlgmr.msra.gmra.mrb[16].mxu1 %vm404_vm6, %v316_v39  ;;  %v321_v40 = vsel %vm166_vm3, %v316_v39, 0 }
 0x376   :  { %3571 = vmatpush3.bf16.msra.mxu0 %v321_v40  ;;  %492 = vmatpush1.bf16.msra.mxu1 %v3982_v28  ;;  %v589_v28 = vsub.s32 1, %v4659_v20 }
 0x377   :  { %3576 = vmatprep.subr.bf16.mxu0 %v4290_v0  ;;  %493 = vmatprep.subr.bf16.mxu1 %v3987_v29  ;;  %v586_v29 = vrot.slane %v581_v26, %v585_v23 }
 0x378   :  { %523 = vmatprep.mubr.bf16.mxu1 %v4292_v31  ;;  %v590_v34 = vrot.slane %v581_v26, %v589_v28 }
 0x379   :  { %3573 = vmatmul.mubr.msk.bf16.vlgmr.msra.gmra.mrb[0].mxu0 %vm162_vm4, %v102_v41 }
 0x37a   :  { %3577 = vmatpush3.bf16.msra.mxu0 %v3988_v42  ;;  %3580 = vmatprep.mubr.msk.bf16.mxu0 %vm4291_vm1, %v4290_v0 }
 0x37b   :  { %3578 = vmatprep.subr.bf16.mxu0 %v4290_v0  ;;  %494 = vmatpush1.bf16.msra.mxu1 %v3985_v30 }
 0x37c   :  { %766 = vmatprep.subr.bf16.mxu1 %v4459_v44 }
 0x37e   :  { %3579 = vmatpush3.bf16.msra.mxu0 %v3989_v43 }
 0x37f   :  { %3584 = vmatprep.subr.bf16.mxu0 %v4290_v0 }
 0x381   :  { %3581 = vmatmul.mubr.msk.bf16.vlgmr.msra.gmra.mrb[4].mxu0 %vm404_vm6, %v316_v39 }
 0x382   :  { %3585 = vmatpush3.bf16.msra.mxu0 %v3988_v42  ;;  %3588 = vmatprep.mubr.msk.bf16.mxu0 %vm4291_vm1, %v4290_v0 }
 0x383   :  { %3586 = vmatprep.subr.bf16.mxu0 %v4290_v0 }
 0x386   :  { %3587 = vmatpush3.bf16.msra.mxu0 %v3989_v43 }
 0x387   :  { %3592 = vmatprep.subr.bf16.mxu0 %v4290_v0 }
 0x448   :  { %v4462_v45 = vpop.f32.mrb[16].mxu1 }
 0x449   :  { %v4464_v46 = vpop.f32.mrb[17].mxu1 }
 0x44a   :  { %v445_v47 = vpop.f32.mrb[18].mxu1 }
 0x44b   :  { %v446_v48 = vpop.f32.mrb[19].mxu1 }
 0x44c   :  { %v357_v49 = vpop.f32.mrb[0].mxu0 }
 0x44d   :  { %v363_v52 = vpack.c.bf16 %v357_v49, %v357_v49  ;;  %v3574_v53 = vpop.f32.mrb[1].mxu0 }
 0x44e   :  { %v360_v55 = vpop.f32.mrb[2].mxu0 }
 0x44f   :  { %v3575_v56 = vpop.f32.mrb[3].mxu0  ;;  %3241 = vmatmul.mubr.msk.bf16.vlgmr.msra.gmra.mrb[20].mxu1 %vm404_vm6, %v363_v52  ;;  %3589 = vmatmul.mubr.msk.bf16.vlgmr.msra.gmra.mrb[8].mxu0 %vm404_vm6, %v363_v52 }
 0x450   :  { %767 = vmatpush1.bf16.msra.mxu1 %v4469_v50  ;;  %3593 = vmatpush3.bf16.msra.mxu0 %v4474_v51 }
 0x451   :  { %768 = vmatprep.subr.bf16.mxu1 %v4479_v54  ;;  %3594 = vmatprep.subr.bf16.mxu0 %v4290_v0 }
 0x452   :  { %798 = vmatprep.mubr.bf16.mxu1 %v4292_v31  ;;  %3608 = vmatprep.mubr.msk.bf16.mxu0 %vm4291_vm1, %v4290_v0 }
 0x454   :  { %769 = vmatpush1.bf16.msra.mxu1 %v4487_v57  ;;  %v4506_v60 = vpop.f32.mrb[4].mxu0  ;;  %3595 = vmatpush3.bf16.msra.mxu0 %v4493_v58 }
 0x455   :  { %v3582_v63 = vpop.f32.mrb[5].mxu0  ;;  %770 = vmatprep.subr.bf16.mxu1 %v4499_v59  ;;  %3596 = vmatprep.subr.bf16.mxu0 %v4290_v0 }
 0x456   :  { %v485_v2 = vpop.f32.mrb[6].mxu0 }
 0x457   :  { %v3583_v3 = vpop.f32.mrb[7].mxu0 }
 0x458   :  { %771 = vmatpush1.bf16.msra.mxu1 %v4511_v61  ;;  %3597 = vmatpush3.bf16.msra.mxu0 %v4517_v62 }
 0x459   :  { %772 = vmatprep.subr.bf16.mxu1 %v4523_v1  ;;  %3598 = vmatprep.subr.bf16.mxu0 %v4290_v0 }
 0x45c   :  { %773 = vmatpush1.bf16.msra.mxu1 %v4530_v4  ;;  %3599 = vmatpush3.bf16.msra.mxu0 %v4536_v5 }
 0x45d   :  { %774 = vmatprep.subr.bf16.mxu1 %v4542_v6  ;;  %3600 = vmatprep.subr.bf16.mxu0 %v4290_v0 }
 0x460   :  { %775 = vmatpush1.bf16.msra.mxu1 %v4549_v7  ;;  %3601 = vmatpush3.bf16.msra.mxu0 %v4555_v8 }
 0x461   :  { %776 = vmatprep.subr.bf16.mxu1 %v4561_v9  ;;  %3602 = vmatprep.subr.bf16.mxu0 %v4290_v0 }
 0x464   :  { %777 = vmatpush1.bf16.msra.mxu1 %v4568_v10  ;;  %3603 = vmatpush3.bf16.msra.mxu0 %v4574_v11 }
 0x465   :  { %778 = vmatprep.subr.bf16.mxu1 %v4580_v12  ;;  %3604 = vmatprep.subr.bf16.mxu0 %v4290_v0 }
 0x468   :  { %779 = vmatpush1.bf16.msra.mxu1 %v4587_v13  ;;  %3605 = vmatpush3.bf16.msra.mxu0 %v4593_v14 }
 0x469   :  { %780 = vmatprep.subr.bf16.mxu1 %v4599_v15  ;;  %3606 = vmatprep.subr.bf16.mxu0 %v4290_v0 }
 0x46c   :  { %781 = vmatpush1.bf16.msra.mxu1 %v4606_v16  ;;  %3607 = vmatpush3.bf16.msra.mxu0 %v4612_v17 }
 0x46d   :  { %878 = vmatprep.subr.bf16.mxu1 %v4459_v44  ;;  %3612 = vmatprep.subr.bf16.mxu0 %v4290_v0 }
 0x46f   :  { %799 = vmatmul.mubr.bf16.vlgmr.msra.gmra.mrb[24].mxu1 %v4292_v31  ;;  %3609 = vmatmul.mubr.bf16.vlgmr.msra.gmra.mrb[12].mxu0 %v4292_v31 }
 0x470   :  { %879 = vmatpush1.bf16.msra.mxu1 %v4469_v50  ;;  %3613 = vmatpush3.bf16.msra.mxu0 %v4474_v51 }
 0x471   :  { %880 = vmatprep.subr.bf16.mxu1 %v4479_v54  ;;  %3614 = vmatprep.subr.bf16.mxu0 %v4290_v0 }
 0x472   :  { %910 = vmatprep.mubr.bf16.mxu1 %v4292_v31  ;;  %3628 = vmatprep.mubr.msk.bf16.mxu0 %vm4291_vm1, %v4290_v0 }
 0x474   :  { %881 = vmatpush1.bf16.msra.mxu1 %v4487_v57  ;;  %3615 = vmatpush3.bf16.msra.mxu0 %v4493_v58 }
 0x475   :  { %882 = vmatprep.subr.bf16.mxu1 %v4499_v59  ;;  %3616 = vmatprep.subr.bf16.mxu0 %v4290_v0 }
 0x478   :  { %883 = vmatpush1.bf16.msra.mxu1 %v4511_v61  ;;  %3617 = vmatpush3.bf16.msra.mxu0 %v4517_v62 }
 0x479   :  { %884 = vmatprep.subr.bf16.mxu1 %v4523_v1  ;;  %3618 = vmatprep.subr.bf16.mxu0 %v4290_v0 }
 0x47c   :  { %885 = vmatpush1.bf16.msra.mxu1 %v4530_v4  ;;  %3619 = vmatpush3.bf16.msra.mxu0 %v4536_v5 }
 0x47d   :  { %886 = vmatprep.subr.bf16.mxu1 %v4542_v6  ;;  %3620 = vmatprep.subr.bf16.mxu0 %v4290_v0 }
 0x480   :  { %887 = vmatpush1.bf16.msra.mxu1 %v4549_v7  ;;  %3621 = vmatpush3.bf16.msra.mxu0 %v4555_v8 }
 0x481   :  { %888 = vmatprep.subr.bf16.mxu1 %v4561_v9  ;;  %3622 = vmatprep.subr.bf16.mxu0 %v4290_v0 }
 0x484   :  { %889 = vmatpush1.bf16.msra.mxu1 %v4568_v10  ;;  %3623 = vmatpush3.bf16.msra.mxu0 %v4574_v11 }
 0x485   :  { %890 = vmatprep.subr.bf16.mxu1 %v4580_v12  ;;  %3624 = vmatprep.subr.bf16.mxu0 %v4290_v0 }
 0x488   :  { %891 = vmatpush1.bf16.msra.mxu1 %v4587_v13  ;;  %3625 = vmatpush3.bf16.msra.mxu0 %v4593_v14 }
 0x489   :  { %892 = vmatprep.subr.bf16.mxu1 %v4599_v15  ;;  %3626 = vmatprep.subr.bf16.mxu0 %v4290_v0 }
 0x48c   :  { %893 = vmatpush1.bf16.msra.mxu1 %v4606_v16  ;;  %3627 = vmatpush3.bf16.msra.mxu0 %v4612_v17 }
 0x48d   :  { %990 = vmatprep.subr.bf16.mxu1 %v4459_v44  ;;  %3632 = vmatprep.subr.bf16.mxu0 %v4290_v0 }
 0x522   :  { %v525_v35 = vpop.f32.mrb[20].mxu1  ;;  %v566_v36 = vpop.f32.mrb[8].mxu0 }
 0x523   :  { %v578_v37 = vsel %vm97_vm7, %v4462_v45, %v525_v35  ;;  %v580_v38 = vsel %vm4672_vm8, %v4506_v60, %v566_v36  ;;  %v527_v39 = vpop.f32.mrb[21].mxu1  ;;  %v3590_v40 = vpop.f32.mrb[9].mxu0 }
 0x524   :  { %v598_v41 = vadd.f32 %v586_v29, %v578_v37  ;;  %v600_v42 = vadd.f32 %v594_v32, %v580_v38  ;;  %v579_v43 = vsel %vm4678_vm9, %v4464_v46, %v527_v39  ;;  %v529_v47 = vpop.f32.mrb[22].mxu1  ;;  %v569_v48 = vpop.f32.mrb[10].mxu0 }
 0x525   :  { %v599_v49 = vadd.f32 %v590_v34, %v579_v43  ;;  %v530_v52 = vpop.f32.mrb[23].mxu1  ;;  %v3591_v53 = vpop.f32.mrb[11].mxu0  ;;  %v4696_v34 = vld [vmem:[%s5734_s10] sm:$0x1] }
 0x526   :  { %601 = vst [vmem:[#allocation2] sm:$0xff] %v598_v41  ;;  %603 = vst [vmem:[#allocation2 + $0x10] sm:$0xff] %v600_v42 }
 0x527   :  { %602 = vst [vmem:[#allocation2 + $0x8] sm:$0xff] %v599_v49 }
 0x52e   :  { %v637_v45 = vld [vmem:[#allocation2] ss:$8 sm:$0x7]  ;;  %v876_v53 = vld [vmem:[#allocation2 + $0x1] ss:$8 sm:$0x7] }
 0x52f   :  { %v855_v46 = vrot.slane %v637_v45, 1  ;;  %v866_v39 = vrot.slane %v637_v45, 2 }
 0x542   :  { %v800_v55 = vpop.f32.mrb[24].mxu1  ;;  %v841_v56 = vpop.f32.mrb[12].mxu0 }
 0x543   :  { %v847_v60 = vadd.f32 %v800_v55, %v637_v45  ;;  %v802_v63 = vpop.f32.mrb[25].mxu1  ;;  %v3610_v2 = vpop.f32.mrb[13].mxu0  ;;  %v864_v35 = vadd.f32 %v841_v56, %v4696_v34 }
 0x544   :  { %v804_v3 = vpop.f32.mrb[26].mxu1  ;;  %v844_v18 = vpop.f32.mrb[14].mxu0  ;;  %v857_v26 = vadd.f32 %v855_v46, %v802_v63 }
 0x545   :  { %v3267_v21 = vmul.f32 -1.442695, %v847_v60  ;;  %v805_v22 = vpop.f32.mrb[27].mxu1  ;;  %v3611_v24 = vpop.f32.mrb[15].mxu0 }
 0x546   :  { %v3268_v27 = vmul.f32 -1.442695, %v857_v26  ;;  %v967_v24 = vrot.slane %v876_v53, 1 }
 0x547   :  { %4094 = vpow2.f32 %v3267_v21 }
 0x548   :  { %4096 = vpow2.f32 %v3268_v27 }
 0x551   :  { %v4095_v29 = vpop.eup %4094 }
 0x552   :  { %v851_v32 = vadd.f32 1.0, %v4095_v29  ;;  %v4097_v36 = vpop.eup %4096 }
 0x553   :  { %v861_v40 = vadd.f32 1.0, %v4097_v36 }
 0x554   :  { %4098 = vrcp.f32 %v851_v32 }
 0x55e   :  { %v4099_v37 = vpop.eup %4098 }
 0x55f   :  { %v865_v38 = vmul.f32 %v4099_v37, %v864_v35 }
 0x561   :  { %v868_v41 = vadd.f32 %v866_v39, %v865_v38  ;;  %v978_v38 = vrot.slane %v876_v53, 2 }
 0x563   :  { %4100 = vtanh.f32 %v868_v41 }
 0x564   :  { %4102 = vrcp.f32 %v861_v40 }
 0x56d   :  { %v4101_v42 = vpop.eup %4100 }
 0x56e   :  { %v870_v43 = vsub.f32 0.0, %v4101_v42  ;;  %v4103_v47 = vpop.eup %4102 }
 0x570   :  { %v871_v48 = vmul.f32 %v4103_v47, %v870_v43 }
 0x572   :  { %v4699_v49 = vadd.f32 %v4101_v42, %v871_v48 }
 0x574   :  { %873 = vst [vmem:[#allocation3] sm:$0x1] %v4699_v49  ;;  %874 = vst [vmem:[#allocation4 + $0x7] sm:$0x1] %v4699_v49  ;;  %v877_v52 = vpack.c.bf16 %v4699_v49, %v4699_v49 }
 0x576   :  { %911 = vmatmul.mubr.bf16.vlgmr.msra.gmra.mrb[28].mxu1 %v877_v52  ;;  %3629 = vmatmul.mubr.bf16.vlgmr.msra.gmra.mrb[16].mxu0 %v877_v52 }
 0x577   :  { %991 = vmatpush1.bf16.msra.mxu1 %v4469_v50  ;;  %3633 = vmatpush3.bf16.msra.mxu0 %v4474_v51 }
 0x578   :  { %992 = vmatprep.subr.bf16.mxu1 %v4479_v54  ;;  %3634 = vmatprep.subr.bf16.mxu0 %v4290_v0 }
 0x579   :  { %1022 = vmatprep.mubr.bf16.mxu1 %v4292_v31  ;;  %3648 = vmatprep.mubr.msk.bf16.mxu0 %vm4291_vm1, %v4290_v0 }
 0x57b   :  { %993 = vmatpush1.bf16.msra.mxu1 %v4487_v57  ;;  %3635 = vmatpush3.bf16.msra.mxu0 %v4493_v58 }
 0x57c   :  { %994 = vmatprep.subr.bf16.mxu1 %v4499_v59  ;;  %3636 = vmatprep.subr.bf16.mxu0 %v4290_v0 }
 0x57f   :  { %995 = vmatpush1.bf16.msra.mxu1 %v4511_v61  ;;  %3637 = vmatpush3.bf16.msra.mxu0 %v4517_v62 }
 0x580   :  { %996 = vmatprep.subr.bf16.mxu1 %v4523_v1  ;;  %3638 = vmatprep.subr.bf16.mxu0 %v4290_v0 }
 0x583   :  { %997 = vmatpush1.bf16.msra.mxu1 %v4530_v4  ;;  %3639 = vmatpush3.bf16.msra.mxu0 %v4536_v5 }
 0x584   :  { %998 = vmatprep.subr.bf16.mxu1 %v4542_v6  ;;  %3640 = vmatprep.subr.bf16.mxu0 %v4290_v0 }
 0x587   :  { %999 = vmatpush1.bf16.msra.mxu1 %v4549_v7  ;;  %3641 = vmatpush3.bf16.msra.mxu0 %v4555_v8 }
 0x588   :  { %1000 = vmatprep.subr.bf16.mxu1 %v4561_v9  ;;  %3642 = vmatprep.subr.bf16.mxu0 %v4290_v0 }
 0x58b   :  { %1001 = vmatpush1.bf16.msra.mxu1 %v4568_v10  ;;  %3643 = vmatpush3.bf16.msra.mxu0 %v4574_v11 }
 0x58c   :  { %1002 = vmatprep.subr.bf16.mxu1 %v4580_v12  ;;  %3644 = vmatprep.subr.bf16.mxu0 %v4290_v0 }
 0x58f   :  { %1003 = vmatpush1.bf16.msra.mxu1 %v4587_v13  ;;  %3645 = vmatpush3.bf16.msra.mxu0 %v4593_v14 }
 0x590   :  { %1004 = vmatprep.subr.bf16.mxu1 %v4599_v15  ;;  %3646 = vmatprep.subr.bf16.mxu0 %v4290_v0 }
 0x593   :  { %1005 = vmatpush1.bf16.msra.mxu1 %v4606_v16  ;;  %3647 = vmatpush3.bf16.msra.mxu0 %v4612_v17 }
 0x594   :  { %1102 = vmatprep.subr.bf16.mxu1 %v4459_v44  ;;  %3652 = vmatprep.subr.bf16.mxu0 %v4290_v0 }
 0x649   :  { %v912_v45 = vpop.f32.mrb[28].mxu1  ;;  %v953_v55 = vpop.f32.mrb[16].mxu0 }
 0x64a   :  { %v959_v56 = vadd.f32 %v912_v45, %v876_v53  ;;  %v914_v60 = vpop.f32.mrb[29].mxu1  ;;  %v3630_v63 = vpop.f32.mrb[17].mxu0  ;;  %v976_v35 = vadd.f32 %v953_v55, %v4696_v34 }
 0x64b   :  { %v916_v2 = vpop.f32.mrb[30].mxu1  ;;  %v956_v3 = vpop.f32.mrb[18].mxu0  ;;  %v969_v46 = vadd.f32 %v967_v24, %v914_v60 }
 0x64c   :  { %v3269_v18 = vmul.f32 -1.442695, %v959_v56  ;;  %v917_v21 = vpop.f32.mrb[31].mxu1  ;;  %v3631_v22 = vpop.f32.mrb[19].mxu0 }
 0x64d   :  { %v3270_v26 = vmul.f32 -1.442695, %v969_v46 }
 0x64e   :  { %4104 = vpow2.f32 %v3269_v18 }
 0x64f   :  { %4106 = vpow2.f32 %v3270_v26 }
 0x658   :  { %v4105_v27 = vpop.eup %4104 }
 0x659   :  { %v963_v29 = vadd.f32 1.0, %v4105_v27  ;;  %v4107_v32 = vpop.eup %4106 }
 0x65a   :  { %v973_v40 = vadd.f32 1.0, %v4107_v32 }
 0x65b   :  { %4108 = vrcp.f32 %v963_v29 }
 0x665   :  { %v4109_v36 = vpop.eup %4108 }
 0x666   :  { %v977_v37 = vmul.f32 %v4109_v36, %v976_v35 }
 0x668   :  { %v980_v39 = vadd.f32 %v978_v38, %v977_v37 }
 0x66a   :  { %4110 = vtanh.f32 %v980_v39 }
 0x66b   :  { %4112 = vrcp.f32 %v973_v40 }
 0x674   :  { %v4111_v41 = vpop.eup %4110 }
 0x675   :  { %v982_v42 = vsub.f32 %v4699_v49, %v4111_v41  ;;  %v4113_v43 = vpop.eup %4112  ;;  %v988_v49 = vld [vmem:[#allocation2 + $0x2] ss:$8 sm:$0x7] }
 0x676   :  { %v1079_v22 = vrot.slane %v988_v49, 1  ;;  %v1090_v37 = vrot.slane %v988_v49, 2 }
 0x677   :  { %v983_v47 = vmul.f32 %v4113_v43, %v982_v42 }
 0x679   :  { %v4742_v48 = vadd.f32 %v4111_v41, %v983_v47 }
 0x67b   :  { %985 = vst [vmem:[#allocation3 + $0x1] sm:$0x1] %v4742_v48  ;;  %986 = vst [vmem:[#allocation4 + $0x6] sm:$0x1] %v4742_v48  ;;  %v989_v52 = vpack.c.bf16 %v4742_v48, %v4742_v48 }
 0x67d   :  { %1023 = vmatmul.mubr.bf16.vlgmr.msra.gmra.mrb[32].mxu1 %v989_v52  ;;  %3649 = vmatmul.mubr.bf16.vlgmr.msra.gmra.mrb[20].mxu0 %v989_v52 }
 0x67e   :  { %1103 = vmatpush1.bf16.msra.mxu1 %v4469_v50  ;;  %3653 = vmatpush3.bf16.msra.mxu0 %v4474_v51 }
 0x67f   :  { %1104 = vmatprep.subr.bf16.mxu1 %v4479_v54  ;;  %3654 = vmatprep.subr.bf16.mxu0 %v4290_v0 }
 0x680   :  { %1134 = vmatprep.mubr.bf16.mxu1 %v4292_v31  ;;  %3668 = vmatprep.mubr.msk.bf16.mxu0 %vm4291_vm1, %v4290_v0 }
 0x682   :  { %1105 = vmatpush1.bf16.msra.mxu1 %v4487_v57  ;;  %3655 = vmatpush3.bf16.msra.mxu0 %v4493_v58 }
 0x683   :  { %1106 = vmatprep.subr.bf16.mxu1 %v4499_v59  ;;  %3656 = vmatprep.subr.bf16.mxu0 %v4290_v0 }
 0x686   :  { %1107 = vmatpush1.bf16.msra.mxu1 %v4511_v61  ;;  %3657 = vmatpush3.bf16.msra.mxu0 %v4517_v62 }
 0x687   :  { %1108 = vmatprep.subr.bf16.mxu1 %v4523_v1  ;;  %3658 = vmatprep.subr.bf16.mxu0 %v4290_v0 }
 0x68a   :  { %1109 = vmatpush1.bf16.msra.mxu1 %v4530_v4  ;;  %3659 = vmatpush3.bf16.msra.mxu0 %v4536_v5 }
 0x68b   :  { %1110 = vmatprep.subr.bf16.mxu1 %v4542_v6  ;;  %3660 = vmatprep.subr.bf16.mxu0 %v4290_v0 }
 0x68e   :  { %1111 = vmatpush1.bf16.msra.mxu1 %v4549_v7  ;;  %3661 = vmatpush3.bf16.msra.mxu0 %v4555_v8 }
 0x68f   :  { %1112 = vmatprep.subr.bf16.mxu1 %v4561_v9  ;;  %3662 = vmatprep.subr.bf16.mxu0 %v4290_v0 }
 0x692   :  { %1113 = vmatpush1.bf16.msra.mxu1 %v4568_v10  ;;  %3663 = vmatpush3.bf16.msra.mxu0 %v4574_v11 }
 0x693   :  { %1114 = vmatprep.subr.bf16.mxu1 %v4580_v12  ;;  %3664 = vmatprep.subr.bf16.mxu0 %v4290_v0 }
 0x696   :  { %1115 = vmatpush1.bf16.msra.mxu1 %v4587_v13  ;;  %3665 = vmatpush3.bf16.msra.mxu0 %v4593_v14 }
 0x697   :  { %1116 = vmatprep.subr.bf16.mxu1 %v4599_v15  ;;  %3666 = vmatprep.subr.bf16.mxu0 %v4290_v0 }
 0x69a   :  { %1117 = vmatpush1.bf16.msra.mxu1 %v4606_v16  ;;  %3667 = vmatpush3.bf16.msra.mxu0 %v4612_v17 }
 0x69b   :  { %1214 = vmatprep.subr.bf16.mxu1 %v4459_v44  ;;  %3672 = vmatprep.subr.bf16.mxu0 %v4290_v0 }
 0x750   :  { %v1024_v53 = vpop.f32.mrb[32].mxu1  ;;  %v1065_v45 = vpop.f32.mrb[20].mxu0 }
 0x751   :  { %v1071_v55 = vadd.f32 %v1024_v53, %v988_v49  ;;  %v1026_v56 = vpop.f32.mrb[33].mxu1  ;;  %v3650_v60 = vpop.f32.mrb[21].mxu0  ;;  %v1088_v32 = vadd.f32 %v1065_v45, %v4696_v34 }
 0x752   :  { %v1028_v63 = vpop.f32.mrb[34].mxu1  ;;  %v1068_v2 = vpop.f32.mrb[22].mxu0  ;;  %v1081_v24 = vadd.f32 %v1079_v22, %v1026_v56 }
 0x753   :  { %v3271_v3 = vmul.f32 -1.442695, %v1071_v55  ;;  %v1029_v18 = vpop.f32.mrb[35].mxu1  ;;  %v3651_v21 = vpop.f32.mrb[23].mxu0 }
 0x754   :  { %v3272_v46 = vmul.f32 -1.442695, %v1081_v24 }
 0x755   :  { %4114 = vpow2.f32 %v3271_v3 }
 0x756   :  { %4116 = vpow2.f32 %v3272_v46 }
 0x75f   :  { %v4115_v26 = vpop.eup %4114 }
 0x760   :  { %v1075_v27 = vadd.f32 1.0, %v4115_v26  ;;  %v4117_v29 = vpop.eup %4116 }
 0x761   :  { %v1085_v39 = vadd.f32 1.0, %v4117_v29 }
 0x762   :  { %4118 = vrcp.f32 %v1075_v27 }
 0x76c   :  { %v4119_v35 = vpop.eup %4118 }
 0x76d   :  { %v1089_v36 = vmul.f32 %v4119_v35, %v1088_v32 }
 0x76f   :  { %v1092_v38 = vadd.f32 %v1090_v37, %v1089_v36 }
 0x771   :  { %4120 = vtanh.f32 %v1092_v38 }
 0x772   :  { %4122 = vrcp.f32 %v1085_v39 }
 0x77b   :  { %v4121_v40 = vpop.eup %4120 }
 0x77c   :  { %v1094_v41 = vsub.f32 %v4742_v48, %v4121_v40  ;;  %v4123_v42 = vpop.eup %4122  ;;  %v1100_v48 = vld [vmem:[#allocation2 + $0x3] ss:$8 sm:$0x7] }
 0x77d   :  { %v1191_v21 = vrot.slane %v1100_v48, 1  ;;  %v1202_v36 = vrot.slane %v1100_v48, 2 }
 0x77e   :  { %v1095_v43 = vmul.f32 %v4123_v42, %v1094_v41 }
 0x780   :  { %v4785_v47 = vadd.f32 %v4121_v40, %v1095_v43 }
 0x782   :  { %1097 = vst [vmem:[#allocation3 + $0x2] sm:$0x1] %v4785_v47  ;;  %1098 = vst [vmem:[#allocation4 + $0x5] sm:$0x1] %v4785_v47  ;;  %v1101_v52 = vpack.c.bf16 %v4785_v47, %v4785_v47 }
 0x784   :  { %1135 = vmatmul.mubr.bf16.vlgmr.msra.gmra.mrb[36].mxu1 %v1101_v52  ;;  %3669 = vmatmul.mubr.bf16.vlgmr.msra.gmra.mrb[24].mxu0 %v1101_v52 }
 0x785   :  { %1215 = vmatpush1.bf16.msra.mxu1 %v4469_v50  ;;  %3673 = vmatpush3.bf16.msra.mxu0 %v4474_v51 }
 0x786   :  { %1216 = vmatprep.subr.bf16.mxu1 %v4479_v54  ;;  %3674 = vmatprep.subr.bf16.mxu0 %v4290_v0 }
 0x787   :  { %1246 = vmatprep.mubr.bf16.mxu1 %v4292_v31  ;;  %3688 = vmatprep.mubr.msk.bf16.mxu0 %vm4291_vm1, %v4290_v0 }
 0x789   :  { %1217 = vmatpush1.bf16.msra.mxu1 %v4487_v57  ;;  %3675 = vmatpush3.bf16.msra.mxu0 %v4493_v58 }
 0x78a   :  { %1218 = vmatprep.subr.bf16.mxu1 %v4499_v59  ;;  %3676 = vmatprep.subr.bf16.mxu0 %v4290_v0 }
 0x78d   :  { %1219 = vmatpush1.bf16.msra.mxu1 %v4511_v61  ;;  %3677 = vmatpush3.bf16.msra.mxu0 %v4517_v62 }
 0x78e   :  { %1220 = vmatprep.subr.bf16.mxu1 %v4523_v1  ;;  %3678 = vmatprep.subr.bf16.mxu0 %v4290_v0 }
 0x791   :  { %1221 = vmatpush1.bf16.msra.mxu1 %v4530_v4  ;;  %3679 = vmatpush3.bf16.msra.mxu0 %v4536_v5 }
 0x792   :  { %1222 = vmatprep.subr.bf16.mxu1 %v4542_v6  ;;  %3680 = vmatprep.subr.bf16.mxu0 %v4290_v0 }
 0x795   :  { %1223 = vmatpush1.bf16.msra.mxu1 %v4549_v7  ;;  %3681 = vmatpush3.bf16.msra.mxu0 %v4555_v8 }
 0x796   :  { %1224 = vmatprep.subr.bf16.mxu1 %v4561_v9  ;;  %3682 = vmatprep.subr.bf16.mxu0 %v4290_v0 }
 0x799   :  { %1225 = vmatpush1.bf16.msra.mxu1 %v4568_v10  ;;  %3683 = vmatpush3.bf16.msra.mxu0 %v4574_v11 }
 0x79a   :  { %1226 = vmatprep.subr.bf16.mxu1 %v4580_v12  ;;  %3684 = vmatprep.subr.bf16.mxu0 %v4290_v0 }
 0x79d   :  { %1227 = vmatpush1.bf16.msra.mxu1 %v4587_v13  ;;  %3685 = vmatpush3.bf16.msra.mxu0 %v4593_v14 }
 0x79e   :  { %1228 = vmatprep.subr.bf16.mxu1 %v4599_v15  ;;  %3686 = vmatprep.subr.bf16.mxu0 %v4290_v0 }
 0x7a1   :  { %1229 = vmatpush1.bf16.msra.mxu1 %v4606_v16  ;;  %3687 = vmatpush3.bf16.msra.mxu0 %v4612_v17 }
 0x7a2   :  { %1326 = vmatprep.subr.bf16.mxu1 %v4459_v44  ;;  %3692 = vmatprep.subr.bf16.mxu0 %v4290_v0 }
 0x857   :  { %v1136_v49 = vpop.f32.mrb[36].mxu1  ;;  %v1177_v53 = vpop.f32.mrb[24].mxu0 }
 0x858   :  { %v1183_v45 = vadd.f32 %v1136_v49, %v1100_v48  ;;  %v1138_v55 = vpop.f32.mrb[37].mxu1  ;;  %v3670_v56 = vpop.f32.mrb[25].mxu0  ;;  %v1200_v29 = vadd.f32 %v1177_v53, %v4696_v34 }
 0x859   :  { %v1140_v60 = vpop.f32.mrb[38].mxu1  ;;  %v1180_v63 = vpop.f32.mrb[26].mxu0  ;;  %v1193_v22 = vadd.f32 %v1191_v21, %v1138_v55 }
 0x85a   :  { %v3273_v2 = vmul.f32 -1.442695, %v1183_v45  ;;  %v1141_v3 = vpop.f32.mrb[39].mxu1  ;;  %v3671_v18 = vpop.f32.mrb[27].mxu0 }
 0x85b   :  { %v3274_v24 = vmul.f32 -1.442695, %v1193_v22 }
 0x85c   :  { %4124 = vpow2.f32 %v3273_v2 }
 0x85d   :  { %4126 = vpow2.f32 %v3274_v24 }
 0x866   :  { %v4125_v46 = vpop.eup %4124 }
 0x867   :  { %v1187_v26 = vadd.f32 1.0, %v4125_v46  ;;  %v4127_v27 = vpop.eup %4126 }
 0x868   :  { %v1197_v38 = vadd.f32 1.0, %v4127_v27 }
 0x869   :  { %4128 = vrcp.f32 %v1187_v26 }
 0x873   :  { %v4129_v32 = vpop.eup %4128 }
 0x874   :  { %v1201_v35 = vmul.f32 %v4129_v32, %v1200_v29 }
 0x876   :  { %v1204_v37 = vadd.f32 %v1202_v36, %v1201_v35 }
 0x878   :  { %4130 = vtanh.f32 %v1204_v37 }
 0x879   :  { %4132 = vrcp.f32 %v1197_v38 }
 0x882   :  { %v4131_v39 = vpop.eup %4130 }
 0x883   :  { %v1206_v40 = vsub.f32 %v4785_v47, %v4131_v39  ;;  %v4133_v41 = vpop.eup %4132  ;;  %v1212_v47 = vld [vmem:[#allocation2 + $0x4] ss:$8 sm:$0x7] }
 0x884   :  { %v1303_v18 = vrot.slane %v1212_v47, 1  ;;  %v1314_v32 = vrot.slane %v1212_v47, 2 }
 0x885   :  { %v1207_v42 = vmul.f32 %v4133_v41, %v1206_v40 }
 0x887   :  { %v4828_v43 = vadd.f32 %v4131_v39, %v1207_v42 }
 0x889   :  { %1209 = vst [vmem:[#allocation3 + $0x3] sm:$0x1] %v4828_v43  ;;  %1210 = vst [vmem:[#allocation4 + $0x4] sm:$0x1] %v4828_v43  ;;  %v1213_v52 = vpack.c.bf16 %v4828_v43, %v4828_v43 }
 0x88b   :  { %1247 = vmatmul.mubr.bf16.vlgmr.msra.gmra.mrb[40].mxu1 %v1213_v52  ;;  %3689 = vmatmul.mubr.bf16.vlgmr.msra.gmra.mrb[28].mxu0 %v1213_v52 }
 0x88c   :  { %1327 = vmatpush1.bf16.msra.mxu1 %v4469_v50  ;;  %3693 = vmatpush3.bf16.msra.mxu0 %v4474_v51 }
 0x88d   :  { %1328 = vmatprep.subr.bf16.mxu1 %v4479_v54  ;;  %3694 = vmatprep.subr.bf16.mxu0 %v4290_v0 }
 0x88e   :  { %1358 = vmatprep.mubr.bf16.mxu1 %v4292_v31  ;;  %3708 = vmatprep.mubr.msk.bf16.mxu0 %vm4291_vm1, %v4290_v0 }
 0x890   :  { %1329 = vmatpush1.bf16.msra.mxu1 %v4487_v57  ;;  %3695 = vmatpush3.bf16.msra.mxu0 %v4493_v58 }
 0x891   :  { %1330 = vmatprep.subr.bf16.mxu1 %v4499_v59  ;;  %3696 = vmatprep.subr.bf16.mxu0 %v4290_v0 }
 0x894   :  { %1331 = vmatpush1.bf16.msra.mxu1 %v4511_v61  ;;  %3697 = vmatpush3.bf16.msra.mxu0 %v4517_v62 }
 0x895   :  { %1332 = vmatprep.subr.bf16.mxu1 %v4523_v1  ;;  %3698 = vmatprep.subr.bf16.mxu0 %v4290_v0 }
 0x898   :  { %1333 = vmatpush1.bf16.msra.mxu1 %v4530_v4  ;;  %3699 = vmatpush3.bf16.msra.mxu0 %v4536_v5 }
 0x899   :  { %1334 = vmatprep.subr.bf16.mxu1 %v4542_v6  ;;  %3700 = vmatprep.subr.bf16.mxu0 %v4290_v0 }
 0x89c   :  { %1335 = vmatpush1.bf16.msra.mxu1 %v4549_v7  ;;  %3701 = vmatpush3.bf16.msra.mxu0 %v4555_v8 }
 0x89d   :  { %1336 = vmatprep.subr.bf16.mxu1 %v4561_v9  ;;  %3702 = vmatprep.subr.bf16.mxu0 %v4290_v0 }
 0x8a0   :  { %1337 = vmatpush1.bf16.msra.mxu1 %v4568_v10  ;;  %3703 = vmatpush3.bf16.msra.mxu0 %v4574_v11 }
 0x8a1   :  { %1338 = vmatprep.subr.bf16.mxu1 %v4580_v12  ;;  %3704 = vmatprep.subr.bf16.mxu0 %v4290_v0 }
 0x8a4   :  { %1339 = vmatpush1.bf16.msra.mxu1 %v4587_v13  ;;  %3705 = vmatpush3.bf16.msra.mxu0 %v4593_v14 }
 0x8a5   :  { %1340 = vmatprep.subr.bf16.mxu1 %v4599_v15  ;;  %3706 = vmatprep.subr.bf16.mxu0 %v4290_v0 }
 0x8a8   :  { %1341 = vmatpush1.bf16.msra.mxu1 %v4606_v16  ;;  %3707 = vmatpush3.bf16.msra.mxu0 %v4612_v17 }
 0x8a9   :  { %1438 = vmatprep.subr.bf16.mxu1 %v4459_v44  ;;  %3712 = vmatprep.subr.bf16.mxu0 %v4290_v0 }
 0x95e   :  { %v1248_v48 = vpop.f32.mrb[40].mxu1  ;;  %v1289_v49 = vpop.f32.mrb[28].mxu0 }
 0x95f   :  { %v1295_v53 = vadd.f32 %v1248_v48, %v1212_v47  ;;  %v1250_v45 = vpop.f32.mrb[41].mxu1  ;;  %v3690_v55 = vpop.f32.mrb[29].mxu0  ;;  %v1312_v26 = vadd.f32 %v1289_v49, %v4696_v34 }
 0x960   :  { %v1252_v56 = vpop.f32.mrb[42].mxu1  ;;  %v1292_v60 = vpop.f32.mrb[30].mxu0  ;;  %v1305_v21 = vadd.f32 %v1303_v18, %v1250_v45  ;;  %v4258_v18 = vld [vmem:[%s5732_s9 + $0x18] ss:$12 sps:$4 sm:$0xff]  }
 0x961   :  { %v3275_v63 = vmul.f32 -1.442695, %v1295_v53  ;;  %v1253_v2 = vpop.f32.mrb[43].mxu1  ;;  %v3691_v3 = vpop.f32.mrb[31].mxu0 }
 0x962   :  { %v3276_v22 = vmul.f32 -1.442695, %v1305_v21  ;;  %v4256_v2 = vld [vmem:[%s5732_s9 + $0x8] ss:$12 sps:$4 sm:$0xff]   ;;  %v4259_v21 = vld [vmem:[%s5732_s9 + $0x20] ss:$12 sps:$4 sm:$0xff]  }
 0x963   :  { %4134 = vpow2.f32 %v3275_v63  ;;  %v4255_v63 = vld [vmem:[%s5732_s9] ss:$12 sps:$4 sm:$0xff]   ;;  %v4257_v3 = vld [vmem:[%s5732_s9 + $0x1c] ss:$12 sps:$4 sm:$0xff]  }
 0x964   :  { %4136 = vpow2.f32 %v3276_v22  ;;  %v4260_v22 = vld [vmem:[%s5732_s9 + $0x34] ss:$12 sps:$4 sm:$0xff]  }
 0x96d   :  { %v4135_v24 = vpop.eup %4134 }
 0x96e   :  { %v1299_v46 = vadd.f32 1.0, %v4135_v24  ;;  %v4137_v44 = vpop.eup %4136  ;;  %v4261_v24 = vld [vmem:[%s5732_s9 + $0x30] ss:$12 sps:$4 sm:$0xff]  }
 0x96f   :  { %v1309_v36 = vadd.f32 1.0, %v4137_v44  ;;  %v4263_v44 = vld [vmem:[%s5732_s9 + $0x4c] ss:$12 sps:$4 sm:$0xff]  }
 0x970   :  { %4138 = vrcp.f32 %v1299_v46  ;;  %v4262_v46 = vld [vmem:[%s5732_s9 + $0x38] ss:$12 sps:$4 sm:$0xff]  }
 0x97a   :  { %v4139_v27 = vpop.eup %4138 }
 0x97b   :  { %v1313_v29 = vmul.f32 %v4139_v27, %v1312_v26  ;;  %v4264_v26 = vld [vmem:[%s5732_s9 + $0x48] ss:$12 sps:$4 sm:$0xff]   ;;  %v4265_v27 = vld [vmem:[%s5732_s9 + $0x50] ss:$12 sps:$4 sm:$0xff]  }
 0x97d   :  { %v1316_v35 = vadd.f32 %v1314_v32, %v1313_v29  ;;  %v4266_v29 = vld [vmem:[%s5732_s9 + $0x64] ss:$12 sps:$4 sm:$0xff]   ;;  %v4267_v32 = vld [vmem:[%s5732_s9 + $0x60] ss:$12 sps:$4 sm:$0xff]  }
 0x97f   :  { %4140 = vtanh.f32 %v1316_v35  ;;  %v4268_v35 = vld [vmem:[%s5732_s9 + $0x68] ss:$12 sps:$4 sm:$0xff]  }
 0x980   :  { %4142 = vrcp.f32 %v1309_v36  ;;  %v4269_v36 = vld [vmem:[%s5732_s9 + $0x7c] ss:$12 sps:$4 sm:$0xff]  }
 0x989   :  { %v4141_v37 = vpop.eup %4140 }
 0x98a   :  { %v1318_v38 = vsub.f32 %v4828_v43, %v4141_v37  ;;  %v4143_v39 = vpop.eup %4142 }
 0x98c   :  { %v1319_v40 = vmul.f32 %v4143_v39, %v1318_v38  ;;  %v4271_v38 = vld [vmem:[%s5732_s9 + $0x80] ss:$12 sps:$4 sm:$0xff]  }
 0x98d   :  { %v4272_v39 = vld [vmem:[%s5732_s9 + $0x94] ss:$12 sps:$4 sm:$0xff]  }
 0x98e   :  { %v4871_v41 = vadd.f32 %v4141_v37, %v1319_v40  ;;  %v4270_v37 = vld [vmem:[%s5732_s9 + $0x78] ss:$12 sps:$4 sm:$0xff]   ;;  %v4273_v40 = vld [vmem:[%s5732_s9 + $0x90] ss:$12 sps:$4 sm:$0xff]  }
 0x990   :  { %1321 = vst [vmem:[#allocation3 + $0x4] sm:$0x1] %v4871_v41  ;;  %1322 = vst [vmem:[#allocation4 + $0x3] sm:$0x1] %v4871_v41  ;;  %v1325_v42 = vpack.c.bf16 %v4871_v41, %v4871_v41 }
 0x992   :  { %1359 = vmatmul.mubr.bf16.vlgmr.msra.gmra.mrb[44].mxu1 %v1325_v42  ;;  %3709 = vmatmul.mubr.bf16.vlgmr.msra.gmra.mrb[32].mxu0 %v1325_v42  ;;  %v1436_v42 = vld [vmem:[#allocation2 + $0x6] ss:$8 sm:$0x7] }
 0x993   :  { %1439 = vmatpush1.bf16.msra.mxu1 %v4469_v50  ;;  %3713 = vmatpush3.bf16.msra.mxu0 %v4474_v51  ;;  %v4254_v50 = vld [vmem:[%s5732_s9 + $0x4] ss:$12 sps:$4 sm:$0xff]  }
 0x994   :  { %1440 = vmatprep.subr.bf16.mxu1 %v4479_v54  ;;  %3714 = vmatprep.subr.bf16.mxu0 %v4290_v0  ;;  %v1324_v51 = vld [vmem:[#allocation2 + $0x5] ss:$8 sm:$0x7] }
 0x995   :  { %1470 = vmatprep.mubr.bf16.mxu1 %v4292_v31  ;;  %3728 = vmatprep.mubr.msk.bf16.mxu0 %vm4291_vm1, %v4290_v0  ;;  %v1426_v52 = vrot.slane %v1324_v51, 2 }
 0x997   :  { %1441 = vmatpush1.bf16.msra.mxu1 %v4487_v57  ;;  %3715 = vmatpush3.bf16.msra.mxu0 %v4493_v58 }
 0x998   :  { %1442 = vmatprep.subr.bf16.mxu1 %v4499_v59  ;;  %3716 = vmatprep.subr.bf16.mxu0 %v4290_v0 }
 0x99b   :  { %1443 = vmatpush1.bf16.msra.mxu1 %v4511_v61  ;;  %3717 = vmatpush3.bf16.msra.mxu0 %v4517_v62 }
 0x99c   :  { %1444 = vmatprep.subr.bf16.mxu1 %v4523_v1  ;;  %3718 = vmatprep.subr.bf16.mxu0 %v4290_v0 }
 0x99f   :  { %1445 = vmatpush1.bf16.msra.mxu1 %v4530_v4  ;;  %3719 = vmatpush3.bf16.msra.mxu0 %v4536_v5 }
 0x9a0   :  { %1446 = vmatprep.subr.bf16.mxu1 %v4542_v6  ;;  %3720 = vmatprep.subr.bf16.mxu0 %v4290_v0 }
 0x9a3   :  { %1447 = vmatpush1.bf16.msra.mxu1 %v4549_v7  ;;  %3721 = vmatpush3.bf16.msra.mxu0 %v4555_v8  ;;  %v1415_v7 = vrot.slane %v1324_v51, 1 }
 0x9a4   :  { %1448 = vmatprep.subr.bf16.mxu1 %v4561_v9  ;;  %3722 = vmatprep.subr.bf16.mxu0 %v4290_v0 }
 0x9a7   :  { %1449 = vmatpush1.bf16.msra.mxu1 %v4568_v10  ;;  %3723 = vmatpush3.bf16.msra.mxu0 %v4574_v11 }
 0x9a8   :  { %1450 = vmatprep.subr.bf16.mxu1 %v4580_v12  ;;  %3724 = vmatprep.subr.bf16.mxu0 %v4290_v0 }
 0x9ab   :  { %1451 = vmatpush1.bf16.msra.mxu1 %v4587_v13  ;;  %3725 = vmatpush3.bf16.msra.mxu0 %v4593_v14 }
 0x9ac   :  { %1452 = vmatprep.subr.bf16.mxu1 %v4599_v15  ;;  %3726 = vmatprep.subr.bf16.mxu0 %v4290_v0 }
 0x9af   :  { %1453 = vmatpush1.bf16.msra.mxu1 %v4606_v16  ;;  %3727 = vmatpush3.bf16.msra.mxu0 %v4612_v17 }
 0x9b0   :  { %1550 = vmatprep.subr.bf16.mxu1 %v4254_v50  ;;  %3732 = vmatprep.subr.bf16.mxu0 %v4290_v0 }
 0xa65   :  { %v1360_v54 = vpop.f32.mrb[44].mxu1  ;;  %v1401_v57 = vpop.f32.mrb[32].mxu0 }
 0xa66   :  { %v1407_v58 = vadd.f32 %v1360_v54, %v1324_v51  ;;  %v1362_v59 = vpop.f32.mrb[45].mxu1  ;;  %v3710_v61 = vpop.f32.mrb[33].mxu0  ;;  %v1424_v13 = vadd.f32 %v1401_v57, %v4696_v34 }
 0xa67   :  { %v1364_v62 = vpop.f32.mrb[46].mxu1  ;;  %v1404_v1 = vpop.f32.mrb[34].mxu0  ;;  %v1417_v8 = vadd.f32 %v1415_v7, %v1362_v59 }
 0xa68   :  { %v3277_v4 = vmul.f32 -1.442695, %v1407_v58  ;;  %v1365_v5 = vpop.f32.mrb[47].mxu1  ;;  %v3711_v6 = vpop.f32.mrb[35].mxu0 }
 0xa69   :  { %v3278_v9 = vmul.f32 -1.442695, %v1417_v8 }
 0xa6a   :  { %4144 = vpow2.f32 %v3277_v4 }
 0xa6b   :  { %4146 = vpow2.f32 %v3278_v9 }
 0xa74   :  { %v4145_v10 = vpop.eup %4144 }
 0xa75   :  { %v1411_v11 = vadd.f32 1.0, %v4145_v10  ;;  %v4147_v12 = vpop.eup %4146 }
 0xa76   :  { %v1421_v48 = vadd.f32 1.0, %v4147_v12 }
 0xa77   :  { %4148 = vrcp.f32 %v1411_v11  ;;  %v1538_v11 = vrot.slane %v1436_v42, 2 }
 0xa81   :  { %v4149_v14 = vpop.eup %4148 }
 0xa82   :  { %v1425_v43 = vmul.f32 %v4149_v14, %v1424_v13 }
 0xa84   :  { %v1428_v47 = vadd.f32 %v1426_v52, %v1425_v43 }
 0xa86   :  { %4150 = vtanh.f32 %v1428_v47 }
 0xa87   :  { %4152 = vrcp.f32 %v1421_v48 }
 0xa90   :  { %v4151_v49 = vpop.eup %4150 }
 0xa91   :  { %v1430_v53 = vsub.f32 %v4871_v41, %v4151_v49  ;;  %v4153_v45 = vpop.eup %4152  ;;  %v4274_v41 = vld [vmem:[%s5732_s9 + $0x98] ss:$12 sps:$4 sm:$0xff]  }
 0xa93   :  { %v1431_v55 = vmul.f32 %v4153_v45, %v1430_v53  ;;  %v5013_v53 = vld [vmem:[%s5735_s11] ss:$12 sps:$4 sm:$0xff]   ;;  %v5019_v45 = vld [vmem:[%s5735_s11 + $0x1c] ss:$12 sps:$4 sm:$0xff]  }
 0xa95   :  { %v4916_v56 = vadd.f32 %v4151_v49, %v1431_v55  ;;  %v4024_v49 = vld [vmem:[%s5735_s11 + $0x4] ss:$12 sps:$4 sm:$0xff]  }
 0xa96   :  { %v5024_v55 = vld [vmem:[%s5735_s11 + $0x18] ss:$12 sps:$4 sm:$0xff]  }
 0xa97   :  { %1433 = vst [vmem:[#allocation3 + $0x5] sm:$0x1] %v4916_v56  ;;  %1434 = vst [vmem:[#allocation4 + $0x2] sm:$0x1] %v4916_v56  ;;  %v1437_v60 = vpack.c.bf16 %v4916_v56, %v4916_v56 }
 0xa99   :  { %1471 = vmatmul.mubr.bf16.vlgmr.msra.gmra.mrb[48].mxu1 %v1437_v60  ;;  %3729 = vmatmul.mubr.bf16.vlgmr.msra.gmra.mrb[36].mxu0 %v1437_v60  ;;  %v5036_v60 = vld [vmem:[%s5735_s11 + $0x30] ss:$12 sps:$4 sm:$0xff]  }
 0xa9a   :  { %1551 = vmatpush1.bf16.msra.mxu1 %v4255_v63  ;;  %3733 = vmatpush3.bf16.msra.mxu0 %v4256_v2  ;;  %v5043_v63 = vld [vmem:[%s5735_s11 + $0x4c] ss:$12 sps:$4 sm:$0xff]   ;;  %v5048_v2 = vld [vmem:[%s5735_s11 + $0x48] ss:$12 sps:$4 sm:$0xff]  }
 0xa9b   :  { %1552 = vmatprep.subr.bf16.mxu1 %v4257_v3  ;;  %3734 = vmatprep.subr.bf16.mxu0 %v4290_v0  ;;  %v5055_v3 = vld [vmem:[%s5735_s11 + $0x64] ss:$12 sps:$4 sm:$0xff]  }
 0xa9c   :  { %1582 = vmatprep.mubr.bf16.mxu1 %v4292_v31  ;;  %3748 = vmatprep.mubr.msk.bf16.mxu0 %vm4291_vm1, %v4290_v0 }
 0xa9e   :  { %1553 = vmatpush1.bf16.msra.mxu1 %v4258_v18  ;;  %3735 = vmatpush3.bf16.msra.mxu0 %v4259_v21  ;;  %v5060_v18 = vld [vmem:[%s5735_s11 + $0x60] ss:$12 sps:$4 sm:$0xff]   ;;  %v5066_v21 = vld [vmem:[%s5735_s11 + $0x7c] ss:$12 sps:$4 sm:$0xff]  }
 0xa9f   :  { %1554 = vmatprep.subr.bf16.mxu1 %v4260_v22  ;;  %3736 = vmatprep.subr.bf16.mxu0 %v4290_v0  ;;  %v5072_v22 = vld [vmem:[%s5735_s11 + $0x78] ss:$12 sps:$4 sm:$0xff]  }
 0xaa2   :  { %1555 = vmatpush1.bf16.msra.mxu1 %v4261_v24  ;;  %3737 = vmatpush3.bf16.msra.mxu0 %v4262_v46  ;;  %v5078_v24 = vld [vmem:[%s5735_s11 + $0x94] ss:$12 sps:$4 sm:$0xff]   ;;  %v5084_v46 = vld [vmem:[%s5735_s11 + $0x90] ss:$12 sps:$4 sm:$0xff]  }
 0xaa3   :  { %1556 = vmatprep.subr.bf16.mxu1 %v4263_v44  ;;  %3738 = vmatprep.subr.bf16.mxu0 %v4290_v0  ;;  %v5090_v44 = vld [vmem:[%s5735_s11 + $0xac] ss:$12 sps:$4 sm:$0xff]  }
 0xaa6   :  { %1557 = vmatpush1.bf16.msra.mxu1 %v4264_v26  ;;  %3739 = vmatpush3.bf16.msra.mxu0 %v4265_v27  ;;  %v5096_v26 = vld [vmem:[%s5735_s11 + $0xa8] ss:$12 sps:$4 sm:$0xff]  }
 0xaa7   :  { %1558 = vmatprep.subr.bf16.mxu1 %v4266_v29  ;;  %3740 = vmatprep.subr.bf16.mxu0 %v4290_v0  ;;  %v1548_v27 = vld [vmem:[#allocation2 + $0x7] ss:$8 sm:$0x7] }
 0xaaa   :  { %1559 = vmatpush1.bf16.msra.mxu1 %v4267_v32  ;;  %3741 = vmatpush3.bf16.msra.mxu0 %v4268_v35 }
 0xaab   :  { %1560 = vmatprep.subr.bf16.mxu1 %v4269_v36  ;;  %3742 = vmatprep.subr.bf16.mxu0 %v4290_v0 }
 0xaae   :  { %1561 = vmatpush1.bf16.msra.mxu1 %v4270_v37  ;;  %3743 = vmatpush3.bf16.msra.mxu0 %v4271_v38 }
 0xaaf   :  { %1562 = vmatprep.subr.bf16.mxu1 %v4272_v39  ;;  %3744 = vmatprep.subr.bf16.mxu0 %v4290_v0 }
 0xab2   :  { %1563 = vmatpush1.bf16.msra.mxu1 %v4273_v40  ;;  %3745 = vmatpush3.bf16.msra.mxu0 %v4274_v41 }
 0xab3   :  { %1564 = vmatprep.subr.bf16.mxu1 %v4599_v15  ;;  %3746 = vmatprep.subr.bf16.mxu0 %v4290_v0  ;;  %v1527_v15 = vrot.slane %v1436_v42, 1 }
 0xab6   :  { %1565 = vmatpush1.bf16.msra.mxu1 %v4606_v16  ;;  %3747 = vmatpush3.bf16.msra.mxu0 %v4612_v17 }
 0xab7   :  { %3752 = vmatprep.subr.bf16.mxu1 %v4290_v0  ;;  %1869 = vmatprep.subr.bf16.mxu0 %v4024_v49 }
 0xb6c   :  { %v1472_v50 = vpop.f32.mrb[48].mxu1  ;;  %v1513_v51 = vpop.f32.mrb[36].mxu0 }
 0xb6d   :  { %v1519_v54 = vadd.f32 %v1472_v50, %v1436_v42  ;;  %v1474_v57 = vpop.f32.mrb[49].mxu1  ;;  %v3730_v58 = vpop.f32.mrb[37].mxu0  ;;  %v1536_v8 = vadd.f32 %v1513_v51, %v4696_v34  ;;  %v1639_v50 = vrot.slane %v1548_v27, 1 }
 0xb6e   :  { %v1476_v59 = vpop.f32.mrb[50].mxu1  ;;  %v1516_v61 = vpop.f32.mrb[38].mxu0  ;;  %v1529_v5 = vadd.f32 %v1527_v15, %v1474_v57  ;;  %v1650_v15 = vrot.slane %v1548_v27, 2 }
 0xb6f   :  { %v3279_v62 = vmul.f32 -1.442695, %v1519_v54  ;;  %v1477_v1 = vpop.f32.mrb[51].mxu1  ;;  %v3731_v4 = vpop.f32.mrb[39].mxu0  ;;  %v4275_v61 = vld [vmem:[%s5734_s10] sm:$0x1] }
 0xb70   :  { %v3280_v6 = vmul.f32 -1.442695, %v1529_v5 }
 0xb71   :  { %4154 = vpow2.f32 %v3279_v62 }
 0xb72   :  { %4156 = vpow2.f32 %v3280_v6 }
 0xb7b   :  { %v4155_v16 = vpop.eup %4154 }
 0xb7c   :  { %v1523_v7 = vadd.f32 1.0, %v4155_v16  ;;  %v4157_v17 = vpop.eup %4156 }
 0xb7d   :  { %v1533_v13 = vadd.f32 1.0, %v4157_v17 }
 0xb7e   :  { %4158 = vrcp.f32 %v1523_v7 }
 0xb88   :  { %v4159_v9 = vpop.eup %4158 }
 0xb89   :  { %v1537_v10 = vmul.f32 %v4159_v9, %v1536_v8 }
 0xb8b   :  { %v1540_v12 = vadd.f32 %v1538_v11, %v1537_v10 }
 0xb8d   :  { %4160 = vtanh.f32 %v1540_v12 }
 0xb8e   :  { %4162 = vrcp.f32 %v1533_v13 }
 0xb97   :  { %v4161_v14 = vpop.eup %4160 }
 0xb98   :  { %v1542_v43 = vsub.f32 %v4916_v56, %v4161_v14  ;;  %v4163_v52 = vpop.eup %4162  ;;  %v5031_v56 = vld [vmem:[%s5735_s11 + $0x34] ss:$12 sps:$4 sm:$0xff]  }
 0xb9a   :  { %v1543_v47 = vmul.f32 %v4163_v52, %v1542_v43  ;;  %v4046_v43 = vld [vmem:[%s5735_s11 + $0x8] ss:$12 sps:$4 sm:$0xff]   ;;  %v4276_v52 = vld [vmem:[%s5731_s0] sm:$0xf] }
 0xb9c   :  { %v4998_v48 = vadd.f32 %v4161_v14, %v1543_v47  ;;  %v4047_v47 = vld [vmem:[%s5735_s11 + $0x20] ss:$12 sps:$4 sm:$0xff]  }
 0xb9e   :  { %1545 = vst [vmem:[#allocation3 + $0x6] sm:$0x1] %v4998_v48  ;;  %1546 = vst [vmem:[#allocation4 + $0x1] sm:$0x1] %v4998_v48  ;;  %v1549_v34 = vpack.c.bf16 %v4998_v48, %v4998_v48 }
 0xba0   :  { %1583 = vmatmul.mubr.bf16.vlgmr.msra.gmra.mrb[52].mxu1 %v1549_v34  ;;  %3749 = vmatmul.mubr.bf16.vlgmr.msra.gmra.mrb[40].mxu0 %v1549_v34  ;;  %v4049_v34 = vld [vmem:[%s5735_s11 + $0x50] ss:$12 sps:$4 sm:$0xff]  }
 0xba1   :  { %1901 = vmatprep.mubr.bf16.mxu0 %v4292_v31  ;;  %3754 = vmatprep.mubr.msk.bf16.mxu1 %vm4291_vm1, %v4290_v0 }
 0xba2   :  { %1870 = vmatpush1.bf16.msra.mxu0 %v5013_v53 }
 0xba3   :  { %1871 = vmatprep.subr.bf16.mxu0 %v5019_v45 }
 0xba6   :  { %1872 = vmatpush1.bf16.msra.mxu0 %v5024_v55 }
 0xba7   :  { %1873 = vmatprep.subr.bf16.mxu0 %v5031_v56 }
 0xbaa   :  { %1874 = vmatpush1.bf16.msra.mxu0 %v5036_v60 }
 0xbab   :  { %1875 = vmatprep.subr.bf16.mxu0 %v5043_v63 }
 0xbae   :  { %1876 = vmatpush1.bf16.msra.mxu0 %v5048_v2 }
 0xbaf   :  { %1877 = vmatprep.subr.bf16.mxu0 %v5055_v3 }
 0xbb2   :  { %1878 = vmatpush1.bf16.msra.mxu0 %v5060_v18 }
 0xbb3   :  { %1879 = vmatprep.subr.bf16.mxu0 %v5066_v21 }
 0xbb6   :  { %1880 = vmatpush1.bf16.msra.mxu0 %v5072_v22 }
 0xbb7   :  { %1881 = vmatprep.subr.bf16.mxu0 %v5078_v24 }
 0xbba   :  { %1882 = vmatpush1.bf16.msra.mxu0 %v5084_v46 }
 0xbbb   :  { %1883 = vmatprep.subr.bf16.mxu0 %v5090_v44 }
 0xbbe   :  { %1884 = vmatpush1.bf16.msra.mxu0 %v5096_v26 }
 0xbbf   :  { %1950 = vmatprep.subr.bf16.mxu0 %v4024_v49  ;;  %v4050_v49 = vld [vmem:[%s5735_s11 + $0x68] ss:$12 sps:$4 sm:$0xff]  }
 0xc73   :  { %v1584_v29 = vpop.f32.mrb[52].mxu1  ;;  %v1625_v32 = vpop.f32.mrb[40].mxu0 }
 0xc74   :  { %v1631_v35 = vadd.f32 %v1584_v29, %v1548_v27  ;;  %v1586_v36 = vpop.f32.mrb[53].mxu1  ;;  %v3750_v37 = vpop.f32.mrb[41].mxu0  ;;  %v1648_v62 = vadd.f32 %v4275_v61, %v1625_v32  ;;  %v5201_v29 = vld [vmem:[%s5736_s13 + $0x18] ss:$12 sps:$4 sm:$0xff]   ;;  %v5207_v32 = vld [vmem:[%s5736_s13 + $0x20] ss:$12 sps:$4 sm:$0xff]  }
 0xc75   :  { %v1588_v38 = vpop.f32.mrb[54].mxu1  ;;  %v1628_v39 = vpop.f32.mrb[42].mxu0  ;;  %v1641_v51 = vadd.f32 %v1639_v50, %v1586_v36  ;;  %v5223_v36 = vld [vmem:[%s5736_s13 + $0x30] ss:$12 sps:$4 sm:$0xff]   ;;  %v5229_v37 = vld [vmem:[%s5736_s13 + $0x38] ss:$12 sps:$4 sm:$0xff]  }
 0xc76   :  { %v3281_v40 = vmul.f32 -1.442695, %v1631_v35  ;;  %v1589_v41 = vpop.f32.mrb[55].mxu1  ;;  %v3751_v42 = vpop.f32.mrb[43].mxu0  ;;  %v5213_v35 = vld [vmem:[%s5736_s13 + $0x34] ss:$12 sps:$4 sm:$0xff]  }
 0xc77   :  { %v3282_v54 = vmul.f32 -1.442695, %v1641_v51  ;;  %v5235_v38 = vld [vmem:[%s5736_s13 + $0x4c] ss:$12 sps:$4 sm:$0xff]   ;;  %v5242_v39 = vld [vmem:[%s5736_s13 + $0x48] ss:$12 sps:$4 sm:$0xff]  }
 0xc78   :  { %4164 = vpow2.f32 %v3281_v40  ;;  %v5248_v40 = vld [vmem:[%s5736_s13 + $0x50] ss:$12 sps:$4 sm:$0xff]   ;;  %v5261_v42 = vld [vmem:[%s5736_s13 + $0x60] ss:$12 sps:$4 sm:$0xff]   ;;  %v5267_v50 = vld [vmem:[%s5736_s13 + $0x68] ss:$12 sps:$4 sm:$0xff]  }
 0xc79   :  { %4166 = vpow2.f32 %v3282_v54  ;;  %v5254_v41 = vld [vmem:[%s5736_s13 + $0x64] ss:$12 sps:$4 sm:$0xff]   ;;  %v5273_v51 = vld [vmem:[%s5736_s13 + $0x7c] ss:$12 sps:$4 sm:$0xff]  }
 0xc7a   :  { %v5280_v54 = vld [vmem:[%s5736_s13 + $0x78] ss:$12 sps:$4 sm:$0xff]  }
 0xc7b   :  { %v5305_v61 = vld [vmem:[%s5736_s13 + $0x98] ss:$12 sps:$4 sm:$0xff]  }
 0xc82   :  { %v4165_v57 = vpop.eup %4164 }
 0xc83   :  { %v1635_v58 = vadd.f32 1.0, %v4165_v57  ;;  %v4167_v59 = vpop.eup %4166  ;;  %v5286_v57 = vld [vmem:[%s5736_s13 + $0x80] ss:$12 sps:$4 sm:$0xff]  }
 0xc84   :  { %v1645_v6 = vadd.f32 1.0, %v4167_v59  ;;  %v5299_v59 = vld [vmem:[%s5736_s13 + $0x90] ss:$12 sps:$4 sm:$0xff]  }
 0xc85   :  { %4168 = vrcp.f32 %v1635_v58  ;;  %v5292_v58 = vld [vmem:[%s5736_s13 + $0x94] ss:$12 sps:$4 sm:$0xff]  }
 0xc8f   :  { %v4169_v1 = vpop.eup %4168 }
 0xc90   :  { %v1649_v4 = vmul.f32 %v4169_v1, %v1648_v62  ;;  %v5311_v62 = vld [vmem:[%s5736_s13 + $0xac] ss:$12 sps:$4 sm:$0xff]   ;;  %v5318_v1 = vld [vmem:[%s5736_s13 + $0xa8] ss:$12 sps:$4 sm:$0xff]  }
 0xc92   :  { %v1652_v5 = vadd.f32 %v1650_v15, %v1649_v4  ;;  %v5324_v4 = vld [vmem:[%s5736_s13 + $0xb0] ss:$12 sps:$4 sm:$0xff]  }
 0xc94   :  { %4170 = vtanh.f32 %v1652_v5 }
 0xc95   :  { %4172 = vrcp.f32 %v1645_v6 }
 0xc9e   :  { %v4171_v16 = vpop.eup %4170 }
 0xc9f   :  { %v1654_v7 = vsub.f32 %v4998_v48, %v4171_v16  ;;  %v4173_v17 = vpop.eup %4172  ;;  %v4048_v48 = vld [vmem:[%s5735_s11 + $0x38] ss:$12 sps:$4 sm:$0xff]  }
 0xca1   :  { %v1655_v8 = vmul.f32 %v4173_v17, %v1654_v7  ;;  %v2034_v7 = vld [vmem:[%s5737_s12] sm:$0x7] }
 0xca2   :  { %v2039_v17 = vrot.slane %v2034_v7, %v585_v23 }
 0xca3   :  { %v1656_v9 = vadd.f32 %v4171_v16, %v1655_v8  ;;  %v2047_v8 = vrot.slane %v2034_v7, %v593_v25 }
 0xca5   :  { %1657 = vst [vmem:[#allocation3 + $0x7] sm:$0x1] %v1656_v9  ;;  %1658 = vst [vmem:[#allocation4] sm:$0x1] %v1656_v9  ;;  %v2043_v9 = vrot.slane %v2034_v7, %v589_v28 }
 0xcac   :  { %v1659_v10 = vld [vmem:[#allocation3] sm:$0xff]  ;;  %v1660_v11 = vld [vmem:[#allocation4] sm:$0xff] }
 0xcad   :  { %v1663_v12 = vsel %vm97_vm7, %v1659_v10, %v1660_v11 }
 0xcae   :  { %v1664_v13 = vpack.c.bf16 %v1663_v12, %v1663_v12 }
 0xcb0   :  { %1902 = vmatmul.mubr.bf16.vlgmr.msra.gmra.mrb[44].mxu0 %v1664_v13  ;;  %v1666_v14 = vsel %vm166_vm3, %v1664_v13, 0 }
 0xcb1   :  { %3753 = vmatpush3.bf16.msra.mxu1 %v1666_v14  ;;  %1951 = vmatpush1.bf16.msra.mxu0 %v5013_v53  ;;  %v4051_v53 = vld [vmem:[%s5735_s11 + $0x80] ss:$12 sps:$4 sm:$0xff]  }
 0xcb2   :  { %3758 = vmatprep.subr.bf16.mxu1 %v4290_v0  ;;  %1952 = vmatprep.subr.bf16.mxu0 %v5019_v45  ;;  %v4052_v45 = vld [vmem:[%s5735_s11 + $0x98] ss:$12 sps:$4 sm:$0xff]  }
 0xcb3   :  { %1982 = vmatprep.mubr.bf16.mxu0 %v4292_v31 }
 0xcb4   :  { %3755 = vmatmul.mubr.msk.bf16.vlgmr.msra.gmra.mrb[56].mxu1 %vm162_vm4, %v4276_v52 }
 0xcb5   :  { %3759 = vmatpush3.bf16.msra.mxu1 %v4046_v43  ;;  %3774 = vmatprep.mubr.msk.bf16.mxu1 %vm4291_vm1, %v4290_v0 }
 0xcb6   :  { %3760 = vmatprep.subr.bf16.mxu1 %v4290_v0  ;;  %1953 = vmatpush1.bf16.msra.mxu0 %v5024_v55  ;;  %v4053_v55 = vld [vmem:[%s5735_s11 + $0xb0] ss:$12 sps:$4 sm:$0xff]  }
 0xcb7   :  { %1954 = vmatprep.subr.bf16.mxu0 %v5031_v56  ;;  %v5175_v56 = vld [vmem:[%s5736_s13 + $0x4] ss:$12 sps:$4 sm:$0xff]  }
 0xcb9   :  { %3761 = vmatpush3.bf16.msra.mxu1 %v4047_v47 }
 0xcba   :  { %3762 = vmatprep.subr.bf16.mxu1 %v4290_v0  ;;  %1955 = vmatpush1.bf16.msra.mxu0 %v5036_v60 }
 0xcbb   :  { %1956 = vmatprep.subr.bf16.mxu0 %v5043_v63 }
 0xcbd   :  { %3763 = vmatpush3.bf16.msra.mxu1 %v4048_v48 }
 0xcbe   :  { %3764 = vmatprep.subr.bf16.mxu1 %v4290_v0  ;;  %1957 = vmatpush1.bf16.msra.mxu0 %v5048_v2 }
 0xcbf   :  { %1958 = vmatprep.subr.bf16.mxu0 %v5055_v3 }
 0xcc1   :  { %3765 = vmatpush3.bf16.msra.mxu1 %v4049_v34 }
 0xcc2   :  { %3766 = vmatprep.subr.bf16.mxu1 %v4290_v0  ;;  %1959 = vmatpush1.bf16.msra.mxu0 %v5060_v18 }
 0xcc3   :  { %1960 = vmatprep.subr.bf16.mxu0 %v5066_v21  ;;  %v5185_v21 = vld [vmem:[%s5736_s13] ss:$12 sps:$4 sm:$0xff]  }
 0xcc5   :  { %3767 = vmatpush3.bf16.msra.mxu1 %v4050_v49 }
 0xcc6   :  { %3768 = vmatprep.subr.bf16.mxu1 %v4290_v0  ;;  %1961 = vmatpush1.bf16.msra.mxu0 %v5072_v22  ;;  %v5190_v22 = vld [vmem:[%s5736_s13 + $0x8] ss:$12 sps:$4 sm:$0xff]  }
 0xcc7   :  { %1962 = vmatprep.subr.bf16.mxu0 %v5078_v24 }
 0xcc9   :  { %3769 = vmatpush3.bf16.msra.mxu1 %v4051_v53 }
 0xcca   :  { %3770 = vmatprep.subr.bf16.mxu1 %v4290_v0  ;;  %1963 = vmatpush1.bf16.msra.mxu0 %v5084_v46 }
 0xccb   :  { %1964 = vmatprep.subr.bf16.mxu0 %v5090_v44  ;;  %v5195_v44 = vld [vmem:[%s5736_s13 + $0x1c] ss:$12 sps:$4 sm:$0xff]  }
 0xccd   :  { %3771 = vmatpush3.bf16.msra.mxu1 %v4052_v45 }
 0xcce   :  { %3772 = vmatprep.subr.bf16.mxu1 %v4290_v0  ;;  %1965 = vmatpush1.bf16.msra.mxu0 %v5096_v26 }
 0xccf   :  { %2219 = vmatprep.subr.bf16.mxu0 %v5175_v56 }
 0xcd1   :  { %3773 = vmatpush3.bf16.msra.mxu1 %v4053_v55 }
 0xcd2   :  { %3778 = vmatprep.subr.bf16.mxu1 %v4290_v0 }
 0xcd4   :  { %3775 = vmatmul.mubr.bf16.vlgmr.msra.gmra.mrb[60].mxu1 %v1664_v13 }
 0xcd5   :  { %3779 = vmatpush3.bf16.msra.mxu1 %v4046_v43  ;;  %3794 = vmatprep.mubr.msk.bf16.mxu1 %vm4291_vm1, %v4290_v0 }
 0xcd6   :  { %3780 = vmatprep.subr.bf16.mxu1 %v4290_v0 }
 0xcd9   :  { %3781 = vmatpush3.bf16.msra.mxu1 %v4047_v47 }
 0xcda   :  { %3782 = vmatprep.subr.bf16.mxu1 %v4290_v0 }
 0xcdd   :  { %3783 = vmatpush3.bf16.msra.mxu1 %v4048_v48 }
 0xcde   :  { %3784 = vmatprep.subr.bf16.mxu1 %v4290_v0 }
 0xce1   :  { %3785 = vmatpush3.bf16.msra.mxu1 %v4049_v34 }
 0xce2   :  { %3786 = vmatprep.subr.bf16.mxu1 %v4290_v0 }
 0xce5   :  { %3787 = vmatpush3.bf16.msra.mxu1 %v4050_v49 }
 0xce6   :  { %3788 = vmatprep.subr.bf16.mxu1 %v4290_v0 }
 0xce9   :  { %3789 = vmatpush3.bf16.msra.mxu1 %v4051_v53 }
 0xcea   :  { %3790 = vmatprep.subr.bf16.mxu1 %v4290_v0 }
 0xced   :  { %3791 = vmatpush3.bf16.msra.mxu1 %v4052_v45 }
 0xcee   :  { %3792 = vmatprep.subr.bf16.mxu1 %v4290_v0 }
 0xcf1   :  { %3793 = vmatpush3.bf16.msra.mxu1 %v4053_v55 }
 0xcf2   :  { %3798 = vmatprep.subr.bf16.mxu1 %v4290_v0 }
 0xd83   :  { %v5178_v60 = vpop.f32.mrb[44].mxu0 }
 0xd84   :  { %v5180_v63 = vpop.f32.mrb[45].mxu0 }
 0xd85   :  { %v1907_v2 = vpop.f32.mrb[46].mxu0 }
 0xd86   :  { %v1908_v3 = vpop.f32.mrb[47].mxu0 }
 0xd87   :  { %v1702_v18 = vpop.f32.mrb[56].mxu1 }
 0xd88   :  { %v1708_v24 = vpack.c.bf16 %v1702_v18, %v1702_v18  ;;  %v3756_v46 = vpop.f32.mrb[57].mxu1 }
 0xd89   :  { %v1705_v26 = vpop.f32.mrb[58].mxu1 }
 0xd8a   :  { %1983 = vmatmul.mubr.bf16.vlgmr.msra.gmra.mrb[48].mxu0 %v1708_v24  ;;  %3795 = vmatmul.mubr.bf16.vlgmr.msra.gmra.mrb[64].mxu1 %v1708_v24  ;;  %v3757_v27 = vpop.f32.mrb[59].mxu1 }
 0xd8b   :  { %2220 = vmatpush1.bf16.msra.mxu0 %v5185_v21  ;;  %3799 = vmatpush3.bf16.msra.mxu1 %v5190_v22 }
 0xd8c   :  { %2221 = vmatprep.subr.bf16.mxu0 %v5195_v44  ;;  %3800 = vmatprep.subr.bf16.mxu1 %v4290_v0 }
 0xd8d   :  { %2251 = vmatprep.mubr.bf16.mxu0 %v4292_v31  ;;  %3814 = vmatprep.mubr.msk.bf16.mxu1 %vm4291_vm1, %v4290_v0 }
 0xd8f   :  { %2222 = vmatpush1.bf16.msra.mxu0 %v5201_v29  ;;  %3801 = vmatpush3.bf16.msra.mxu1 %v5207_v32 }
 0xd90   :  { %2223 = vmatprep.subr.bf16.mxu0 %v5213_v35  ;;  %3802 = vmatprep.subr.bf16.mxu1 %v4290_v0 }
 0xd93   :  { %2224 = vmatpush1.bf16.msra.mxu0 %v5223_v36  ;;  %3803 = vmatpush3.bf16.msra.mxu1 %v5229_v37 }
 0xd94   :  { %2225 = vmatprep.subr.bf16.mxu0 %v5235_v38  ;;  %3804 = vmatprep.subr.bf16.mxu1 %v4290_v0 }
 0xd97   :  { %2226 = vmatpush1.bf16.msra.mxu0 %v5242_v39  ;;  %3805 = vmatpush3.bf16.msra.mxu1 %v5248_v40 }
 0xd98   :  { %2227 = vmatprep.subr.bf16.mxu0 %v5254_v41  ;;  %3806 = vmatprep.subr.bf16.mxu1 %v4290_v0 }
 0xd9b   :  { %2228 = vmatpush1.bf16.msra.mxu0 %v5261_v42  ;;  %3807 = vmatpush3.bf16.msra.mxu1 %v5267_v50 }
 0xd9c   :  { %2229 = vmatprep.subr.bf16.mxu0 %v5273_v51  ;;  %3808 = vmatprep.subr.bf16.mxu1 %v4290_v0 }
 0xd9f   :  { %2230 = vmatpush1.bf16.msra.mxu0 %v5280_v54  ;;  %3809 = vmatpush3.bf16.msra.mxu1 %v5286_v57 }
 0xda0   :  { %2231 = vmatprep.subr.bf16.mxu0 %v5292_v58  ;;  %3810 = vmatprep.subr.bf16.mxu1 %v4290_v0 }
 0xda3   :  { %2232 = vmatpush1.bf16.msra.mxu0 %v5299_v59  ;;  %3811 = vmatpush3.bf16.msra.mxu1 %v5305_v61 }
 0xda4   :  { %2233 = vmatprep.subr.bf16.mxu0 %v5311_v62  ;;  %3812 = vmatprep.subr.bf16.mxu1 %v4290_v0 }
 0xda7   :  { %2234 = vmatpush1.bf16.msra.mxu0 %v5318_v1  ;;  %v1944_v15 = vpop.f32.mrb[60].mxu1  ;;  %3813 = vmatpush3.bf16.msra.mxu1 %v5324_v4 }
 0xda8   :  { %v3776_v5 = vpop.f32.mrb[61].mxu1  ;;  %2330 = vmatprep.subr.bf16.mxu0 %v5175_v56  ;;  %3818 = vmatprep.subr.bf16.mxu1 %v4290_v0 }
 0xda9   :  { %v1947_v6 = vpop.f32.mrb[62].mxu1  ;;  %v5389_v5 = vld [vmem:[%s5738_s14] sm:$0x1] }
 0xdaa   :  { %2252 = vmatmul.mubr.bf16.vlgmr.msra.gmra.mrb[52].mxu0 %v4292_v31  ;;  %v3777_v16 = vpop.f32.mrb[63].mxu1  ;;  %3815 = vmatmul.mubr.bf16.vlgmr.msra.gmra.mrb[68].mxu1 %v4292_v31 }
 0xdab   :  { %2331 = vmatpush1.bf16.msra.mxu0 %v5185_v21  ;;  %3819 = vmatpush3.bf16.msra.mxu1 %v5190_v22 }
 0xdac   :  { %2332 = vmatprep.subr.bf16.mxu0 %v5195_v44  ;;  %3820 = vmatprep.subr.bf16.mxu1 %v4290_v0 }
 0xdad   :  { %2362 = vmatprep.mubr.bf16.mxu0 %v4292_v31  ;;  %3834 = vmatprep.mubr.msk.bf16.mxu1 %vm4291_vm1, %v4290_v0 }
 0xdaf   :  { %2333 = vmatpush1.bf16.msra.mxu0 %v5201_v29  ;;  %3821 = vmatpush3.bf16.msra.mxu1 %v5207_v32 }
 0xdb0   :  { %2334 = vmatprep.subr.bf16.mxu0 %v5213_v35  ;;  %3822 = vmatprep.subr.bf16.mxu1 %v4290_v0 }
 0xdb3   :  { %2335 = vmatpush1.bf16.msra.mxu0 %v5223_v36  ;;  %3823 = vmatpush3.bf16.msra.mxu1 %v5229_v37 }
 0xdb4   :  { %2336 = vmatprep.subr.bf16.mxu0 %v5235_v38  ;;  %3824 = vmatprep.subr.bf16.mxu1 %v4290_v0 }
 0xdb7   :  { %2337 = vmatpush1.bf16.msra.mxu0 %v5242_v39  ;;  %3825 = vmatpush3.bf16.msra.mxu1 %v5248_v40 }
 0xdb8   :  { %2338 = vmatprep.subr.bf16.mxu0 %v5254_v41  ;;  %3826 = vmatprep.subr.bf16.mxu1 %v4290_v0 }
 0xdbb   :  { %2339 = vmatpush1.bf16.msra.mxu0 %v5261_v42  ;;  %3827 = vmatpush3.bf16.msra.mxu1 %v5267_v50 }
 0xdbc   :  { %2340 = vmatprep.subr.bf16.mxu0 %v5273_v51  ;;  %3828 = vmatprep.subr.bf16.mxu1 %v4290_v0 }
 0xdbf   :  { %2341 = vmatpush1.bf16.msra.mxu0 %v5280_v54  ;;  %3829 = vmatpush3.bf16.msra.mxu1 %v5286_v57 }
 0xdc0   :  { %2342 = vmatprep.subr.bf16.mxu0 %v5292_v58  ;;  %3830 = vmatprep.subr.bf16.mxu1 %v4290_v0 }
 0xdc3   :  { %2343 = vmatpush1.bf16.msra.mxu0 %v5299_v59  ;;  %3831 = vmatpush3.bf16.msra.mxu1 %v5305_v61 }
 0xdc4   :  { %2344 = vmatprep.subr.bf16.mxu0 %v5311_v62  ;;  %3832 = vmatprep.subr.bf16.mxu1 %v4290_v0 }
 0xdc7   :  { %2345 = vmatpush1.bf16.msra.mxu0 %v5318_v1  ;;  %3833 = vmatpush3.bf16.msra.mxu1 %v5324_v4 }
 0xdc8   :  { %2441 = vmatprep.subr.bf16.mxu0 %v5175_v56  ;;  %3838 = vmatprep.subr.bf16.mxu1 %v4290_v0 }
 0xe5d   :  { %v1984_v10 = vpop.f32.mrb[48].mxu0  ;;  %v2025_v11 = vpop.f32.mrb[64].mxu1 }
 0xe5e   :  { %v2031_v12 = vsel %vm97_vm7, %v5178_v60, %v1984_v10  ;;  %v2033_v13 = vsel %vm4672_vm8, %v1944_v15, %v2025_v11  ;;  %v1986_v14 = vpop.f32.mrb[49].mxu0  ;;  %v3796_v43 = vpop.f32.mrb[65].mxu1 }
 0xe5f   :  { %v2051_v52 = vadd.f32 %v2039_v17, %v2031_v12  ;;  %v2053_v47 = vadd.f32 %v2047_v8, %v2033_v13  ;;  %v2032_v23 = vsel %vm4678_vm9, %v5180_v63, %v1986_v14  ;;  %v1988_v25 = vpop.f32.mrb[50].mxu0  ;;  %v2028_v20 = vpop.f32.mrb[66].mxu1 }
 0xe60   :  { %v2052_v28 = vadd.f32 %v2043_v9, %v2032_v23  ;;  %v1989_v48 = vpop.f32.mrb[51].mxu0  ;;  %v3797_v34 = vpop.f32.mrb[67].mxu1 }
 0xe61   :  { %2054 = vst [vmem:[#allocation2] sm:$0xff] %v2051_v52  ;;  %2056 = vst [vmem:[#allocation2 + $0x10] sm:$0xff] %v2053_v47 }
 0xe62   :  { %2055 = vst [vmem:[#allocation2 + $0x8] sm:$0xff] %v2052_v28 }
 0xe69   :  { %v2090_v49 = vld [vmem:[#allocation2] ss:$8 sm:$0x7]  ;;  %v2328_v47 = vld [vmem:[#allocation2 + $0x1] ss:$8 sm:$0x7] }
 0xe6a   :  { %v2308_v63 = vrot.slane %v2090_v49, 1  ;;  %v2319_v17 = vrot.slane %v2090_v49, 2 }
 0xe7d   :  { %v2253_v53 = vpop.f32.mrb[52].mxu0  ;;  %v2294_v30 = vpop.f32.mrb[68].mxu1 }
 0xe7e   :  { %v2300_v45 = vadd.f32 %v2253_v53, %v2090_v49  ;;  %v2255_v55 = vpop.f32.mrb[53].mxu0  ;;  %v3816_v60 = vpop.f32.mrb[69].mxu1  ;;  %v2317_v6 = vadd.f32 %v2294_v30, %v5389_v5 }
 0xe7f   :  { %v2257_v2 = vpop.f32.mrb[54].mxu0  ;;  %v2297_v3 = vpop.f32.mrb[70].mxu1  ;;  %v2310_v46 = vadd.f32 %v2308_v63, %v2255_v55  ;;  %v2419_v55 = vrot.slane %v2328_v47, 1 }
 0xe80   :  { %v3332_v18 = vmul.f32 -1.442695, %v2300_v45  ;;  %v2258_v24 = vpop.f32.mrb[55].mxu0  ;;  %v3817_v33 = vpop.f32.mrb[71].mxu1 }
 0xe81   :  { %v3333_v26 = vmul.f32 -1.442695, %v2310_v46  ;;  %v2430_v46 = vrot.slane %v2328_v47, 2 }
 0xe82   :  { %4174 = vpow2.f32 %v3332_v18 }
 0xe83   :  { %4176 = vpow2.f32 %v3333_v26 }
 0xe8c   :  { %v4175_v27 = vpop.eup %4174 }
 0xe8d   :  { %v2304_v15 = vadd.f32 1.0, %v4175_v27  ;;  %v4177_v16 = vpop.eup %4176 }
 0xe8e   :  { %v2314_v9 = vadd.f32 1.0, %v4177_v16 }
 0xe8f   :  { %4178 = vrcp.f32 %v2304_v15 }
 0xe99   :  { %v4179_v7 = vpop.eup %4178 }
 0xe9a   :  { %v2318_v8 = vmul.f32 %v4179_v7, %v2317_v6 }
 0xe9c   :  { %v2321_v10 = vadd.f32 %v2319_v17, %v2318_v8 }
 0xe9e   :  { %4180 = vtanh.f32 %v2321_v10  ;;  %v2439_v10 = vld [vmem:[#allocation2 + $0x2] ss:$8 sm:$0x7] }
 0xe9f   :  { %4182 = vrcp.f32 %v2314_v9 }
 0xea8   :  { %v4181_v11 = vpop.eup %4180 }
 0xea9   :  { %v2323_v12 = vsub.f32 0.0, %v4181_v11  ;;  %v4183_v13 = vpop.eup %4182 }
 0xeab   :  { %v2324_v14 = vmul.f32 %v4183_v13, %v2323_v12 }
 0xead   :  { %v5392_v43 = vadd.f32 %v4181_v11, %v2324_v14 }
 0xeaf   :  { %2326 = vst [vmem:[#allocation3] sm:$0x1] %v5392_v43  ;;  %2327 = vst [vmem:[#allocation4 + $0x7] sm:$0x1] %v5392_v43  ;;  %v2329_v52 = vpack.c.bf16 %v5392_v43, %v5392_v43 }
 0xeb1   :  { %2363 = vmatmul.mubr.bf16.vlgmr.msra.gmra.mrb[56].mxu0 %v2329_v52  ;;  %3835 = vmatmul.mubr.bf16.vlgmr.msra.gmra.mrb[72].mxu1 %v2329_v52 }
 0xeb2   :  { %2442 = vmatpush1.bf16.msra.mxu0 %v5185_v21  ;;  %3839 = vmatpush3.bf16.msra.mxu1 %v5190_v22 }
 0xeb3   :  { %2443 = vmatprep.subr.bf16.mxu0 %v5195_v44  ;;  %3840 = vmatprep.subr.bf16.mxu1 %v4290_v0 }
 0xeb4   :  { %2473 = vmatprep.mubr.bf16.mxu0 %v4292_v31  ;;  %3854 = vmatprep.mubr.msk.bf16.mxu1 %vm4291_vm1, %v4290_v0 }
 0xeb6   :  { %2444 = vmatpush1.bf16.msra.mxu0 %v5201_v29  ;;  %3841 = vmatpush3.bf16.msra.mxu1 %v5207_v32 }
 0xeb7   :  { %2445 = vmatprep.subr.bf16.mxu0 %v5213_v35  ;;  %3842 = vmatprep.subr.bf16.mxu1 %v4290_v0 }
 0xeba   :  { %2446 = vmatpush1.bf16.msra.mxu0 %v5223_v36  ;;  %3843 = vmatpush3.bf16.msra.mxu1 %v5229_v37 }
 0xebb   :  { %2447 = vmatprep.subr.bf16.mxu0 %v5235_v38  ;;  %3844 = vmatprep.subr.bf16.mxu1 %v4290_v0 }
 0xebe   :  { %2448 = vmatpush1.bf16.msra.mxu0 %v5242_v39  ;;  %3845 = vmatpush3.bf16.msra.mxu1 %v5248_v40 }
 0xebf   :  { %2449 = vmatprep.subr.bf16.mxu0 %v5254_v41  ;;  %3846 = vmatprep.subr.bf16.mxu1 %v4290_v0 }
 0xec2   :  { %2450 = vmatpush1.bf16.msra.mxu0 %v5261_v42  ;;  %3847 = vmatpush3.bf16.msra.mxu1 %v5267_v50 }
 0xec3   :  { %2451 = vmatprep.subr.bf16.mxu0 %v5273_v51  ;;  %3848 = vmatprep.subr.bf16.mxu1 %v4290_v0 }
 0xec6   :  { %2452 = vmatpush1.bf16.msra.mxu0 %v5280_v54  ;;  %3849 = vmatpush3.bf16.msra.mxu1 %v5286_v57 }
 0xec7   :  { %2453 = vmatprep.subr.bf16.mxu0 %v5292_v58  ;;  %3850 = vmatprep.subr.bf16.mxu1 %v4290_v0 }
 0xeca   :  { %2454 = vmatpush1.bf16.msra.mxu0 %v5299_v59  ;;  %3851 = vmatpush3.bf16.msra.mxu1 %v5305_v61 }
 0xecb   :  { %2455 = vmatprep.subr.bf16.mxu0 %v5311_v62  ;;  %3852 = vmatprep.subr.bf16.mxu1 %v4290_v0 }
 0xece   :  { %2456 = vmatpush1.bf16.msra.mxu0 %v5318_v1  ;;  %3853 = vmatpush3.bf16.msra.mxu1 %v5324_v4 }
 0xecf   :  { %2552 = vmatprep.subr.bf16.mxu0 %v5175_v56  ;;  %3858 = vmatprep.subr.bf16.mxu1 %v4290_v0 }
 0xf84   :  { %v2364_v23 = vpop.f32.mrb[56].mxu0  ;;  %v2405_v25 = vpop.f32.mrb[72].mxu1 }
 0xf85   :  { %v2411_v20 = vadd.f32 %v2364_v23, %v2328_v47  ;;  %v2366_v28 = vpop.f32.mrb[57].mxu0  ;;  %v3836_v48 = vpop.f32.mrb[73].mxu1  ;;  %v2428_v33 = vadd.f32 %v2405_v25, %v5389_v5 }
 0xf86   :  { %v2368_v34 = vpop.f32.mrb[58].mxu0  ;;  %v2408_v49 = vpop.f32.mrb[74].mxu1  ;;  %v2421_v60 = vadd.f32 %v2419_v55, %v2366_v28  ;;  %v2530_v28 = vrot.slane %v2439_v10, 1 }
 0xf87   :  { %v3334_v53 = vmul.f32 -1.442695, %v2411_v20  ;;  %v2369_v30 = vpop.f32.mrb[59].mxu0  ;;  %v3837_v45 = vpop.f32.mrb[75].mxu1 }
 0xf88   :  { %v3335_v2 = vmul.f32 -1.442695, %v2421_v60  ;;  %v2541_v60 = vrot.slane %v2439_v10, 2 }
 0xf89   :  { %4184 = vpow2.f32 %v3334_v53 }
 0xf8a   :  { %4186 = vpow2.f32 %v3335_v2 }
 0xf93   :  { %v4185_v3 = vpop.eup %4184 }
 0xf94   :  { %v2415_v18 = vadd.f32 1.0, %v4185_v3  ;;  %v4187_v24 = vpop.eup %4186 }
 0xf95   :  { %v2425_v15 = vadd.f32 1.0, %v4187_v24 }
 0xf96   :  { %4188 = vrcp.f32 %v2415_v18 }
 0xfa0   :  { %v4189_v63 = vpop.eup %4188 }
 0xfa1   :  { %v2429_v26 = vmul.f32 %v4189_v63, %v2428_v33 }
 0xfa3   :  { %v2432_v27 = vadd.f32 %v2430_v46, %v2429_v26 }
 0xfa5   :  { %4190 = vtanh.f32 %v2432_v27 }
 0xfa6   :  { %4192 = vrcp.f32 %v2425_v15  ;;  %v2550_v15 = vld [vmem:[#allocation2 + $0x3] ss:$8 sm:$0x7] }
 0xfaf   :  { %v4191_v6 = vpop.eup %4190 }
 0xfb0   :  { %v2434_v16 = vsub.f32 %v5392_v43, %v4191_v6  ;;  %v4193_v7 = vpop.eup %4192 }
 0xfb2   :  { %v2435_v17 = vmul.f32 %v4193_v7, %v2434_v16 }
 0xfb4   :  { %v5435_v8 = vadd.f32 %v4191_v6, %v2435_v17 }
 0xfb6   :  { %2437 = vst [vmem:[#allocation3 + $0x1] sm:$0x1] %v5435_v8  ;;  %2438 = vst [vmem:[#allocation4 + $0x6] sm:$0x1] %v5435_v8  ;;  %v2440_v9 = vpack.c.bf16 %v5435_v8, %v5435_v8 }
 0xfb8   :  { %2474 = vmatmul.mubr.bf16.vlgmr.msra.gmra.mrb[60].mxu0 %v2440_v9  ;;  %3855 = vmatmul.mubr.bf16.vlgmr.msra.gmra.mrb[76].mxu1 %v2440_v9 }
 0xfb9   :  { %2553 = vmatpush1.bf16.msra.mxu0 %v5185_v21  ;;  %3859 = vmatpush3.bf16.msra.mxu1 %v5190_v22 }
 0xfba   :  { %2554 = vmatprep.subr.bf16.mxu0 %v5195_v44  ;;  %3860 = vmatprep.subr.bf16.mxu1 %v4290_v0 }
 0xfbb   :  { %2584 = vmatprep.mubr.bf16.mxu0 %v4292_v31  ;;  %3874 = vmatprep.mubr.msk.bf16.mxu1 %vm4291_vm1, %v4290_v0 }
 0xfbd   :  { %2555 = vmatpush1.bf16.msra.mxu0 %v5201_v29  ;;  %3861 = vmatpush3.bf16.msra.mxu1 %v5207_v32 }
 0xfbe   :  { %2556 = vmatprep.subr.bf16.mxu0 %v5213_v35  ;;  %3862 = vmatprep.subr.bf16.mxu1 %v4290_v0 }
 0xfc1   :  { %2557 = vmatpush1.bf16.msra.mxu0 %v5223_v36  ;;  %3863 = vmatpush3.bf16.msra.mxu1 %v5229_v37 }
 0xfc2   :  { %2558 = vmatprep.subr.bf16.mxu0 %v5235_v38  ;;  %3864 = vmatprep.subr.bf16.mxu1 %v4290_v0 }
 0xfc5   :  { %2559 = vmatpush1.bf16.msra.mxu0 %v5242_v39  ;;  %3865 = vmatpush3.bf16.msra.mxu1 %v5248_v40 }
 0xfc6   :  { %2560 = vmatprep.subr.bf16.mxu0 %v5254_v41  ;;  %3866 = vmatprep.subr.bf16.mxu1 %v4290_v0 }
 0xfc9   :  { %2561 = vmatpush1.bf16.msra.mxu0 %v5261_v42  ;;  %3867 = vmatpush3.bf16.msra.mxu1 %v5267_v50 }
 0xfca   :  { %2562 = vmatprep.subr.bf16.mxu0 %v5273_v51  ;;  %3868 = vmatprep.subr.bf16.mxu1 %v4290_v0 }
 0xfcd   :  { %2563 = vmatpush1.bf16.msra.mxu0 %v5280_v54  ;;  %3869 = vmatpush3.bf16.msra.mxu1 %v5286_v57 }
 0xfce   :  { %2564 = vmatprep.subr.bf16.mxu0 %v5292_v58  ;;  %3870 = vmatprep.subr.bf16.mxu1 %v4290_v0 }
 0xfd1   :  { %2565 = vmatpush1.bf16.msra.mxu0 %v5299_v59  ;;  %3871 = vmatpush3.bf16.msra.mxu1 %v5305_v61 }
 0xfd2   :  { %2566 = vmatprep.subr.bf16.mxu0 %v5311_v62  ;;  %3872 = vmatprep.subr.bf16.mxu1 %v4290_v0 }
 0xfd5   :  { %2567 = vmatpush1.bf16.msra.mxu0 %v5318_v1  ;;  %3873 = vmatpush3.bf16.msra.mxu1 %v5324_v4 }
 0xfd6   :  { %2663 = vmatprep.subr.bf16.mxu0 %v5175_v56  ;;  %3878 = vmatprep.subr.bf16.mxu1 %v4290_v0 }
0x108b   :  { %v2475_v11 = vpop.f32.mrb[60].mxu0  ;;  %v2516_v12 = vpop.f32.mrb[76].mxu1 }
0x108c   :  { %v2522_v13 = vadd.f32 %v2475_v11, %v2439_v10  ;;  %v2477_v14 = vpop.f32.mrb[61].mxu0  ;;  %v3856_v43 = vpop.f32.mrb[77].mxu1  ;;  %v2539_v45 = vadd.f32 %v2516_v12, %v5389_v5 }
0x108d   :  { %v2479_v52 = vpop.f32.mrb[62].mxu0  ;;  %v2519_v47 = vpop.f32.mrb[78].mxu1  ;;  %v2532_v48 = vadd.f32 %v2530_v28, %v2477_v14  ;;  %v2641_v14 = vrot.slane %v2550_v15, 1 }
0x108e   :  { %v3336_v23 = vmul.f32 -1.442695, %v2522_v13  ;;  %v2480_v25 = vpop.f32.mrb[63].mxu0  ;;  %v3857_v20 = vpop.f32.mrb[79].mxu1 }
0x108f   :  { %v3337_v34 = vmul.f32 -1.442695, %v2532_v48  ;;  %v2652_v48 = vrot.slane %v2550_v15, 2 }
0x1090   :  { %4194 = vpow2.f32 %v3336_v23 }
0x1091   :  { %4196 = vpow2.f32 %v3337_v34 }
0x109a   :  { %v4195_v49 = vpop.eup %4194 }
0x109b   :  { %v2526_v53 = vadd.f32 1.0, %v4195_v49  ;;  %v4197_v30 = vpop.eup %4196 }
0x109c   :  { %v2536_v18 = vadd.f32 1.0, %v4197_v30 }
0x109d   :  { %4198 = vrcp.f32 %v2526_v53 }
0x10a7   :  { %v4199_v55 = vpop.eup %4198 }
0x10a8   :  { %v2540_v2 = vmul.f32 %v4199_v55, %v2539_v45 }
0x10aa   :  { %v2543_v3 = vadd.f32 %v2541_v60, %v2540_v2 }
0x10ac   :  { %4200 = vtanh.f32 %v2543_v3 }
0x10ad   :  { %4202 = vrcp.f32 %v2536_v18  ;;  %v2661_v18 = vld [vmem:[#allocation2 + $0x4] ss:$8 sm:$0x7] }
0x10b6   :  { %v4201_v24 = vpop.eup %4200 }
0x10b7   :  { %v2545_v33 = vsub.f32 %v5435_v8, %v4201_v24  ;;  %v4203_v63 = vpop.eup %4202 }
0x10b9   :  { %v2546_v46 = vmul.f32 %v4203_v63, %v2545_v33 }
0x10bb   :  { %v5478_v26 = vadd.f32 %v4201_v24, %v2546_v46 }
0x10bd   :  { %2548 = vst [vmem:[#allocation3 + $0x2] sm:$0x1] %v5478_v26  ;;  %2549 = vst [vmem:[#allocation4 + $0x5] sm:$0x1] %v5478_v26  ;;  %v2551_v27 = vpack.c.bf16 %v5478_v26, %v5478_v26 }
0x10bf   :  { %2585 = vmatmul.mubr.bf16.vlgmr.msra.gmra.mrb[64].mxu0 %v2551_v27  ;;  %3875 = vmatmul.mubr.bf16.vlgmr.msra.gmra.mrb[80].mxu1 %v2551_v27 }
0x10c0   :  { %2664 = vmatpush1.bf16.msra.mxu0 %v5185_v21  ;;  %3879 = vmatpush3.bf16.msra.mxu1 %v5190_v22 }
0x10c1   :  { %2665 = vmatprep.subr.bf16.mxu0 %v5195_v44  ;;  %3880 = vmatprep.subr.bf16.mxu1 %v4290_v0 }
0x10c2   :  { %2695 = vmatprep.mubr.bf16.mxu0 %v4292_v31  ;;  %3894 = vmatprep.mubr.msk.bf16.mxu1 %vm4291_vm1, %v4290_v0 }
0x10c4   :  { %2666 = vmatpush1.bf16.msra.mxu0 %v5201_v29  ;;  %3881 = vmatpush3.bf16.msra.mxu1 %v5207_v32 }
0x10c5   :  { %2667 = vmatprep.subr.bf16.mxu0 %v5213_v35  ;;  %3882 = vmatprep.subr.bf16.mxu1 %v4290_v0 }
0x10c8   :  { %2668 = vmatpush1.bf16.msra.mxu0 %v5223_v36  ;;  %3883 = vmatpush3.bf16.msra.mxu1 %v5229_v37 }
0x10c9   :  { %2669 = vmatprep.subr.bf16.mxu0 %v5235_v38  ;;  %3884 = vmatprep.subr.bf16.mxu1 %v4290_v0 }
0x10cc   :  { %2670 = vmatpush1.bf16.msra.mxu0 %v5242_v39  ;;  %3885 = vmatpush3.bf16.msra.mxu1 %v5248_v40 }
0x10cd   :  { %2671 = vmatprep.subr.bf16.mxu0 %v5254_v41  ;;  %3886 = vmatprep.subr.bf16.mxu1 %v4290_v0 }
0x10d0   :  { %2672 = vmatpush1.bf16.msra.mxu0 %v5261_v42  ;;  %3887 = vmatpush3.bf16.msra.mxu1 %v5267_v50 }
0x10d1   :  { %2673 = vmatprep.subr.bf16.mxu0 %v5273_v51  ;;  %3888 = vmatprep.subr.bf16.mxu1 %v4290_v0 }
0x10d4   :  { %2674 = vmatpush1.bf16.msra.mxu0 %v5280_v54  ;;  %3889 = vmatpush3.bf16.msra.mxu1 %v5286_v57 }
0x10d5   :  { %2675 = vmatprep.subr.bf16.mxu0 %v5292_v58  ;;  %3890 = vmatprep.subr.bf16.mxu1 %v4290_v0 }
0x10d8   :  { %2676 = vmatpush1.bf16.msra.mxu0 %v5299_v59  ;;  %3891 = vmatpush3.bf16.msra.mxu1 %v5305_v61 }
0x10d9   :  { %2677 = vmatprep.subr.bf16.mxu0 %v5311_v62  ;;  %3892 = vmatprep.subr.bf16.mxu1 %v4290_v0 }
0x10dc   :  { %2678 = vmatpush1.bf16.msra.mxu0 %v5318_v1  ;;  %3893 = vmatpush3.bf16.msra.mxu1 %v5324_v4 }
0x10dd   :  { %2774 = vmatprep.subr.bf16.mxu0 %v5175_v56  ;;  %3898 = vmatprep.subr.bf16.mxu1 %v4290_v0 }
0x1192   :  { %v2586_v6 = vpop.f32.mrb[64].mxu0  ;;  %v2627_v16 = vpop.f32.mrb[80].mxu1 }
0x1193   :  { %v2633_v7 = vadd.f32 %v2586_v6, %v2550_v15  ;;  %v2588_v17 = vpop.f32.mrb[65].mxu0  ;;  %v3876_v8 = vpop.f32.mrb[81].mxu1  ;;  %v2650_v20 = vadd.f32 %v2627_v16, %v5389_v5 }
0x1194   :  { %v2590_v9 = vpop.f32.mrb[66].mxu0  ;;  %v2630_v10 = vpop.f32.mrb[82].mxu1  ;;  %v2643_v43 = vadd.f32 %v2641_v14, %v2588_v17  ;;  %v2752_v17 = vrot.slane %v2661_v18, 1  ;;  %v2763_v14 = vrot.slane %v2661_v18, 2 }
0x1195   :  { %v3338_v11 = vmul.f32 -1.442695, %v2633_v7  ;;  %v2591_v12 = vpop.f32.mrb[67].mxu0  ;;  %v3877_v13 = vpop.f32.mrb[83].mxu1 }
0x1196   :  { %v3339_v52 = vmul.f32 -1.442695, %v2643_v43 }
0x1197   :  { %4204 = vpow2.f32 %v3338_v11 }
0x1198   :  { %4206 = vpow2.f32 %v3339_v52 }
0x11a1   :  { %v4205_v47 = vpop.eup %4204 }
0x11a2   :  { %v2637_v23 = vadd.f32 1.0, %v4205_v47  ;;  %v4207_v25 = vpop.eup %4206 }
0x11a3   :  { %v2647_v53 = vadd.f32 1.0, %v4207_v25 }
0x11a4   :  { %4208 = vrcp.f32 %v2637_v23 }
0x11ae   :  { %v4209_v28 = vpop.eup %4208 }
0x11af   :  { %v2651_v34 = vmul.f32 %v4209_v28, %v2650_v20 }
0x11b1   :  { %v2654_v49 = vadd.f32 %v2652_v48, %v2651_v34 }
0x11b3   :  { %4210 = vtanh.f32 %v2654_v49 }
0x11b4   :  { %4212 = vrcp.f32 %v2647_v53 }
0x11bd   :  { %v4211_v30 = vpop.eup %4210 }
0x11be   :  { %v2656_v45 = vsub.f32 %v5478_v26, %v4211_v30  ;;  %v4213_v55 = vpop.eup %4212 }
0x11c0   :  { %v2657_v60 = vmul.f32 %v4213_v55, %v2656_v45 }
0x11c2   :  { %v5521_v2 = vadd.f32 %v4211_v30, %v2657_v60 }
0x11c4   :  { %2659 = vst [vmem:[#allocation3 + $0x3] sm:$0x1] %v5521_v2  ;;  %2660 = vst [vmem:[#allocation4 + $0x4] sm:$0x1] %v5521_v2  ;;  %v2662_v3 = vpack.c.bf16 %v5521_v2, %v5521_v2 }
0x11c6   :  { %2696 = vmatmul.mubr.bf16.vlgmr.msra.gmra.mrb[68].mxu0 %v2662_v3  ;;  %3895 = vmatmul.mubr.bf16.vlgmr.msra.gmra.mrb[84].mxu1 %v2662_v3 }
0x11c7   :  { %2775 = vmatpush1.bf16.msra.mxu0 %v5185_v21  ;;  %3899 = vmatpush3.bf16.msra.mxu1 %v5190_v22 }
0x11c8   :  { %2776 = vmatprep.subr.bf16.mxu0 %v5195_v44  ;;  %3900 = vmatprep.subr.bf16.mxu1 %v4290_v0 }
0x11c9   :  { %2806 = vmatprep.mubr.bf16.mxu0 %v4292_v31  ;;  %3914 = vmatprep.mubr.msk.bf16.mxu1 %vm4291_vm1, %v4290_v0 }
0x11cb   :  { %2777 = vmatpush1.bf16.msra.mxu0 %v5201_v29  ;;  %3901 = vmatpush3.bf16.msra.mxu1 %v5207_v32 }
0x11cc   :  { %2778 = vmatprep.subr.bf16.mxu0 %v5213_v35  ;;  %3902 = vmatprep.subr.bf16.mxu1 %v4290_v0 }
0x11cf   :  { %2779 = vmatpush1.bf16.msra.mxu0 %v5223_v36  ;;  %3903 = vmatpush3.bf16.msra.mxu1 %v5229_v37 }
0x11d0   :  { %2780 = vmatprep.subr.bf16.mxu0 %v5235_v38  ;;  %3904 = vmatprep.subr.bf16.mxu1 %v4290_v0 }
0x11d3   :  { %2781 = vmatpush1.bf16.msra.mxu0 %v5242_v39  ;;  %3905 = vmatpush3.bf16.msra.mxu1 %v5248_v40 }
0x11d4   :  { %2782 = vmatprep.subr.bf16.mxu0 %v5254_v41  ;;  %3906 = vmatprep.subr.bf16.mxu1 %v4290_v0 }
0x11d7   :  { %2783 = vmatpush1.bf16.msra.mxu0 %v5261_v42  ;;  %3907 = vmatpush3.bf16.msra.mxu1 %v5267_v50 }
0x11d8   :  { %2784 = vmatprep.subr.bf16.mxu0 %v5273_v51  ;;  %3908 = vmatprep.subr.bf16.mxu1 %v4290_v0 }
0x11db   :  { %2785 = vmatpush1.bf16.msra.mxu0 %v5280_v54  ;;  %3909 = vmatpush3.bf16.msra.mxu1 %v5286_v57 }
0x11dc   :  { %2786 = vmatprep.subr.bf16.mxu0 %v5292_v58  ;;  %3910 = vmatprep.subr.bf16.mxu1 %v4290_v0 }
0x11df   :  { %2787 = vmatpush1.bf16.msra.mxu0 %v5299_v59  ;;  %3911 = vmatpush3.bf16.msra.mxu1 %v5305_v61 }
0x11e0   :  { %2788 = vmatprep.subr.bf16.mxu0 %v5311_v62  ;;  %3912 = vmatprep.subr.bf16.mxu1 %v4290_v0 }
0x11e3   :  { %2789 = vmatpush1.bf16.msra.mxu0 %v5318_v1  ;;  %3913 = vmatpush3.bf16.msra.mxu1 %v5324_v4 }
0x11e4   :  { %2885 = vmatprep.subr.bf16.mxu0 %v5175_v56  ;;  %3918 = vmatprep.subr.bf16.mxu1 %v4290_v0 }
0x1299   :  { %v2697_v24 = vpop.f32.mrb[68].mxu0  ;;  %v2738_v33 = vpop.f32.mrb[84].mxu1 }
0x129a   :  { %v2744_v63 = vadd.f32 %v2697_v24, %v2661_v18  ;;  %v2699_v46 = vpop.f32.mrb[69].mxu0  ;;  %v3896_v26 = vpop.f32.mrb[85].mxu1  ;;  %v2761_v12 = vadd.f32 %v2738_v33, %v5389_v5 }
0x129b   :  { %v2701_v27 = vpop.f32.mrb[70].mxu0  ;;  %v2741_v15 = vpop.f32.mrb[86].mxu1  ;;  %v2754_v8 = vadd.f32 %v2752_v17, %v2699_v46  ;;  %v4278_v17 = vld [vmem:[%s5736_s13] ss:$12 sps:$4 sm:$0xff]  }
0x129c   :  { %v3340_v6 = vmul.f32 -1.442695, %v2744_v63  ;;  %v2702_v16 = vpop.f32.mrb[71].mxu0  ;;  %v3897_v7 = vpop.f32.mrb[87].mxu1 }
0x129d   :  { %v3341_v9 = vmul.f32 -1.442695, %v2754_v8  ;;  %v4279_v8 = vld [vmem:[%s5736_s13 + $0x8] ss:$12 sps:$4 sm:$0xff]  }
0x129e   :  { %4214 = vpow2.f32 %v3340_v6 }
0x129f   :  { %4216 = vpow2.f32 %v3341_v9  ;;  %v4280_v9 = vld [vmem:[%s5736_s13 + $0x1c] ss:$12 sps:$4 sm:$0xff]  }
0x12a8   :  { %v4215_v10 = vpop.eup %4214 }
0x12a9   :  { %v2748_v11 = vadd.f32 1.0, %v4215_v10  ;;  %v4217_v56 = vpop.eup %4216  ;;  %v4281_v10 = vld [vmem:[%s5736_s13 + $0x18] ss:$12 sps:$4 sm:$0xff]  }
0x12aa   :  { %v2758_v47 = vadd.f32 1.0, %v4217_v56  ;;  %v4283_v56 = vld [vmem:[%s5736_s13 + $0x34] ss:$12 sps:$4 sm:$0xff]  }
0x12ab   :  { %4218 = vrcp.f32 %v2748_v11  ;;  %v4282_v11 = vld [vmem:[%s5736_s13 + $0x20] ss:$12 sps:$4 sm:$0xff]  }
0x12b5   :  { %v4219_v13 = vpop.eup %4218 }
0x12b6   :  { %v2762_v43 = vmul.f32 %v4219_v13, %v2761_v12  ;;  %v4285_v12 = vld [vmem:[%s5736_s13 + $0x38] ss:$12 sps:$4 sm:$0xff]  }
0x12b7   :  { %v4286_v13 = vld [vmem:[%s5736_s13 + $0x4c] ss:$12 sps:$4 sm:$0xff]  }
0x12b8   :  { %v2765_v52 = vadd.f32 %v2763_v14, %v2762_v43  ;;  %v4287_v14 = vld [vmem:[%s5736_s13 + $0x48] ss:$12 sps:$4 sm:$0xff]   ;;  %v4288_v43 = vld [vmem:[%s5736_s13 + $0x50] ss:$12 sps:$4 sm:$0xff]  }
0x12ba   :  { %4220 = vtanh.f32 %v2765_v52 }
0x12bb   :  { %4222 = vrcp.f32 %v2758_v47 }
0x12c4   :  { %v4221_v23 = vpop.eup %4220 }
0x12c5   :  { %v2767_v25 = vsub.f32 %v5521_v2, %v4221_v23  ;;  %v4223_v20 = vpop.eup %4222 }
0x12c7   :  { %v2768_v28 = vmul.f32 %v4223_v20, %v2767_v25 }
0x12c9   :  { %v5564_v48 = vadd.f32 %v4221_v23, %v2768_v28 }
0x12cb   :  { %2770 = vst [vmem:[#allocation3 + $0x4] sm:$0x1] %v5564_v48  ;;  %2771 = vst [vmem:[#allocation4 + $0x3] sm:$0x1] %v5564_v48  ;;  %v2773_v34 = vpack.c.bf16 %v5564_v48, %v5564_v48 }
0x12cd   :  { %2807 = vmatmul.mubr.bf16.vlgmr.msra.gmra.mrb[72].mxu0 %v2773_v34  ;;  %3915 = vmatmul.mubr.bf16.vlgmr.msra.gmra.mrb[88].mxu1 %v2773_v34 }
0x12ce   :  { %2886 = vmatpush1.bf16.msra.mxu0 %v5185_v21  ;;  %3919 = vmatpush3.bf16.msra.mxu1 %v5190_v22  ;;  %v4277_v21 = vld [vmem:[%s5736_s13 + $0x4] ss:$12 sps:$4 sm:$0xff]  }
0x12cf   :  { %2887 = vmatprep.subr.bf16.mxu0 %v5195_v44  ;;  %3920 = vmatprep.subr.bf16.mxu1 %v4290_v0  ;;  %v2772_v22 = vld [vmem:[#allocation2 + $0x5] ss:$8 sm:$0x7] }
0x12d0   :  { %2917 = vmatprep.mubr.bf16.mxu0 %v4292_v31  ;;  %3934 = vmatprep.mubr.msk.bf16.mxu1 %vm4291_vm1, %v4290_v0  ;;  %v2863_v53 = vrot.slane %v2772_v22, 1  ;;  %v2874_v24 = vrot.slane %v2772_v22, 2 }
0x12d2   :  { %2888 = vmatpush1.bf16.msra.mxu0 %v5201_v29  ;;  %3921 = vmatpush3.bf16.msra.mxu1 %v5207_v32 }
0x12d3   :  { %2889 = vmatprep.subr.bf16.mxu0 %v5213_v35  ;;  %3922 = vmatprep.subr.bf16.mxu1 %v4290_v0 }
0x12d6   :  { %2890 = vmatpush1.bf16.msra.mxu0 %v5223_v36  ;;  %3923 = vmatpush3.bf16.msra.mxu1 %v5229_v37 }
0x12d7   :  { %2891 = vmatprep.subr.bf16.mxu0 %v5235_v38  ;;  %3924 = vmatprep.subr.bf16.mxu1 %v4290_v0 }
0x12da   :  { %2892 = vmatpush1.bf16.msra.mxu0 %v5242_v39  ;;  %3925 = vmatpush3.bf16.msra.mxu1 %v5248_v40 }
0x12db   :  { %2893 = vmatprep.subr.bf16.mxu0 %v5254_v41  ;;  %3926 = vmatprep.subr.bf16.mxu1 %v4290_v0 }
0x12de   :  { %2894 = vmatpush1.bf16.msra.mxu0 %v5261_v42  ;;  %3927 = vmatpush3.bf16.msra.mxu1 %v5267_v50 }
0x12df   :  { %2895 = vmatprep.subr.bf16.mxu0 %v5273_v51  ;;  %3928 = vmatprep.subr.bf16.mxu1 %v4290_v0 }
0x12e2   :  { %2896 = vmatpush1.bf16.msra.mxu0 %v5280_v54  ;;  %3929 = vmatpush3.bf16.msra.mxu1 %v5286_v57 }
0x12e3   :  { %2897 = vmatprep.subr.bf16.mxu0 %v5292_v58  ;;  %3930 = vmatprep.subr.bf16.mxu1 %v4290_v0 }
0x12e6   :  { %2898 = vmatpush1.bf16.msra.mxu0 %v5299_v59  ;;  %3931 = vmatpush3.bf16.msra.mxu1 %v5305_v61 }
0x12e7   :  { %2899 = vmatprep.subr.bf16.mxu0 %v5311_v62  ;;  %3932 = vmatprep.subr.bf16.mxu1 %v4290_v0 }
0x12ea   :  { %2900 = vmatpush1.bf16.msra.mxu0 %v5318_v1  ;;  %3933 = vmatpush3.bf16.msra.mxu1 %v5324_v4 }
0x12eb   :  { %2996 = vmatprep.subr.bf16.mxu0 %v4277_v21  ;;  %3938 = vmatprep.subr.bf16.mxu1 %v4290_v0 }
0x13a0   :  { %v2808_v44 = vpop.f32.mrb[72].mxu0  ;;  %v2849_v29 = vpop.f32.mrb[88].mxu1 }
0x13a1   :  { %v2855_v32 = vadd.f32 %v2808_v44, %v2772_v22  ;;  %v2810_v35 = vpop.f32.mrb[73].mxu0  ;;  %v3916_v36 = vpop.f32.mrb[89].mxu1  ;;  %v2872_v3 = vadd.f32 %v2849_v29, %v5389_v5 }
0x13a2   :  { %v2812_v37 = vpop.f32.mrb[74].mxu0  ;;  %v2852_v38 = vpop.f32.mrb[90].mxu1  ;;  %v2865_v30 = vadd.f32 %v2863_v53, %v2810_v35  ;;  %v4090_v53 = vld [vmem:[%s5739_s15 + $0x20] sm:$0xff]  }
0x13a3   :  { %v3342_v39 = vmul.f32 -1.442695, %v2855_v32  ;;  %v2813_v40 = vpop.f32.mrb[75].mxu0  ;;  %v3917_v49 = vpop.f32.mrb[91].mxu1  ;;  %v4086_v38 = vld [vmem:[%s5739_s15] sm:$0xff]  }
0x13a4   :  { %v3343_v45 = vmul.f32 -1.442695, %v2865_v30  ;;  %v4088_v40 = vld [vmem:[%s5739_s15 + $0x10] sm:$0xff]   ;;  %v4089_v49 = vld [vmem:[%s5739_s15 + $0x18] sm:$0xff]   ;;  %v4091_v30 = vld [vmem:[%s5739_s15 + $0x28] sm:$0xff]  }
0x13a5   :  { %4224 = vpow2.f32 %v3342_v39  ;;  %v4087_v39 = vld [vmem:[%s5739_s15 + $0x8] sm:$0xff]  }
0x13a6   :  { %4226 = vpow2.f32 %v3343_v45  ;;  %v4092_v45 = vld [vmem:[%s5739_s15 + $0x30] sm:$0xff]  }
0x13af   :  { %v4225_v55 = vpop.eup %4224 }
0x13b0   :  { %v2859_v60 = vadd.f32 1.0, %v4225_v55  ;;  %v4227_v2 = vpop.eup %4226  ;;  %v4093_v55 = vld [vmem:[%s5739_s15 + $0x38] sm:$0xff]  }
0x13b1   :  { %v2869_v46 = vadd.f32 1.0, %v4227_v2 }
0x13b2   :  { %4228 = vrcp.f32 %v2859_v60  ;;  %v2994_v60 = vld [vmem:[#allocation2 + $0x7] ss:$8 sm:$0x7] }
0x13bc   :  { %v4229_v18 = vpop.eup %4228 }
0x13bd   :  { %v2873_v33 = vmul.f32 %v4229_v18, %v2872_v3 }
0x13bf   :  { %v2876_v63 = vadd.f32 %v2874_v24, %v2873_v33 }
0x13c1   :  { %4230 = vtanh.f32 %v2876_v63 }
0x13c2   :  { %4232 = vrcp.f32 %v2869_v46 }
0x13cb   :  { %v4231_v26 = vpop.eup %4230 }
0x13cc   :  { %v2878_v27 = vsub.f32 %v5564_v48, %v4231_v26  ;;  %v4233_v15 = vpop.eup %4232 }
0x13ce   :  { %v2879_v6 = vmul.f32 %v4233_v15, %v2878_v27 }
0x13d0   :  { %v5609_v16 = vadd.f32 %v4231_v26, %v2879_v6  ;;  %v3085_v6 = vrot.slane %v2994_v60, 1 }
0x13d2   :  { %2881 = vst [vmem:[#allocation3 + $0x5] sm:$0x1] %v5609_v16  ;;  %2882 = vst [vmem:[#allocation4 + $0x2] sm:$0x1] %v5609_v16  ;;  %v2884_v7 = vpack.c.bf16 %v5609_v16, %v5609_v16 }
0x13d4   :  { %2918 = vmatmul.mubr.bf16.vlgmr.msra.gmra.mrb[76].mxu0 %v2884_v7  ;;  %3935 = vmatmul.mubr.bf16.vlgmr.msra.gmra.mrb[92].mxu1 %v2884_v7 }
0x13d5   :  { %2997 = vmatpush1.bf16.msra.mxu0 %v4278_v17  ;;  %3939 = vmatpush3.bf16.msra.mxu1 %v4279_v8 }
0x13d6   :  { %2998 = vmatprep.subr.bf16.mxu0 %v4280_v9  ;;  %3940 = vmatprep.subr.bf16.mxu1 %v4290_v0  ;;  %v4289_v9 = vld [vmem:[%s5738_s14] sm:$0x1] }
0x13d7   :  { %3028 = vmatprep.mubr.bf16.mxu0 %v4292_v31  ;;  %3954 = vmatprep.mubr.msk.bf16.mxu1 %vm4291_vm1, %v4290_v0  ;;  %v4284_v31 = vld [vmem:[%s5736_s13 + $0x30] ss:$12 sps:$4 sm:$0xff]  }
0x13d9   :  { %2999 = vmatpush1.bf16.msra.mxu0 %v4281_v10  ;;  %3941 = vmatpush3.bf16.msra.mxu1 %v4282_v11 }
0x13da   :  { %3000 = vmatprep.subr.bf16.mxu0 %v4283_v56  ;;  %3942 = vmatprep.subr.bf16.mxu1 %v4290_v0  ;;  %v3096_v56 = vrot.slane %v2994_v60, 2 }
0x13dd   :  { %3001 = vmatpush1.bf16.msra.mxu0 %v4284_v31  ;;  %3943 = vmatpush3.bf16.msra.mxu1 %v4285_v12 }
0x13de   :  { %3002 = vmatprep.subr.bf16.mxu0 %v4286_v13  ;;  %3944 = vmatprep.subr.bf16.mxu1 %v4290_v0 }
0x13e1   :  { %3003 = vmatpush1.bf16.msra.mxu0 %v4287_v14  ;;  %3945 = vmatpush3.bf16.msra.mxu1 %v4288_v43 }
0x13e2   :  { %3004 = vmatprep.subr.bf16.mxu0 %v5254_v41  ;;  %3946 = vmatprep.subr.bf16.mxu1 %v4290_v0  ;;  %v2883_v41 = vld [vmem:[#allocation2 + $0x6] ss:$8 sm:$0x7] }
0x13e3   :  { %v2985_v34 = vrot.slane %v2883_v41, 2 }
0x13e5   :  { %3005 = vmatpush1.bf16.msra.mxu0 %v5261_v42  ;;  %3947 = vmatpush3.bf16.msra.mxu1 %v5267_v50 }
0x13e6   :  { %3006 = vmatprep.subr.bf16.mxu0 %v5273_v51  ;;  %3948 = vmatprep.subr.bf16.mxu1 %v4290_v0 }
0x13e9   :  { %3007 = vmatpush1.bf16.msra.mxu0 %v5280_v54  ;;  %3949 = vmatpush3.bf16.msra.mxu1 %v5286_v57 }
0x13ea   :  { %3008 = vmatprep.subr.bf16.mxu0 %v5292_v58  ;;  %3950 = vmatprep.subr.bf16.mxu1 %v4290_v0 }
0x13ed   :  { %3009 = vmatpush1.bf16.msra.mxu0 %v5299_v59  ;;  %3951 = vmatpush3.bf16.msra.mxu1 %v5305_v61 }
0x13ee   :  { %3010 = vmatprep.subr.bf16.mxu0 %v5311_v62  ;;  %3952 = vmatprep.subr.bf16.mxu1 %v4290_v0  ;;  %v2974_v62 = vrot.slane %v2883_v41, 1 }
0x13f1   :  { %3011 = vmatpush1.bf16.msra.mxu0 %v5318_v1  ;;  %3953 = vmatpush3.bf16.msra.mxu1 %v5324_v4 }
0x13f2   :  { %3958 = vmatprep.subr.bf16.mxu0 %v4290_v0 }
0x14a7   :  { %v2919_v42 = vpop.f32.mrb[76].mxu0  ;;  %v2960_v50 = vpop.f32.mrb[92].mxu1 }
0x14a8   :  { %v2966_v51 = vadd.f32 %v2919_v42, %v2883_v41  ;;  %v2921_v54 = vpop.f32.mrb[77].mxu0  ;;  %v3936_v57 = vpop.f32.mrb[93].mxu1  ;;  %v2983_v28 = vadd.f32 %v2960_v50, %v5389_v5 }
0x14a9   :  { %v2923_v58 = vpop.f32.mrb[78].mxu0  ;;  %v2963_v59 = vpop.f32.mrb[94].mxu1  ;;  %v2976_v23 = vadd.f32 %v2974_v62, %v2921_v54 }
0x14aa   :  { %v3344_v52 = vmul.f32 -1.442695, %v2966_v51  ;;  %v2924_v61 = vpop.f32.mrb[79].mxu0  ;;  %v3937_v47 = vpop.f32.mrb[95].mxu1  ;;  %v3348_v59 = vld [vmem:[%s5740_s16] ss:$0 sm:$0xff] }
0x14ab   :  { %v3345_v25 = vmul.f32 -1.442695, %v2976_v23 }
0x14ac   :  { %4234 = vpow2.f32 %v3344_v52 }
0x14ad   :  { %4236 = vpow2.f32 %v3345_v25 }
0x14b6   :  { %v4235_v1 = vpop.eup %4234 }
0x14b7   :  { %v2970_v20 = vadd.f32 1.0, %v4235_v1  ;;  %v4237_v4 = vpop.eup %4236 }
0x14b8   :  { %v2980_v44 = vadd.f32 1.0, %v4237_v4 }
0x14b9   :  { %4238 = vrcp.f32 %v2970_v20 }
0x14c3   :  { %v4239_v48 = vpop.eup %4238 }
0x14c4   :  { %v2984_v21 = vmul.f32 %v4239_v48, %v2983_v28 }
0x14c6   :  { %v2987_v22 = vadd.f32 %v2985_v34, %v2984_v21 }
0x14c8   :  { %4240 = vtanh.f32 %v2987_v22 }
0x14c9   :  { %4242 = vrcp.f32 %v2980_v44 }
0x14d2   :  { %v4241_v29 = vpop.eup %4240 }
0x14d3   :  { %v2989_v32 = vsub.f32 %v5609_v16, %v4241_v29  ;;  %v4243_v35 = vpop.eup %4242 }
0x14d5   :  { %v2990_v36 = vmul.f32 %v4243_v35, %v2989_v32 }
0x14d7   :  { %v5673_v37 = vadd.f32 %v4241_v29, %v2990_v36 }
0x14d9   :  { %2992 = vst [vmem:[#allocation3 + $0x6] sm:$0x1] %v5673_v37  ;;  %2993 = vst [vmem:[#allocation4 + $0x1] sm:$0x1] %v5673_v37  ;;  %v2995_v5 = vpack.c.bf16 %v5673_v37, %v5673_v37 }
0x14db   :  { %3029 = vmatmul.mubr.bf16.vlgmr.msra.gmra.mrb[80].mxu0 %v2995_v5  ;;  %3955 = vmatmul.mubr.bf16.vlgmr.msra.gmra.mrb[96].mxu1 %v2995_v5 }
0x14dc   :  { %3974 = vmatprep.mubr.msk.bf16.mxu0 %vm4291_vm1, %v4290_v0  ;;  %3959 = vmatpush3.bf16.msra.mxu0 %v4086_v38 }
0x14dd   :  { %3960 = vmatprep.subr.bf16.mxu0 %v4290_v0 }
0x14e0   :  { %3961 = vmatpush3.bf16.msra.mxu0 %v4087_v39 }
0x14e1   :  { %3962 = vmatprep.subr.bf16.mxu0 %v4290_v0 }
0x14e4   :  { %3963 = vmatpush3.bf16.msra.mxu0 %v4088_v40 }
0x14e5   :  { %3964 = vmatprep.subr.bf16.mxu0 %v4290_v0 }
0x14e8   :  { %3965 = vmatpush3.bf16.msra.mxu0 %v4089_v49 }
0x14e9   :  { %3966 = vmatprep.subr.bf16.mxu0 %v4290_v0 }
0x14ec   :  { %3967 = vmatpush3.bf16.msra.mxu0 %v4090_v53 }
0x14ed   :  { %3968 = vmatprep.subr.bf16.mxu0 %v4290_v0 }
0x14f0   :  { %3969 = vmatpush3.bf16.msra.mxu0 %v4091_v30 }
0x14f1   :  { %3970 = vmatprep.subr.bf16.mxu0 %v4290_v0 }
0x14f4   :  { %3971 = vmatpush3.bf16.msra.mxu0 %v4092_v45 }
0x14f5   :  { %3972 = vmatprep.subr.bf16.mxu0 %v4290_v0 }
0x14f8   :  { %3973 = vmatpush3.bf16.msra.mxu0 %v4093_v55 }
0x15ae   :  { %v3030_v2 = vpop.f32.mrb[80].mxu0  ;;  %v3071_v3 = vpop.f32.mrb[96].mxu1 }
0x15af   :  { %v3077_v18 = vadd.f32 %v3030_v2, %v2994_v60  ;;  %v3032_v24 = vpop.f32.mrb[81].mxu0  ;;  %v3956_v33 = vpop.f32.mrb[97].mxu1  ;;  %v3094_v10 = vadd.f32 %v4289_v9, %v3071_v3 }
0x15b0   :  { %v3034_v63 = vpop.f32.mrb[82].mxu0  ;;  %v3074_v46 = vpop.f32.mrb[98].mxu1  ;;  %v3087_v16 = vadd.f32 %v3085_v6, %v3032_v24 }
0x15b1   :  { %v3346_v26 = vmul.f32 -1.442695, %v3077_v18  ;;  %v3035_v27 = vpop.f32.mrb[83].mxu0  ;;  %v3957_v15 = vpop.f32.mrb[99].mxu1 }
0x15b2   :  { %v3347_v7 = vmul.f32 -1.442695, %v3087_v16 }
0x15b3   :  { %4244 = vpow2.f32 %v3346_v26 }
0x15b4   :  { %4246 = vpow2.f32 %v3347_v7 }
0x15bd   :  { %v4245_v17 = vpop.eup %4244 }
0x15be   :  { %v3081_v8 = vadd.f32 1.0, %v4245_v17  ;;  %v4247_v0 = vpop.eup %4246 }
0x15bf   :  { %v3091_v13 = vadd.f32 1.0, %v4247_v0 }
0x15c0   :  { %4248 = vrcp.f32 %v3081_v8 }
0x15ca   :  { %v4249_v11 = vpop.eup %4248 }
0x15cb   :  { %v3095_v31 = vmul.f32 %v4249_v11, %v3094_v10 }
0x15cd   :  { %v3098_v12 = vadd.f32 %v3096_v56, %v3095_v31 }
0x15cf   :  { %4250 = vtanh.f32 %v3098_v12 }
0x15d0   :  { %4252 = vrcp.f32 %v3091_v13 }
0x15d9   :  { %v4251_v14 = vpop.eup %4250 }
0x15da   :  { %v3100_v43 = vsub.f32 %v5673_v37, %v4251_v14  ;;  %v4253_v41 = vpop.eup %4252 }
0x15dc   :  { %v3101_v42 = vmul.f32 %v4253_v41, %v3100_v43 }
0x15de   :  { %v3102_v50 = vadd.f32 %v4251_v14, %v3101_v42 }
0x15e0   :  { %3103 = vst [vmem:[#allocation3 + $0x7] sm:$0x1] %v3102_v50  ;;  %3104 = vst [vmem:[#allocation4] sm:$0x1] %v3102_v50 }
0x15e7   :  { %v3105_v51 = vld [vmem:[#allocation3] sm:$0xff]  ;;  %v3106_v54 = vld [vmem:[#allocation4] sm:$0xff] }
0x15e8   :  { %v3107_v57 = vsel %vm97_vm7, %v3105_v51, %v3106_v54 }
0x15e9   :  { %v3108_v58 = vpack.c.bf16 %v3107_v57, %v3107_v57 }
0x15eb   :  { %3975 = vmatmul.mubr.bf16.vlgmr.msra.gmra.mrb[84].mxu0 %v3108_v58 }
0x16be   :  { %v3214_v52 = vpop.f32.mrb[84].mxu0 }
0x16bf   :  { %v3215_v61 = vadd.f32 %v3348_v59, %v3214_v52  ;;  %v3976_v47 = vpop.f32.mrb[85].mxu0 }
0x16c0   :  { %v3217_v62 = vpop.f32.mrb[86].mxu0 }
0x16c1   :  { %3220 = vst [vmem:[%s5741_s17] sm:$0xff] %v3215_v61  ;;  %v3977_v23 = vpop.f32.mrb[87].mxu0 }

</bundles_post_ra>
